<compile_context>
chip_gen: v7x
topology: tpu7x:2x2x1
jax: 0.10.0
libtpu: 0.0.40
codegen_flags: <defaults>
</compile_context>

<pallas_src>
import functools

import jax
import jax.numpy as jnp
from jax.experimental import pallas as pl
from jax.experimental.pallas import tpu as pltpu

LANE = 128      # TPU lane width
SUBLANE = 8     # f32 sublane tiling


def _round_up(x, m):
    return (x + m - 1) // m * m


def fold_bn(gamma, beta, mean, var, eps=1e-5):
    scale = gamma / jnp.sqrt(var + eps)
    bias = beta - mean * scale
    return scale.astype(jnp.float32), bias.astype(jnp.float32)


# ---------------------------------------------------------------------------
# Fused Bottleneck kernel: one image per grid step.
#   x_ref  : (1, Tin, Cp)      flat spatially-padded input; channel Ci is the folded
#                              "1 at interior pixels" mask/bias channel (also the residual source)
#   w1_ref : (Cp, Cmp)         BN-folded conv1 weight; row Ci holds the folded bn1 bias
#   w2_ref : (3, 3*Cmp, Cmp)   BN-folded 3x3 taps grouped per kh (kw blocks stacked along K)
#   w3_ref : (Cmp, Cp)         BN-folded conv3 weight
#   b2/b3  : (1, Cmp)/(1, Cp)  folded biases (f32)
#   o_ref  : (1, Tout, Cp)     flat output; columns W..Wp-1 of each row are garbage (stripped)
# ---------------------------------------------------------------------------
def _bottleneck_kernel(x_ref, w1_ref, w2_ref, w3_ref, b2_ref, b3_ref, o_ref, *, Wp, Tout):
    f32 = jnp.float32
    cdt = w1_ref.dtype                                   # compute dtype (bf16 by default)

    xp = x_ref[0]                                        # (Tin, Cp)

    # --- conv1 (1x1) + bn1 + relu; bias AND interior mask are folded into w1, so halo rows
    #     (and the right padding columns / tail rows, whose inputs are all-zero) come out 0. ---
    h1 = jnp.maximum(jnp.dot(xp, w1_ref[...], preferred_element_type=f32), 0.0)   # (Tin, Cmp) f32

    # --- conv2 (3x3, stride 1, pad 1): out[t] = sum_{kh,kw} h1[t + kh*Wp + kw] @ w2[kh,kw].
    #     Build the kw=0/1/2 shifted copies once (f32, so the +1/+2 shifts are clean sublane
    #     relayouts), concat along channels, then 3 grouped matmuls with K = 3*Cmid whose
    #     operands are sublane-aligned slices at kh*Wp (Wp is a multiple of 8).            ---
    Tg = Tout + 2 * Wp
    h3 = jnp.concatenate([h1[0:Tg], h1[1:1 + Tg], h1[2:2 + Tg]], axis=1)           # (Tg, 3*Cmp)
    acc = jnp.dot(h3[0:Tout].astype(cdt), w2_ref[0], preferred_element_type=f32)
    acc = acc + jnp.dot(h3[Wp:Wp + Tout].astype(cdt), w2_ref[1],
                        preferred_element_type=f32)
    acc = acc + jnp.dot(h3[2 * Wp:2 * Wp + Tout].astype(cdt), w2_ref[2],
                        preferred_element_type=f32)
    h2 = jnp.maximum(acc + b2_ref[...], 0.0)                                        # (Tout, Cmp) f32

    # --- conv3 (1x1) + bn3 + residual add + relu (epilogue in f32) ---
    y = jnp.dot(h2.astype(cdt), w3_ref[...], preferred_element_type=f32) + b3_ref[...]
    y = y + x_ref[0, Wp + 1:Wp + 1 + Tout, :].astype(f32)     # residual = shifted input slice
    o_ref[0] = jnp.maximum(y, 0.0).astype(o_ref.dtype)


def bottleneck_forward(x_nchw, params, *, eps=1e-5, compute_dtype=jnp.bfloat16):
    """Fused Bottleneck forward (stride=1, downsample=None => in_channels == 4*out_channels).

    compute_dtype=bf16 feeds the MXU at its native rate and halves the x / output HBM streams;
    accumulation, biases and the epilogue stay f32.  Pass jnp.float32 for strict numerics.
    """
    N, Ci, H, W = x_nchw.shape
    Cm = params["w1"].shape[1]
    Co = params["w3"].shape[1]
    assert Ci == Co, "no-downsample Bottleneck requires in_channels == expansion*out_channels"

    f32 = jnp.float32
    Cp = _round_up(Ci + 1, LANE)        # +1: folded bias / interior-mask channel
    Cmp = _round_up(Cm, LANE)           # padded mid channels
    Wp = _round_up(W + 2, SUBLANE)      # padded row length (sublane-aligned kh*Wp tap offsets)
    Hp = H + 2
    Tout = H * Wp                       # output rows (cols W..Wp-1 of each row stripped later)
    Tin = Hp * Wp + SUBLANE             # +8 zero rows so the kw=+2 shift stays in-bounds

    # ---- fold BN into conv weights / biases; pack + pad (one-time, XLA side) ----
    s1, b1 = fold_bn(*params["bn1"], eps)
    s2, b2 = fold_bn(*params["bn2"], eps)
    s3, b3 = fold_bn(*params["bn3"], eps)

    w1p = jnp.zeros((Cp, Cmp), f32).at[:Ci, :Cm].set(params["w1"] * s1[None, :])
    w1p = w1p.at[Ci, :Cm].set(b1).astype(compute_dtype)          # bias row hit by the mask channel

    w2f = params["w2"] * s2[None, None, :]                        # (9, Cm, Cm), taps k = kh*3+kw
    w2g = jnp.zeros((3, 3 * Cmp, Cmp), f32)
    for kh in range(3):
        for kw in range(3):
            w2g = w2g.at[kh, kw * Cmp:kw * Cmp + Cm, :Cm].set(w2f[3 * kh + kw])
    w2g = w2g.astype(compute_dtype)

    w3p = jnp.zeros((Cmp, Cp), f32).at[:Cm, :Co].set(params["w3"] * s3[None, :]).astype(compute_dtype)
    b2p = jnp.zeros((1, Cmp), f32).at[0, :Cm].set(b2)
    b3p = jnp.zeros((1, Cp), f32).at[0, :Co].set(b3)

    # ---- input: NCHW -> NHWC, append mask channel, spatial+channel zero-pad, flatten ----
    xt = jnp.transpose(x_nchw, (0, 2, 3, 1)).astype(f32)
    xt = jnp.concatenate([xt, jnp.ones((N, H, W, 1), f32)], axis=-1)     # mask/bias channel
    xpad = jnp.pad(xt, ((0, 0), (1, 1), (1, Wp - W - 1), (0, Cp - Ci - 1)))
    xflat = xpad.reshape(N, Hp * Wp, Cp)
    xflat = jnp.pad(xflat, ((0, 0), (0, Tin - Hp * Wp), (0, 0))).astype(compute_dtype)

    kernel = functools.partial(_bottleneck_kernel, Wp=Wp, Tout=Tout)

    itm = jnp.dtype(compute_dtype).itemsize
    flops = 2 * N * (Tin * Cp * Cmp + 3 * Tout * (3 * Cmp) * Cmp + Tout * Cmp * Cp)
    bytes_accessed = (itm * (N * Tin * Cp + N * Tout * Cp
                             + w1p.size + w2g.size + w3p.size)
                      + 4 * (b2p.size + b3p.size))
    cost = pl.CostEstimate(flops=int(flops), transcendentals=0,
                           bytes_accessed=int(bytes_accessed))

    # VMEM budget: 2x only for the pipelined x/out blocks; weights/biases + f32 temporaries once
    # (with headroom); cap by device capacity.
    io_bytes = 2 * itm * (Tin * Cp + Tout * Cp)
    w_bytes = 2 * (itm * (w1p.size + w2g.size + w3p.size) + 4 * (b2p.size + b3p.size))
    tmp_bytes = (4 * (Tin * Cmp + (Tout + 2 * Wp) * 3 * Cmp + 2 * Tout * Cmp + Tout * Cp)
                 + itm * Tout * 3 * Cmp)
    try:
        cap = int(0.9 * pltpu.get_tpu_info().vmem_capacity_bytes)
    except Exception:
        cap = 48 << 20
    vmem_limit = int(min(max(int(1.5 * (io_bytes + w_bytes + tmp_bytes)) + (2 << 20), 8 << 20),
                         cap))

    out_flat = pl.pallas_call(
        kernel,
        out_shape=jax.ShapeDtypeStruct((N, Tout, Cp), compute_dtype),
        grid=(N,),
        in_specs=[
            pl.BlockSpec((1, Tin, Cp), lambda n: (n, 0, 0)),        # x (+ residual + mask channel)
            pl.BlockSpec((Cp, Cmp), lambda n: (0, 0)),              # w1 (BN bias folded in)
            pl.BlockSpec((3, 3 * Cmp, Cmp), lambda n: (0, 0, 0)),   # grouped 3x3 taps
            pl.BlockSpec((Cmp, Cp), lambda n: (0, 0)),              # w3
            pl.BlockSpec((1, Cmp), lambda n: (0, 0)),               # b2 (f32)
            pl.BlockSpec((1, Cp), lambda n: (0, 0)),                # b3 (f32)
        ],
        out_specs=pl.BlockSpec((1, Tout, Cp), lambda n: (n, 0, 0)),
        compiler_params=pltpu.CompilerParams(
            dimension_semantics=("parallel",),
            vmem_limit_bytes=vmem_limit,
        ),
        cost_estimate=cost,
    )(xflat, w1p, w2g, w3p, b2p, b3p)

    # ---- strip padded columns / channels, back to NCHW ----
    out = out_flat.reshape(N, H, Wp, Cp)[:, :, :W, :Co]
    return jnp.transpose(out, (0, 3, 1, 2)).astype(x_nchw.dtype)


# ---------------------------------------------------------------------------
# Plain-JAX reference (in-script sanity check)
# ---------------------------------------------------------------------------
def reference_forward(x_nchw, params):
    x = jnp.transpose(x_nchw, (0, 2, 3, 1))
    Cmid = params["w1"].shape[1]
    s1, b1 = fold_bn(*params["bn1"])
    s2, b2 = fold_bn(*params["bn2"])
    s3, b3 = fold_bn(*params["bn3"])

    o = jnp.maximum(x @ params["w1"] * s1 + b1, 0.0)

    w2 = params["w2"].reshape(3, 3, Cmid, Cmid)  # (kh, kw, Cin, Cout)
    o = jax.lax.conv_general_dilated(
        o, w2, window_strides=(1, 1), padding="SAME",
        dimension_numbers=("NHWC", "HWIO", "NHWC"))
    o = jnp.maximum(o * s2 + b2, 0.0)

    o = o @ params["w3"] * s3 + b3 + x
    o = jnp.maximum(o, 0.0)
    return jnp.transpose(o, (0, 3, 1, 2))


if __name__ == "__main__":
    key = jax.random.PRNGKey(0)
    N, H, W = 2, 16, 16
    out_channels = 4
    in_channels = out_channels * 4  # so the residual path needs no downsample

    ks = jax.random.split(key, 10)
    params = {
        # conv weights stored as (Cin, Cout) for 1x1 and (9, Cin, Cout) for 3x3 taps (kh*3+kw)
        "w1": 0.1 * jax.random.normal(ks[0], (in_channels, out_channels), jnp.float32),
        "w2": 0.1 * jax.random.normal(ks[1], (9, out_channels, out_channels), jnp.float32),
        "w3": 0.1 * jax.random.normal(ks[2], (out_channels, in_channels), jnp.float32),
        "bn1": (1.0 + 0.1 * jax.random.normal(ks[3], (out_channels,)),
                0.1 * jax.random.normal(ks[4], (out_channels,)),
                jnp.zeros((out_channels,)), jnp.ones((out_channels,))),
        "bn2": (1.0 + 0.1 * jax.random.normal(ks[5], (out_channels,)),
                0.1 * jax.random.normal(ks[6], (out_channels,)),
                jnp.zeros((out_channels,)), jnp.ones((out_channels,))),
        "bn3": (1.0 + 0.1 * jax.random.normal(ks[7], (in_channels,)),
                0.1 * jax.random.normal(ks[8], (in_channels,)),
                jnp.zeros((in_channels,)), jnp.ones((in_channels,))),
    }

    x = jax.random.normal(ks[9], (N, in_channels, H, W), jnp.float32)

    ref = jax.block_until_ready(reference_forward(x, params))

    # Default (bf16 compute) path: loose tolerance (bf16-rounded inputs/weights/output).
    fwd_bf16 = jax.jit(bottleneck_forward)
    out_bf16 = jax.block_until_ready(fwd_bf16(x, params))
    assert out_bf16.shape == (N, in_channels, H, W)
    assert jnp.allclose(out_bf16, ref, atol=7.5e-2, rtol=5e-2), \
        float(jnp.max(jnp.abs(out_bf16 - ref)))

    # f32 path: strict numerics check of the same kernel.
    fwd_f32 = jax.jit(functools.partial(bottleneck_forward, compute_dtype=jnp.float32))
    out_f32 = jax.block_until_ready(fwd_f32(x, params))
    assert jnp.allclose(out_f32, ref, atol=2e-4, rtol=2e-4), \
        float(jnp.max(jnp.abs(out_f32 - ref)))

    print("KERNEL_OK")
</pallas_src>

<mosaic_0001>
module attributes {stable_mosaic.version = 11 : i64} {
  func.func @_bottleneck_kernel(%arg0: i32, %arg1: memref<1x440x128xbf16, #tpu.memory_space<vmem>>, %arg2: memref<128x128xbf16, #tpu.memory_space<vmem>>, %arg3: memref<3x384x128xbf16, #tpu.memory_space<vmem>>, %arg4: memref<128x128xbf16, #tpu.memory_space<vmem>>, %arg5: memref<1x128xf32, #tpu.memory_space<vmem>>, %arg6: memref<1x128xf32, #tpu.memory_space<vmem>>, %arg7: memref<1x384x128xbf16, #tpu.memory_space<vmem>>) attributes {dimension_semantics = [#tpu.dimension_semantics<parallel>], iteration_bounds = array<i64: 2>, scalar_prefetch = 0 : i64, scratch_operands = 0 : i64, tpu.core_type = #tpu.core_type<tc>, window_params = [{transform_indices = @transform_0, window_bounds = array<i64: 1, 440, 128>}, {pipeline_mode = #tpu.pipeline_mode<synchronous>, transform_indices = @transform_1, window_bounds = array<i64: 128, 128>}, {pipeline_mode = #tpu.pipeline_mode<synchronous>, transform_indices = @transform_2, window_bounds = array<i64: 3, 384, 128>}, {pipeline_mode = #tpu.pipeline_mode<synchronous>, transform_indices = @transform_3, window_bounds = array<i64: 128, 128>}, {pipeline_mode = #tpu.pipeline_mode<synchronous>, transform_indices = @transform_4, window_bounds = array<i64: 1, 128>}, {pipeline_mode = #tpu.pipeline_mode<synchronous>, transform_indices = @transform_5, window_bounds = array<i64: 1, 128>}, {transform_indices = @transform_6, window_bounds = array<i64: 1, 384, 128>}]} {
    %c0 = arith.constant 0 : index
    %c0_0 = arith.constant 0 : index
    %c0_1 = arith.constant 0 : index
    %0 = vector.load %arg1[%c0, %c0_0, %c0_1] : memref<1x440x128xbf16, #tpu.memory_space<vmem>>, vector<1x440x128xbf16>
    %1 = vector.shape_cast %0 : vector<1x440x128xbf16> to vector<440x128xbf16>
    %c0_2 = arith.constant 0 : index
    %c0_3 = arith.constant 0 : index
    %2 = vector.load %arg2[%c0_2, %c0_3] : memref<128x128xbf16, #tpu.memory_space<vmem>>, vector<128x128xbf16>
    %cst = arith.constant dense<0.000000e+00> : vector<440x128xf32>
    %3 = tpu.matmul %1, %2, %cst {dimension_numbers = #tpu.dot_dimension_numbers<[1], [0], [0], [1], [0, 0, 1, 1], [], []>} : vector<440x128xbf16>, vector<128x128xbf16>, vector<440x128xf32> -> vector<440x128xf32>
    %cst_4 = arith.constant 0.000000e+00 : f32
    %4 = vector.broadcast %cst_4 : f32 to vector<440x128xf32>
    %5 = arith.maximumf %3, %4 : vector<440x128xf32>
    %6 = vector.extract_strided_slice %5 {offsets = [0, 0], sizes = [432, 128], strides = [1, 1]} : vector<440x128xf32> to vector<432x128xf32>
    %7 = vector.extract_strided_slice %5 {offsets = [1, 0], sizes = [432, 128], strides = [1, 1]} : vector<440x128xf32> to vector<432x128xf32>
    %8 = vector.extract_strided_slice %5 {offsets = [2, 0], sizes = [432, 128], strides = [1, 1]} : vector<440x128xf32> to vector<432x128xf32>
    %9 = tpu.concatenate %6, %7, %8 in 1 : vector<432x128xf32>, vector<432x128xf32>, vector<432x128xf32> -> vector<432x384xf32>
    %10 = vector.extract_strided_slice %9 {offsets = [0, 0], sizes = [384, 384], strides = [1, 1]} : vector<432x384xf32> to vector<384x384xf32>
    %11 = arith.truncf %10 : vector<384x384xf32> to vector<384x384xbf16>
    %c0_5 = arith.constant 0 : index
    %c0_6 = arith.constant 0 : index
    %c0_7 = arith.constant 0 : index
    %12 = vector.load %arg3[%c0_5, %c0_6, %c0_7] : memref<3x384x128xbf16, #tpu.memory_space<vmem>>, vector<1x384x128xbf16>
    %13 = vector.shape_cast %12 : vector<1x384x128xbf16> to vector<384x128xbf16>
    %cst_8 = arith.constant dense<0.000000e+00> : vector<384x128xf32>
    %14 = tpu.matmul %11, %13, %cst_8 {dimension_numbers = #tpu.dot_dimension_numbers<[1], [0], [0], [1], [0, 0, 1, 1], [], []>} : vector<384x384xbf16>, vector<384x128xbf16>, vector<384x128xf32> -> vector<384x128xf32>
    %15 = vector.extract_strided_slice %9 {offsets = [24, 0], sizes = [384, 384], strides = [1, 1]} : vector<432x384xf32> to vector<384x384xf32>
    %16 = arith.truncf %15 : vector<384x384xf32> to vector<384x384xbf16>
    %c1 = arith.constant 1 : index
    %c0_9 = arith.constant 0 : index
    %c0_10 = arith.constant 0 : index
    %17 = vector.load %arg3[%c1, %c0_9, %c0_10] : memref<3x384x128xbf16, #tpu.memory_space<vmem>>, vector<1x384x128xbf16>
    %18 = vector.shape_cast %17 : vector<1x384x128xbf16> to vector<384x128xbf16>
    %cst_11 = arith.constant dense<0.000000e+00> : vector<384x128xf32>
    %19 = tpu.matmul %16, %18, %cst_11 {dimension_numbers = #tpu.dot_dimension_numbers<[1], [0], [0], [1], [0, 0, 1, 1], [], []>} : vector<384x384xbf16>, vector<384x128xbf16>, vector<384x128xf32> -> vector<384x128xf32>
    %20 = arith.addf %14, %19 : vector<384x128xf32>
    %21 = vector.extract_strided_slice %9 {offsets = [48, 0], sizes = [384, 384], strides = [1, 1]} : vector<432x384xf32> to vector<384x384xf32>
    %22 = arith.truncf %21 : vector<384x384xf32> to vector<384x384xbf16>
    %c2 = arith.constant 2 : index
    %c0_12 = arith.constant 0 : index
    %c0_13 = arith.constant 0 : index
    %23 = vector.load %arg3[%c2, %c0_12, %c0_13] : memref<3x384x128xbf16, #tpu.memory_space<vmem>>, vector<1x384x128xbf16>
    %24 = vector.shape_cast %23 : vector<1x384x128xbf16> to vector<384x128xbf16>
    %cst_14 = arith.constant dense<0.000000e+00> : vector<384x128xf32>
    %25 = tpu.matmul %22, %24, %cst_14 {dimension_numbers = #tpu.dot_dimension_numbers<[1], [0], [0], [1], [0, 0, 1, 1], [], []>} : vector<384x384xbf16>, vector<384x128xbf16>, vector<384x128xf32> -> vector<384x128xf32>
    %26 = arith.addf %20, %25 : vector<384x128xf32>
    %c0_15 = arith.constant 0 : index
    %c0_16 = arith.constant 0 : index
    %27 = vector.load %arg5[%c0_15, %c0_16] : memref<1x128xf32, #tpu.memory_space<vmem>>, vector<1x128xf32>
    %28 = vector.broadcast %27 : vector<1x128xf32> to vector<384x128xf32>
    %29 = arith.addf %26, %28 : vector<384x128xf32>
    %cst_17 = arith.constant 0.000000e+00 : f32
    %30 = vector.broadcast %cst_17 : f32 to vector<384x128xf32>
    %31 = arith.maximumf %29, %30 : vector<384x128xf32>
    %32 = arith.truncf %31 : vector<384x128xf32> to vector<384x128xbf16>
    %c0_18 = arith.constant 0 : index
    %c0_19 = arith.constant 0 : index
    %33 = vector.load %arg4[%c0_18, %c0_19] : memref<128x128xbf16, #tpu.memory_space<vmem>>, vector<128x128xbf16>
    %cst_20 = arith.constant dense<0.000000e+00> : vector<384x128xf32>
    %34 = tpu.matmul %32, %33, %cst_20 {dimension_numbers = #tpu.dot_dimension_numbers<[1], [0], [0], [1], [0, 0, 1, 1], [], []>} : vector<384x128xbf16>, vector<128x128xbf16>, vector<384x128xf32> -> vector<384x128xf32>
    %c0_21 = arith.constant 0 : index
    %c0_22 = arith.constant 0 : index
    %35 = vector.load %arg6[%c0_21, %c0_22] : memref<1x128xf32, #tpu.memory_space<vmem>>, vector<1x128xf32>
    %36 = vector.broadcast %35 : vector<1x128xf32> to vector<384x128xf32>
    %37 = arith.addf %34, %36 : vector<384x128xf32>
    %c0_23 = arith.constant 0 : index
    %c25 = arith.constant 25 : index
    %c0_24 = arith.constant 0 : index
    %38 = vector.load %arg1[%c0_23, %c25, %c0_24] : memref<1x440x128xbf16, #tpu.memory_space<vmem>>, vector<1x384x128xbf16>
    %39 = vector.shape_cast %38 : vector<1x384x128xbf16> to vector<384x128xbf16>
    %40 = arith.extf %39 : vector<384x128xbf16> to vector<384x128xf32>
    %41 = arith.addf %37, %40 : vector<384x128xf32>
    %cst_25 = arith.constant 0.000000e+00 : f32
    %42 = vector.broadcast %cst_25 : f32 to vector<384x128xf32>
    %43 = arith.maximumf %41, %42 : vector<384x128xf32>
    %44 = arith.truncf %43 : vector<384x128xf32> to vector<384x128xbf16>
    %c0_26 = arith.constant 0 : index
    %c0_27 = arith.constant 0 : index
    %c0_28 = arith.constant 0 : index
    %45 = vector.load %arg7[%c0_26, %c0_27, %c0_28] : memref<1x384x128xbf16, #tpu.memory_space<vmem>>, vector<1x384x128xbf16>
    %46 = vector.shape_cast %45 : vector<1x384x128xbf16> to vector<384x128xbf16>
    %47 = vector.shape_cast %44 : vector<384x128xbf16> to vector<1x384x128xbf16>
    tpu.vector_store %arg7[%c0_26, %c0_27, %c0_28], %47 {strides = array<i32>} : memref<1x384x128xbf16, #tpu.memory_space<vmem>>, vector<1x384x128xbf16>,
    return
  }
  func.func @transform_0(%arg0: i32) -> (i32, i32, i32) {
    %c0_i32 = arith.constant 0 : i32
    %c0_i32_0 = arith.constant 0 : i32
    %c0_i32_1 = arith.constant 0 : i32
    return %arg0, %c0_i32, %c0_i32_0 : i32, i32, i32
  }
  func.func @transform_1(%arg0: i32) -> (i32, i32) {
    %c0_i32 = arith.constant 0 : i32
    %c0_i32_0 = arith.constant 0 : i32
    %c0_i32_1 = arith.constant 0 : i32
    return %c0_i32, %c0_i32_0 : i32, i32
  }
  func.func @transform_2(%arg0: i32) -> (i32, i32, i32) {
    %c0_i32 = arith.constant 0 : i32
    %c0_i32_0 = arith.constant 0 : i32
    %c0_i32_1 = arith.constant 0 : i32
    %c0_i32_2 = arith.constant 0 : i32
    return %c0_i32, %c0_i32_0, %c0_i32_1 : i32, i32, i32
  }
  func.func @transform_3(%arg0: i32) -> (i32, i32) {
    %c0_i32 = arith.constant 0 : i32
    %c0_i32_0 = arith.constant 0 : i32
    %c0_i32_1 = arith.constant 0 : i32
    return %c0_i32, %c0_i32_0 : i32, i32
  }
  func.func @transform_4(%arg0: i32) -> (i32, i32) {
    %c0_i32 = arith.constant 0 : i32
    %c0_i32_0 = arith.constant 0 : i32
    %c0_i32_1 = arith.constant 0 : i32
    return %c0_i32, %c0_i32_0 : i32, i32
  }
  func.func @transform_5(%arg0: i32) -> (i32, i32) {
    %c0_i32 = arith.constant 0 : i32
    %c0_i32_0 = arith.constant 0 : i32
    %c0_i32_1 = arith.constant 0 : i32
    return %c0_i32, %c0_i32_0 : i32, i32
  }
  func.func @transform_6(%arg0: i32) -> (i32, i32, i32) {
    %c0_i32 = arith.constant 0 : i32
    %c0_i32_0 = arith.constant 0 : i32
    %c0_i32_1 = arith.constant 0 : i32
    return %arg0, %c0_i32, %c0_i32_0 : i32, i32, i32
  }
}

</mosaic_0001>

<bundles_post_ra>
// kernel: bottleneck_forward.1
= control target key start
LH: loop header
LB: loop body
LE: loop exit
PB: predicated region body
PF: predicated region fallthrough
CT: control target
= control target key end

     0   :  { %s5739_s21 = smov 0   ;;  %s8164_s0 = inlined_call_operand.vmem [shape: bf16[2,440,128], index: 0, kind: input, shape index: {}]   ;;  %s8165_s1 = inlined_call_operand.vmem [shape: bf16[128,128], index: 1, kind: input, shape index: {}]   ;;  %s8166_s2 = inlined_call_operand.vmem [shape: bf16[3,384,128], index: 2, kind: input, shape index: {}]   ;;  %s8167_s3 = inlined_call_operand.vmem [shape: bf16[128,128], index: 3, kind: input, shape index: {}]   ;;  %s8168_s4 = inlined_call_operand.vmem [shape: f32[1,128], index: 4, kind: input, shape index: {}]   ;;  %s8169_s5 = inlined_call_operand.vmem [shape: f32[1,128], index: 5, kind: input, shape index: {}]   ;;  %s8170_s6 = inlined_call_operand.vmem [shape: bf16[2,384,128], index: 6, kind: output, shape index: {}]  }
   0x1 LB: > { %s4467_s22 = sadd.s32 4294967295, %s5701_s21   ;;  %p4471_p0 = scmp.ge.s32.totalorder %s5701_s21, 1  ;;  %s5701_s21 = sphi %s5739_s21, %s16_s21  }
   0x2   : > { %p212_p1 = scmp.lt.s32.totalorder %s5701_s21, 3 }
   0x4   : > { %p213_p2 = pnand %p4471_p0, %p212_p1 }
   0x6   : > { %216 = sbr.rel (%p213_p2) target bundleno = 1241 (0x4d9), region = 44 }
   0xd   : > { %v5579_v0 = vld [vmem:[%s8165_s1] sm:$0xff]   ;;  %p242_p3 = scmp.lt.s32.totalorder %s4467_s22, 1  ;;  %v5580_v1 = vld [vmem:[%s8165_s1 + $0x8] sm:$0xff]   ;;  %v5581_v2 = vld [vmem:[%s8165_s1 + $0x10] sm:$0xff]   ;;  %v8173_v3 = vmov 0   ;;  %vm904_vm0 = vcmask 1046528  }
   0xe   : > { %5208 = vmatprep.subr.bf16.mxu0 %v5579_v0  ;;  %1617 = vmatprep.subr.bf16.mxu1 %v8173_v3  ;;  %v5582_v4 = vld [vmem:[%s8165_s1 + $0x18] sm:$0xff]   ;;  %v5583_v6 = vld [vmem:[%s8165_s1 + $0x20] sm:$0xff]   ;;  %v5584_v7 = vld [vmem:[%s8165_s1 + $0x28] sm:$0xff]   ;;  %vm1068_vm1 = vcmask 1045504  }
   0xf   : > { %s8687_s22 = smov (!%p242_p3, %s4467_s22), 1  ;;  %5209 = vmatpush3.bf16.msra.mxu0 %v5579_v0  ;;  %v5585_v8 = vld [vmem:[%s8165_s1 + $0x30] sm:$0xff]   ;;  %v5586_v9 = vld [vmem:[%s8165_s1 + $0x38] sm:$0xff]   ;;  %v5613_v12 = vld [vmem:[%s8166_s2 + $0xc0] sm:$0xff]  }
  0x10   : > { %5210 = vmatprep.subr.bf16.mxu0 %v5580_v1  ;;  %s5568_s29 = smul.u32 220, %s8687_s22  ;;  %1618 = vmatpush1.bf16.msra.mxu1 %v5613_v12  ;;  %v5614_v13 = vld [vmem:[%s8166_s2 + $0xc8] sm:$0xff]   ;;  %v5615_v16 = vld [vmem:[%s8166_s2 + $0xd0] sm:$0xff]   ;;  %v5616_v18 = vld [vmem:[%s8166_s2 + $0xd8] sm:$0xff]  }
  0x11   : > { %1619 = vmatprep.subr.bf16.mxu1 %v8173_v3  ;;  %v5624_v19 = vld [vmem:[%s8166_s2 + $0x140] sm:$0xff]   ;;  %v5626_v21 = vld [vmem:[%s8166_s2 + $0x148] sm:$0xff]   ;;  %v5628_v23 = vld [vmem:[%s8166_s2 + $0x150] sm:$0xff]   ;;  %s5569_s15 = smul.u32 192, %s8687_s22 }
  0x12   : > { %s5763_s8 = scalar_lea.vmem %s8164_s0, %s5568_s29  ;;  %v5619_v22 = vld [vmem:[%s8166_s2 + $0xe0] sm:$0xff]   ;;  %v5620_v24 = vld [vmem:[%s8166_s2 + $0xe8] sm:$0xff]   ;;  %v5621_v27 = vld [vmem:[%s8166_s2 + $0xf0] sm:$0xff]  }
  0x13   : > { %5211 = vmatpush3.bf16.msra.mxu0 %v5580_v1  ;;  %v5587_v5 = vld [vmem:[%s5763_s8] sm:$0xff]   ;;  %v5588_v10 = vld [vmem:[%s5763_s8 + $0x8] sm:$0xff]   ;;  %v5589_v11 = vld [vmem:[%s5763_s8 + $0x10] sm:$0xff]   ;;  %s8026_s18 = scalar_lea.vmem %s8170_s6, %s5569_s15 }
  0x14   : > { %5212 = vmatprep.subr.bf16.mxu0 %v5581_v2  ;;  %5224 = vmatprep.mubr.bf16.mxu0 %v5587_v5  ;;  %v5590_v14 = vld [vmem:[%s5763_s8 + $0x18] sm:$0xff]   ;;  %v5591_v15 = vld [vmem:[%s5763_s8 + $0x20] sm:$0xff]   ;;  %v5592_v17 = vld [vmem:[%s5763_s8 + $0x28] sm:$0xff]  }
  0x15   : > { %1620 = vmatpush1.bf16.msra.mxu1 %v5614_v13  ;;  %v5593_v20 = vld [vmem:[%s5763_s8 + $0x30] sm:$0xff]   ;;  %v5594_v25 = vld [vmem:[%s5763_s8 + $0x38] sm:$0xff]   ;;  %v5595_v26 = vld [vmem:[%s5763_s8 + $0x40] sm:$0xff]  }
  0x16   : > { %1621 = vmatprep.subr.bf16.mxu1 %v8173_v3  ;;  %v5622_v28 = vld [vmem:[%s8166_s2 + $0xf8] sm:$0xff]   ;;  %v5596_v29 = vld [vmem:[%s5763_s8 + $0x48] sm:$0xff]   ;;  %v5597_v30 = vld [vmem:[%s5763_s8 + $0x50] sm:$0xff]  }
  0x17   : > { %5213 = vmatpush3.bf16.msra.mxu0 %v5581_v2  ;;  %v5623_v31 = vld [vmem:[%s8166_s2 + $0x100] sm:$0xff]   ;;  %v5625_v32 = vld [vmem:[%s8166_s2 + $0x108] sm:$0xff]   ;;  %v5598_v33 = vld [vmem:[%s5763_s8 + $0x58] sm:$0xff]  }
  0x18   : > { %5214 = vmatprep.subr.bf16.mxu0 %v5582_v4  ;;  %v5599_v34 = vld [vmem:[%s5763_s8 + $0x60] sm:$0xff]   ;;  %v5627_v35 = vld [vmem:[%s8166_s2 + $0x110] sm:$0xff]   ;;  %v5600_v36 = vld [vmem:[%s5763_s8 + $0x68] sm:$0xff]  }
  0x19   : > { %1622 = vmatpush1.bf16.msra.mxu1 %v5615_v16  ;;  %v5601_v37 = vld [vmem:[%s5763_s8 + $0x70] sm:$0xff]   ;;  %v5602_v38 = vld [vmem:[%s5763_s8 + $0x78] sm:$0xff]   ;;  %v5603_v39 = vld [vmem:[%s5763_s8 + $0x80] sm:$0xff]  }
  0x1a   : > { %1623 = vmatprep.subr.bf16.mxu1 %v8173_v3  ;;  %v5604_v40 = vld [vmem:[%s5763_s8 + $0x88] sm:$0xff]   ;;  %v5605_v41 = vld [vmem:[%s5763_s8 + $0x90] sm:$0xff]   ;;  %v5606_v42 = vld [vmem:[%s5763_s8 + $0x98] sm:$0xff]  }
  0x1b   : > { %5215 = vmatpush3.bf16.msra.mxu0 %v5582_v4  ;;  %v5607_v43 = vld [vmem:[%s5763_s8 + $0xa0] sm:$0xff]   ;;  %v5608_v44 = vld [vmem:[%s5763_s8 + $0xa8] sm:$0xff]   ;;  %v5609_v45 = vld [vmem:[%s5763_s8 + $0xb0] sm:$0xff]  }
  0x1c   : > { %5216 = vmatprep.subr.bf16.mxu0 %v5583_v6  ;;  %v5630_v46 = vld [vmem:[%s8166_s2 + $0x158] sm:$0xff]   ;;  %v5611_v49 = vld [vmem:[%s5763_s8 + $0xc0] sm:$0xff]   ;;  %v5634_v52 = vld [vmem:[%s8166_s2 + $0x168] sm:$0xff]  }
  0x1d   : > { %1624 = vmatpush1.bf16.msra.mxu1 %v5616_v18  ;;  %v5629_v47 = vld [vmem:[%s8166_s2 + $0x118] sm:$0xff]   ;;  %v5632_v50 = vld [vmem:[%s8166_s2 + $0x160] sm:$0xff]   ;;  %v5633_v53 = vld [vmem:[%s8166_s2 + $0x128] sm:$0xff]  }
  0x1e   : > { %1625 = vmatprep.subr.bf16.mxu1 %v8173_v3  ;;  %v5610_v48 = vld [vmem:[%s5763_s8 + $0xb8] sm:$0xff]   ;;  %v5631_v51 = vld [vmem:[%s8166_s2 + $0x120] sm:$0xff]   ;;  %v5612_v54 = vld [vmem:[%s5763_s8 + $0xc8] sm:$0xff]  }
  0x1f   : > { %5217 = vmatpush3.bf16.msra.mxu0 %v5583_v6  ;;  %v5617_v55 = vld [vmem:[%s5763_s8 + $0xd0] sm:$0xff]   ;;  %v5638_v58 = vld [vmem:[%s8166_s2 + $0x178] sm:$0xff]  }
  0x20   : > { %5218 = vmatprep.subr.bf16.mxu0 %v5584_v7  ;;  %v5636_v56 = vld [vmem:[%s8166_s2 + $0x170] sm:$0xff]   ;;  %v5637_v59 = vld [vmem:[%s8166_s2 + $0x138] sm:$0xff]  }
  0x21   : > { %1626 = vmatpush1.bf16.msra.mxu1 %v5619_v22  ;;  %v5635_v57 = vld [vmem:[%s8166_s2 + $0x130] sm:$0xff]   ;;  %v5618_v60 = vld [vmem:[%s5763_s8 + $0xd8] ss:$0 sps:$4 sm:$0xff]  }
  0x22   : > { %1627 = vmatprep.subr.bf16.mxu1 %v8173_v3 }
  0x23   : > { %5219 = vmatpush3.bf16.msra.mxu0 %v5584_v7 }
  0x24   : > { %5220 = vmatprep.subr.bf16.mxu0 %v5585_v8 }
  0x25   : > { %1628 = vmatpush1.bf16.msra.mxu1 %v5620_v24 }
  0x26   : > { %1629 = vmatprep.subr.bf16.mxu1 %v8173_v3 }
  0x27   : > { %5221 = vmatpush3.bf16.msra.mxu0 %v5585_v8 }
  0x28   : > { %5222 = vmatprep.subr.bf16.mxu0 %v5586_v9 }
  0x29   : > { %1630 = vmatpush1.bf16.msra.mxu1 %v5621_v27 }
  0x2a   : > { %1631 = vmatprep.subr.bf16.mxu1 %v8173_v3 }
  0x2b   : > { %5223 = vmatpush3.bf16.msra.mxu0 %v5586_v9 }
  0x2c   : > { %5280 = vmatprep.subr.bf16.mxu0 %v5624_v19 }
  0x2d   : > { %1632 = vmatpush1.bf16.msra.mxu1 %v5622_v28 }
  0x2e   : > { %5225 = vmatmul.mubr.bf16.vlgmr.msra.gmra.mrb[0].mxu0 %v5588_v10  ;;  %1633 = vmatprep.subr.bf16.mxu1 %v8173_v3 }
  0x2f   : > { %5228 = vmatprep.mubr.bf16.mxu0 %v5589_v11  ;;  %5281 = vmatpush3.bf16.msra.mxu0 %v5624_v19 }
  0x30   : > { %5282 = vmatprep.subr.bf16.mxu0 %v5626_v21 }
  0x31   : > { %1634 = vmatpush1.bf16.msra.mxu1 %v5623_v31 }
  0x32   : > { %1635 = vmatprep.subr.bf16.mxu1 %v8173_v3 }
  0x33   : > { %5283 = vmatpush3.bf16.msra.mxu0 %v5626_v21 }
  0x34   : > { %5284 = vmatprep.subr.bf16.mxu0 %v5628_v23 }
  0x35   : > { %1636 = vmatpush1.bf16.msra.mxu1 %v5625_v32 }
  0x36   : > { %5229 = vmatmul.mubr.bf16.gmra.mrb[4].mxu0 %v5590_v14  ;;  %1637 = vmatprep.subr.bf16.mxu1 %v8173_v3 }
  0x37   : > { %5232 = vmatprep.mubr.bf16.mxu0 %v5591_v15  ;;  %5285 = vmatpush3.bf16.msra.mxu0 %v5628_v23 }
  0x38   : > { %5286 = vmatprep.subr.bf16.mxu0 %v5630_v46 }
  0x39   : > { %1638 = vmatpush1.bf16.msra.mxu1 %v5627_v35 }
  0x3a   : > { %1639 = vmatprep.subr.bf16.mxu1 %v8173_v3 }
  0x3b   : > { %5287 = vmatpush3.bf16.msra.mxu0 %v5630_v46 }
  0x3c   : > { %5288 = vmatprep.subr.bf16.mxu0 %v5632_v50 }
  0x3d   : > { %1640 = vmatpush1.bf16.msra.mxu1 %v5629_v47 }
  0x3e   : > { %5233 = vmatmul.mubr.bf16.gmra.mrb[8].mxu0 %v5592_v17  ;;  %1641 = vmatprep.subr.bf16.mxu1 %v8173_v3 }
  0x3f   : > { %5236 = vmatprep.mubr.bf16.mxu0 %v5593_v20  ;;  %5289 = vmatpush3.bf16.msra.mxu0 %v5632_v50 }
  0x40   : > { %5290 = vmatprep.subr.bf16.mxu0 %v5634_v52 }
  0x41   : > { %1642 = vmatpush1.bf16.msra.mxu1 %v5631_v51 }
  0x42   : > { %1643 = vmatprep.subr.bf16.mxu1 %v8173_v3 }
  0x43   : > { %5291 = vmatpush3.bf16.msra.mxu0 %v5634_v52 }
  0x44   : > { %5292 = vmatprep.subr.bf16.mxu0 %v5636_v56 }
  0x45   : > { %1644 = vmatpush1.bf16.msra.mxu1 %v5633_v53 }
  0x46   : > { %5237 = vmatmul.mubr.bf16.gmra.mrb[12].mxu0 %v5594_v25  ;;  %1645 = vmatprep.subr.bf16.mxu1 %v8173_v3 }
  0x47   : > { %5240 = vmatprep.mubr.bf16.mxu0 %v5595_v26  ;;  %5293 = vmatpush3.bf16.msra.mxu0 %v5636_v56 }
  0x48   : > { %5294 = vmatprep.subr.bf16.mxu0 %v5638_v58 }
  0x49   : > { %1646 = vmatpush1.bf16.msra.mxu1 %v5635_v57 }
  0x4a   : > { %1647 = vmatprep.subr.bf16.mxu1 %v8173_v3 }
  0x4b   : > { %5295 = vmatpush3.bf16.msra.mxu0 %v5638_v58 }
  0x4c   : > { %2211 = vmatprep.subr.bf16.mxu0 %v8173_v3 }
  0x4d   : > { %1648 = vmatpush1.bf16.msra.mxu1 %v5637_v59 }
  0x4e   : > { %5241 = vmatmul.mubr.bf16.gmra.mrb[16].mxu0 %v5596_v29  ;;  %5536 = vmatprep.subr.bf16.mxu1 %v8173_v3 }
  0x4f   : > { %5244 = vmatprep.mubr.bf16.mxu0 %v5597_v30 }
  0x56   : > { %5245 = vmatmul.mubr.bf16.gmra.mrb[20].mxu0 %v5598_v33 }
  0x57   : > { %5248 = vmatprep.mubr.bf16.mxu0 %v5599_v34 }
  0x5e   : > { %5249 = vmatmul.mubr.bf16.gmra.mrb[24].mxu0 %v5600_v36 }
  0x5f   : > { %5252 = vmatprep.mubr.bf16.mxu0 %v5601_v37 }
  0x66   : > { %5253 = vmatmul.mubr.bf16.gmra.mrb[28].mxu0 %v5602_v38 }
  0x67   : > { %5256 = vmatprep.mubr.bf16.mxu0 %v5603_v39 }
  0x6e   : > { %5257 = vmatmul.mubr.bf16.gmra.mrb[32].mxu0 %v5604_v40 }
  0x6f   : > { %5260 = vmatprep.mubr.bf16.mxu0 %v5605_v41 }
  0x76   : > { %5261 = vmatmul.mubr.bf16.gmra.mrb[36].mxu0 %v5606_v42 }
  0x77   : > { %5264 = vmatprep.mubr.bf16.mxu0 %v5607_v43 }
  0x7e   : > { %5265 = vmatmul.mubr.bf16.gmra.mrb[40].mxu0 %v5608_v44 }
  0x7f   : > { %5268 = vmatprep.mubr.bf16.mxu0 %v5609_v45 }
  0x86   : > { %5269 = vmatmul.mubr.bf16.gmra.mrb[44].mxu0 %v5610_v48 }
  0x87   : > { %5272 = vmatprep.mubr.bf16.mxu0 %v5611_v49 }
  0x8e   : > { %5273 = vmatmul.mubr.bf16.gmra.mrb[48].mxu0 %v5612_v54 }
  0x8f   : > { %5276 = vmatprep.mubr.bf16.mxu0 %v5617_v55 }
  0x96   : > { %5277 = vmatmul.mubr.bf16.gmra.mrb[52].mxu0 %v5618_v60 }
 0x101   : > { %v5226_v61 = vpop.f32.mrb[0].mxu0 }
 0x102   : > { %v5897_v62 = vmax.f32 %v5226_v61, 0.0  ;;  %v572_v63 = vpop.f32.mrb[1].mxu0  ;;  %v5639_v61 = vld [vmem:[%s8166_s2] sm:$0xff]  }
 0x103   : > { %v5899_v0 = vmax.f32 %v572_v63, 0.0  ;;  %v5227_v1 = vpop.f32.mrb[2].mxu0 }
 0x104   : > { %v5901_v2 = vmax.f32 %v5227_v1, 0.0  ;;  %v575_v4 = vpop.f32.mrb[3].mxu0  ;;  %v1072_v5 = vrot.slane %v5897_v62, 2  ;;  %v908_v7 = vrot.slane %v5897_v62, 1 }
 0x105   : > { %v5904_v6 = vmax.f32 %v575_v4, 0.0  ;;  %v905_v8 = vrot.slane %v5899_v0, 1  ;;  %v1069_v12 = vrot.slane %v5899_v0, 2 }
 0x106   : > { %v910_v9 = vrot.slane %v5901_v2, 1  ;;  %v1074_v10 = vrot.slane %v5901_v2, 2 }
 0x107   : > { %v906_v13 = vrot.slane %v5904_v6, 1  ;;  %v1070_v14 = vrot.slane %v5904_v6, 2 }
 0x108   : > { %v5918_v16 = vsel %vm904_vm0, %v908_v7, %v910_v9  ;;  %v5921_v17 = vsel %vm1068_vm1, %v1072_v5, %v1074_v10 }
 0x109   : > { %8274 = vst [vmem:[#allocation2_spill] sm:$0xff] %v5921_v17  ;;  %v5230_v18 = vpop.f32.mrb[4].mxu0  ;;  %v5924_v19 = vsel %vm904_vm0, %v905_v8, %v906_v13  ;;  %v5927_v20 = vsel %vm904_vm0, %v906_v13, %v908_v7  ;;  %v5930_v21 = vsel %vm1068_vm1, %v1069_v12, %v1070_v14  ;;  %v5933_v22 = vsel %vm1068_vm1, %v1070_v14, %v1072_v5 }
 0x10a   : > { %8275 = vst [vmem:[#allocation3_spill] sm:$0xff] %v5930_v21  ;;  %8276 = vst [vmem:[#allocation4_spill] sm:$0xff] %v5933_v22  ;;  %v5935_v23 = vmax.f32 %v5230_v18, 0.0  ;;  %v588_v24 = vpop.f32.mrb[5].mxu0 }
 0x10b   : > { %v5941_v27 = vmax.f32 %v588_v24, 0.0  ;;  %v5231_v28 = vpop.f32.mrb[6].mxu0 }
 0x10c   : > { %v1080_v29 = vrot.slane %v5935_v23, 2  ;;  %v5944_v30 = vmax.f32 %v5231_v28, 0.0  ;;  %v591_v31 = vpop.f32.mrb[7].mxu0  ;;  %v916_v37 = vrot.slane %v5935_v23, 1 }
 0x10d   : > { %8277 = vst [vmem:[#allocation5_spill] sm:$0xff] %v5941_v27  ;;  %v5946_v32 = vmax.f32 %v591_v31, 0.0  ;;  %v912_v33 = vrot.slane %v5941_v27, 1  ;;  %v1076_v34 = vrot.slane %v5941_v27, 2  ;;  %v1352_v35 = vpack.c.bf16 %v5941_v27, %v5901_v2 }
 0x10e   : > { %v1082_v36 = vrot.slane %v5944_v30, 2  ;;  %v918_v38 = vrot.slane %v5944_v30, 1  ;;  %v5957_v39 = vpack.c.bf16 %v5944_v30, %v5935_v23 }
 0x10f   : > { %8278 = vst [vmem:[#allocation6_spill] sm:$0xff] %v5946_v32  ;;  %v5960_v40 = vsel %vm904_vm0, %v910_v9, %v912_v33  ;;  %v914_v41 = vrot.slane %v5946_v32, 1  ;;  %v5964_v42 = vsel %vm1068_vm1, %v1074_v10, %v1076_v34  ;;  %v1078_v43 = vrot.slane %v5946_v32, 2  ;;  %v5642_v9 = vld [vmem:[%s8166_s2 + $0x18] sm:$0xff]  }
 0x110   : > { %8279 = vst [vmem:[#allocation7_spill] sm:$0xff] %v5957_v39  ;;  %8280 = vst [vmem:[#allocation8_spill] sm:$0xff] %v5964_v42  ;;  %v5972_v46 = vsel %vm1068_vm1, %v1080_v29, %v1082_v36  ;;  %v919_v47 = vsel %vm904_vm0, %v916_v37, %v918_v38  ;;  %v1355_v1 = vpack.c.bf16 %v5935_v23, %v5946_v32 }
 0x111   : > { %v5234_v48 = vpop.f32.mrb[8].mxu0  ;;  %v5976_v49 = vsel %vm904_vm0, %v912_v33, %v914_v41  ;;  %v5979_v50 = vsel %vm904_vm0, %v914_v41, %v916_v37  ;;  %v5982_v51 = vsel %vm1068_vm1, %v1076_v34, %v1078_v43  ;;  %v5985_v52 = vsel %vm1068_vm1, %v1078_v43, %v1080_v29 }
 0x112   : > { %8281 = vst [vmem:[#allocation9_spill] sm:$0xff] %v5976_v49  ;;  %8282 = vst [vmem:[#allocation10_spill] sm:$0xff] %v5982_v51  ;;  %v5987_v53 = vmax.f32 %v5234_v48, 0.0  ;;  %v604_v54 = vpop.f32.mrb[9].mxu0  ;;  %v1353_v56 = vpack.c.bf16 %v5976_v49, %v5960_v40  ;;  %v1354_v57 = vpack.c.bf16 %v5982_v51, %v5964_v42  ;;  %v1357_v60 = vpack.c.bf16 %v5972_v46, %v5985_v52 }
 0x113   : > { %8283 = vst [vmem:[#allocation11_spill] sm:$0xff] %v5985_v52  ;;  %v5995_v58 = vmax.f32 %v604_v54, 0.0  ;;  %v5235_v59 = vpop.f32.mrb[10].mxu0  ;;  %v1356_v63 = vpack.c.bf16 %v919_v47, %v5979_v50 }
 0x114   : > { %v6005_v4 = vmax.f32 %v5235_v59, 0.0  ;;  %v607_v5 = vpop.f32.mrb[11].mxu0  ;;  %1649 = vmatprep.mubr.bf16.mxu1 %v1353_v56  ;;  %5296 = vmatprep.mubr.bf16.mxu0 %v1354_v57  ;;  %v1088_v7 = vrot.slane %v5987_v53, 2  ;;  %v924_v8 = vrot.slane %v5987_v53, 1 }
 0x115   : > { %v6011_v10 = vmax.f32 %v607_v5, 0.0  ;;  %1650 = vmatmul.mubr.bf16.vlgmr.msra.gmra.mrb[0].mxu1 %v1352_v35  ;;  %5297 = vmatmul.mubr.bf16.vlgmr.msra.gmra.mrb[56].mxu0 %v1357_v60  ;;  %v1084_v12 = vrot.slane %v5995_v58, 2  ;;  %v920_v13 = vrot.slane %v5995_v58, 1  ;;  %v5640_v35 = vld [vmem:[%s8166_s2 + $0x8] sm:$0xff]  }
 0x116   : > { %5552 = vmatpush1.bf16.msra.mxu1 %v5639_v61  ;;  %1657 = vmatprep.mubr.bf16.mxu1 %v1356_v63  ;;  %v1090_v18 = vrot.slane %v6005_v4, 2  ;;  %v926_v23 = vrot.slane %v6005_v4, 1  ;;  %v6021_v24 = vpack.c.bf16 %v6005_v4, %v5987_v53 }
 0x117   : > { %v1085_v29 = vsel %vm1068_vm1, %v1082_v36, %v1084_v12  ;;  %v1086_v31 = vrot.slane %v6011_v10, 2  ;;  %v921_v33 = vsel %vm904_vm0, %v918_v38, %v920_v13  ;;  %v922_v34 = vrot.slane %v6011_v10, 1  ;;  %5537 = vmatprep.subr.bf16.mxu1 %v8173_v3  ;;  %2212 = vmatpush1.bf16.msra.mxu0 %v5639_v61 }
 0x118   : > { %8284 = vst [vmem:[#allocation12_spill] sm:$0xff] %v6021_v24  ;;  %v6034_v37 = vsel %vm1068_vm1, %v1088_v7, %v1090_v18  ;;  %v6037_v41 = vsel %vm904_vm0, %v924_v8, %v926_v23  ;;  %2213 = vmatprep.subr.bf16.mxu0 %v8173_v3  ;;  %v6042_v38 = vpack.c.bf16 %v921_v33, %v919_v47 }
 0x119   : > { %v5238_v43 = vpop.f32.mrb[12].mxu0  ;;  %v1087_v48 = vsel %vm1068_vm1, %v1084_v12, %v1086_v31  ;;  %v1089_v54 = vsel %vm1068_vm1, %v1086_v31, %v1088_v7  ;;  %v923_v56 = vsel %vm904_vm0, %v920_v13, %v922_v34  ;;  %v6048_v57 = vsel %vm904_vm0, %v922_v34, %v924_v8  ;;  %v5641_v7 = vld [vmem:[%s8166_s2 + $0x10] sm:$0xff]  }
 0x11a   : > { %8285 = vst [vmem:[#allocation13_spill] sm:$0xff] %v6042_v38  ;;  %v6050_v59 = vmax.f32 %v5238_v43, 0.0  ;;  %v620_v60 = vpop.f32.mrb[13].mxu0  ;;  %v1360_v61 = vpack.c.bf16 %v1087_v48, %v1085_v29  ;;  %v1363_v63 = vpack.c.bf16 %v6034_v37, %v1089_v54  ;;  %v1359_v5 = vpack.c.bf16 %v923_v56, %v921_v33  ;;  %5553 = vmatpush1.bf16.msra.mxu1 %v5640_v35 }
 0x11b   : > { %v6053_v47 = vmax.f32 %v620_v60, 0.0  ;;  %v5239_v28 = vpop.f32.mrb[14].mxu0  ;;  %5538 = vmatprep.subr.bf16.mxu1 %v8173_v3  ;;  %2214 = vmatpush1.bf16.msra.mxu0 %v5640_v35  ;;  %v6062_v8 = vpack.c.bf16 %v6048_v57, %v923_v56  ;;  %v6066_v13 = vpack.c.bf16 %v6011_v10, %v5995_v58  ;;  %v6074_v60 = vpack.c.bf16 %v1085_v29, %v5972_v46 }
 0x11c   : > { %v6068_v31 = vmax.f32 %v5239_v28, 0.0  ;;  %v623_v33 = vpop.f32.mrb[15].mxu0  ;;  %5300 = vmatprep.mubr.bf16.mxu0 %v1360_v61  ;;  %v1096_v34 = vrot.slane %v6050_v59, 2  ;;  %v932_v43 = vrot.slane %v6050_v59, 1  ;;  %2215 = vmatprep.subr.bf16.mxu0 %v8173_v3  ;;  %v6088_v29 = vpack.c.bf16 %v1089_v54, %v1087_v48 }
 0x11d   : > { %8286 = vst [vmem:[#allocation14_spill] sm:$0xff] %v6062_v8  ;;  %8287 = vst [vmem:[#allocation15_spill] sm:$0xff] %v6066_v13  ;;  %v6076_v35 = vmax.f32 %v623_v33, 0.0  ;;  %1658 = vmatmul.mubr.bf16.gmra.mrb[4].mxu1 %v1355_v1  ;;  %5301 = vmatmul.mubr.bf16.gmra.mrb[60].mxu0 %v1363_v63  ;;  %v1092_v56 = vrot.slane %v6053_v47, 2  ;;  %v928_v28 = vrot.slane %v6053_v47, 1 }
 0x11e   : > { %8288 = vst [vmem:[#allocation16_spill] sm:$0xff] %v6074_v60  ;;  %1665 = vmatprep.mubr.bf16.mxu1 %v1359_v5  ;;  %v1098_v45 = vrot.slane %v6068_v31, 2  ;;  %5554 = vmatpush1.bf16.msra.mxu1 %v5641_v7  ;;  %v934_v26 = vrot.slane %v6068_v31, 1  ;;  %v6086_v46 = vpack.c.bf16 %v6068_v31, %v6050_v59  ;;  %8290 = vst [vmem:[#allocation18_spill] sm:$0xff] %v6088_v29 }
 0x11f   : > { %v1093_v1 = vsel %vm1068_vm1, %v1090_v18, %v1092_v56  ;;  %v1094_v63 = vrot.slane %v6076_v35, 2  ;;  %v6093_v33 = vsel %vm904_vm0, %v926_v23, %v928_v28  ;;  %v930_v5 = vrot.slane %v6076_v35, 1  ;;  %5539 = vmatprep.subr.bf16.mxu1 %v8173_v3  ;;  %2216 = vmatpush1.bf16.msra.mxu0 %v5641_v7 }
 0x120   : > { %8289 = vst [vmem:[#allocation17_spill] sm:$0xff] %v6086_v46  ;;  %v6101_v55 = vsel %vm1068_vm1, %v1096_v34, %v1098_v45  ;;  %v6104_v48 = vsel %vm904_vm0, %v932_v43, %v934_v26  ;;  %2217 = vmatprep.subr.bf16.mxu0 %v8173_v3  ;;  %v6111_v23 = vpack.c.bf16 %v6093_v33, %v6037_v41 }
 0x121   : > { %v5242_v54 = vpop.f32.mrb[16].mxu0  ;;  %v1095_v11 = vsel %vm1068_vm1, %v1092_v56, %v1094_v63  ;;  %v1097_v7 = vsel %vm1068_vm1, %v1094_v63, %v1096_v34  ;;  %v6116_v44 = vsel %vm904_vm0, %v928_v28, %v930_v5  ;;  %v6119_v15 = vsel %vm904_vm0, %v930_v5, %v932_v43  ;;  %v5643_v43 = vld [vmem:[%s8166_s2 + $0x20] sm:$0xff]  }
 0x122   : > { %8291 = vst [vmem:[#allocation19_spill] sm:$0xff] %v6111_v23  ;;  %v6121_v25 = vmax.f32 %v5242_v54, 0.0  ;;  %v636_v18 = vpop.f32.mrb[17].mxu0  ;;  %v1366_v61 = vpack.c.bf16 %v1095_v11, %v1093_v1  ;;  %v1369_v36 = vpack.c.bf16 %v6101_v55, %v1097_v7  ;;  %5555 = vmatpush1.bf16.msra.mxu1 %v5642_v9  ;;  %v6136_v28 = vpack.c.bf16 %v6119_v15, %v6116_v44 }
 0x123   : > { %v6126_v14 = vmax.f32 %v636_v18, 0.0  ;;  %v5243_v56 = vpop.f32.mrb[18].mxu0  ;;  %2218 = vmatpush1.bf16.msra.mxu0 %v5642_v9  ;;  %5540 = vmatprep.subr.bf16.mxu1 %v8173_v3  ;;  %v6140_v63 = vpack.c.bf16 %v6076_v35, %v6053_v47  ;;  %v6148_v34 = vpack.c.bf16 %v1093_v1, %v6034_v37  ;;  %v8295_v29 = vpack.c.bf16 %v5995_v58, %v5944_v30 }
 0x124   : > { %8292 = vst [vmem:[#allocation20_spill] sm:$0xff] %v6136_v28  ;;  %v6142_v5 = vmax.f32 %v5243_v56, 0.0  ;;  %v639_v18 = vpop.f32.mrb[19].mxu0  ;;  %5304 = vmatprep.mubr.bf16.mxu0 %v1366_v61  ;;  %v1104_v9 = vrot.slane %v6121_v25, 2  ;;  %2219 = vmatprep.subr.bf16.mxu0 %v8173_v3  ;;  %v940_v54 = vrot.slane %v6121_v25, 1  ;;  %v8296_v3 = vpack.c.bf16 %v6037_v41, %v6048_v57  ;;  %v5644_v41 = vld [vmem:[%s8166_s2 + $0x28] sm:$0xff]  }
 0x125   : > { %8293 = vst [vmem:[#allocation21_spill] sm:$0xff] %v6140_v63  ;;  %8294 = vst [vmem:[#allocation22_spill] sm:$0xff] %v6148_v34  ;;  %v6150_v12 = vmax.f32 %v639_v18, 0.0  ;;  %1666 = vmatmul.mubr.bf16.gmra.mrb[8].mxu1 %v8295_v29  ;;  %5305 = vmatmul.mubr.bf16.gmra.mrb[64].mxu0 %v1369_v36  ;;  %v1100_v56 = vrot.slane %v6126_v14, 2  ;;  %v936_v61 = vrot.slane %v6126_v14, 1  ;;  %v6168_v58 = vpack.c.bf16 %v1097_v7, %v1095_v11 }
 0x126   : > { %1673 = vmatprep.mubr.bf16.mxu1 %v8296_v3  ;;  %v1106_v37 = vrot.slane %v6142_v5, 2  ;;  %5556 = vmatpush1.bf16.msra.mxu1 %v5643_v43  ;;  %v942_v1 = vrot.slane %v6142_v5, 1  ;;  %v6166_v30 = vpack.c.bf16 %v6142_v5, %v6121_v25  ;;  %v8299_v57 = vmov 0  }
 0x127   : > { %8298 = vst [vmem:[#allocation24_spill] sm:$0xff] %v6168_v58  ;;  %v1101_v36 = vsel %vm1068_vm1, %v1098_v45, %v1100_v56  ;;  %v1102_v29 = vrot.slane %v6150_v12, 2  ;;  %v6173_v18 = vsel %vm904_vm0, %v934_v26, %v936_v61  ;;  %v938_v3 = vrot.slane %v6150_v12, 1  ;;  %2220 = vmatpush1.bf16.msra.mxu0 %v5643_v43  ;;  %5541 = vmatprep.subr.bf16.mxu1 %v8299_v57 }
 0x128   : > { %8297 = vst [vmem:[#allocation23_spill] sm:$0xff] %v6166_v30  ;;  %v6181_v60 = vsel %vm1068_vm1, %v1104_v9, %v1106_v37  ;;  %v6184_v11 = vsel %vm904_vm0, %v940_v54, %v942_v1  ;;  %2221 = vmatprep.subr.bf16.mxu0 %v8299_v57  ;;  %v6191_v45 = vpack.c.bf16 %v6173_v18, %v6104_v48 }
 0x129   : > { %v5246_v7 = vpop.f32.mrb[20].mxu0  ;;  %v1103_v43 = vsel %vm1068_vm1, %v1100_v56, %v1102_v29  ;;  %v1105_v58 = vsel %vm1068_vm1, %v1102_v29, %v1104_v9  ;;  %v6196_v34 = vsel %vm904_vm0, %v936_v61, %v938_v3  ;;  %v6199_v51 = vsel %vm904_vm0, %v938_v3, %v940_v54  ;;  %v5645_v54 = vld [vmem:[%s8166_s2 + $0x30] sm:$0xff]  }
 0x12a   : > { %8300 = vst [vmem:[#allocation25_spill] sm:$0xff] %v6191_v45  ;;  %v6201_v52 = vmax.f32 %v5246_v7, 0.0  ;;  %v652_v17 = vpop.f32.mrb[21].mxu0  ;;  %v1372_v42 = vpack.c.bf16 %v1103_v43, %v1101_v36  ;;  %v1375_v26 = vpack.c.bf16 %v6181_v60, %v1105_v58  ;;  %5557 = vmatpush1.bf16.msra.mxu1 %v5644_v41  ;;  %v6216_v61 = vpack.c.bf16 %v6199_v51, %v6196_v34 }
 0x12b   : > { %v6206_v22 = vmax.f32 %v652_v17, 0.0  ;;  %v5247_v56 = vpop.f32.mrb[22].mxu0  ;;  %2222 = vmatpush1.bf16.msra.mxu0 %v5644_v41  ;;  %5542 = vmatprep.subr.bf16.mxu1 %v8299_v57  ;;  %v6220_v29 = vpack.c.bf16 %v6150_v12, %v6126_v14  ;;  %v6228_v9 = vpack.c.bf16 %v1101_v36, %v6101_v55  ;;  %v8305_v55 = vpack.c.bf16 %v6116_v44, %v6093_v33  ;;  %v5646_v44 = vld [vmem:[%s8166_s2 + $0x38] sm:$0xff]  }
 0x12c   : > { %8301 = vst [vmem:[#allocation26_spill] sm:$0xff] %v6216_v61  ;;  %v948_v17 = vrot.slane %v6201_v52, 1  ;;  %v1112_v3 = vrot.slane %v6201_v52, 2  ;;  %v6224_v7 = vmax.f32 %v5247_v56, 0.0  ;;  %v655_v41 = vpop.f32.mrb[23].mxu0  ;;  %5308 = vmatprep.mubr.bf16.mxu0 %v1372_v42  ;;  %2223 = vmatprep.subr.bf16.mxu0 %v8299_v57 }
 0x12d   : > { %8302 = vst [vmem:[#allocation27_spill] sm:$0xff] %v6220_v29  ;;  %8303 = vst [vmem:[#allocation28_spill] sm:$0xff] %v6228_v9  ;;  %v944_v21 = vrot.slane %v6206_v22, 1  ;;  %v1108_v30 = vrot.slane %v6206_v22, 2  ;;  %v6232_v61 = vmax.f32 %v655_v41, 0.0  ;;  %v8304_v29 = vpack.c.bf16 %v5987_v53, %v6011_v10  ;;  %5309 = vmatmul.mubr.bf16.gmra.mrb[68].mxu0 %v1375_v26 }
 0x12e   : > { %v950_v42 = vrot.slane %v6224_v7, 1  ;;  %v1114_v46 = vrot.slane %v6224_v7, 2  ;;  %5558 = vmatpush1.bf16.msra.mxu1 %v5645_v54  ;;  %v6246_v36 = vpack.c.bf16 %v6224_v7, %v6201_v52  ;;  %v6248_v41 = vpack.c.bf16 %v1105_v58, %v1103_v43 }
 0x12f   : > { %1674 = vmatmul.mubr.bf16.gmra.mrb[12].mxu1 %v8304_v29  ;;  %v946_v53 = vrot.slane %v6232_v61, 1  ;;  %v1110_v10 = vrot.slane %v6232_v61, 2  ;;  %v1109_v26 = vsel %vm1068_vm1, %v1106_v37, %v1108_v30  ;;  %v6254_v29 = vsel %vm904_vm0, %v942_v1, %v944_v21  ;;  %2224 = vmatpush1.bf16.msra.mxu0 %v5645_v54 }
 0x130   : > { %1681 = vmatprep.mubr.bf16.mxu1 %v8305_v55  ;;  %8306 = vst [vmem:[#allocation29_spill] sm:$0xff] %v6246_v36  ;;  %8307 = vst [vmem:[#allocation30_spill] sm:$0xff] %v6248_v41  ;;  %5543 = vmatprep.subr.bf16.mxu1 %v8299_v57  ;;  %v6261_v33 = vsel %vm1068_vm1, %v1112_v3, %v1114_v46  ;;  %v6265_v58 = vsel %vm904_vm0, %v948_v17, %v950_v42 }
 0x131   : > { %2225 = vmatprep.subr.bf16.mxu0 %v8299_v57  ;;  %v6271_v1 = vpack.c.bf16 %v6254_v29, %v6184_v11  ;;  %v5250_v43 = vpop.f32.mrb[24].mxu0  ;;  %v1111_v54 = vsel %vm1068_vm1, %v1108_v30, %v1110_v10  ;;  %v1113_v55 = vsel %vm1068_vm1, %v1110_v10, %v1112_v3  ;;  %v6276_v56 = vsel %vm904_vm0, %v944_v21, %v946_v53 }
 0x132   : > { %v6279_v41 = vsel %vm904_vm0, %v946_v53, %v948_v17  ;;  %v6281_v9 = vmax.f32 %v5250_v43, 0.0  ;;  %v668_v36 = vpop.f32.mrb[25].mxu0  ;;  %v1378_v45 = vpack.c.bf16 %v1111_v54, %v1109_v26  ;;  %v1381_v37 = vpack.c.bf16 %v6261_v33, %v1113_v55  ;;  %5559 = vmatpush1.bf16.msra.mxu1 %v5646_v44  ;;  %v5647_v17 = vld [vmem:[%s8166_s2 + $0x40] sm:$0xff]  }
 0x133   : > { %8308 = vst [vmem:[#allocation31_spill] sm:$0xff] %v6271_v1  ;;  %v6286_v63 = vmax.f32 %v668_v36, 0.0  ;;  %v5251_v30 = vpop.f32.mrb[26].mxu0  ;;  %2226 = vmatpush1.bf16.msra.mxu0 %v5646_v44  ;;  %5544 = vmatprep.subr.bf16.mxu1 %v8299_v57  ;;  %v6296_v3 = vpack.c.bf16 %v6279_v41, %v6276_v56  ;;  %v6300_v53 = vpack.c.bf16 %v6232_v61, %v6206_v22 }
 0x134   : > { %v956_v36 = vrot.slane %v6281_v9, 1  ;;  %v1120_v10 = vrot.slane %v6281_v9, 2  ;;  %v6304_v44 = vmax.f32 %v5251_v30, 0.0  ;;  %v671_v43 = vpop.f32.mrb[27].mxu0  ;;  %5312 = vmatprep.mubr.bf16.mxu0 %v1378_v45  ;;  %2227 = vmatprep.subr.bf16.mxu0 %v8299_v57  ;;  %v6308_v21 = vpack.c.bf16 %v1109_v26, %v6181_v60 }
 0x135   : > { %8309 = vst [vmem:[#allocation32_spill] sm:$0xff] %v6296_v3  ;;  %8310 = vst [vmem:[#allocation33_spill] sm:$0xff] %v6300_v53  ;;  %v952_v1 = vrot.slane %v6286_v63, 1  ;;  %v1116_v3 = vrot.slane %v6286_v63, 2  ;;  %v6312_v28 = vmax.f32 %v671_v43, 0.0  ;;  %v8312_v53 = vpack.c.bf16 %v6053_v47, %v6005_v4  ;;  %5313 = vmatmul.mubr.bf16.gmra.mrb[72].mxu0 %v1381_v37 }
 0x136   : > { %8311 = vst [vmem:[#allocation34_spill] sm:$0xff] %v6308_v21  ;;  %v958_v45 = vrot.slane %v6304_v44, 1  ;;  %v1122_v24 = vrot.slane %v6304_v44, 2  ;;  %v8313_v60 = vpack.c.bf16 %v6104_v48, %v6119_v15  ;;  %5560 = vmatpush1.bf16.msra.mxu1 %v5647_v17  ;;  %v6326_v26 = vpack.c.bf16 %v6304_v44, %v6281_v9 }
 0x137   : > { %1682 = vmatmul.mubr.bf16.gmra.mrb[16].mxu1 %v8312_v53  ;;  %v6328_v43 = vpack.c.bf16 %v1113_v55, %v1111_v54  ;;  %v954_v4 = vrot.slane %v6312_v28, 1  ;;  %v1118_v47 = vrot.slane %v6312_v28, 2  ;;  %v1117_v37 = vsel %vm1068_vm1, %v1114_v46, %v1116_v3  ;;  %2228 = vmatpush1.bf16.msra.mxu0 %v5647_v17  ;;  %v5648_v53 = vld [vmem:[%s8166_s2 + $0x48] sm:$0xff]  }
 0x138   : > { %1689 = vmatprep.mubr.bf16.mxu1 %v8313_v60  ;;  %8314 = vst [vmem:[#allocation35_spill] sm:$0xff] %v6326_v26  ;;  %v6337_v15 = vsel %vm904_vm0, %v950_v42, %v952_v1  ;;  %5545 = vmatprep.subr.bf16.mxu1 %v8299_v57  ;;  %v6341_v48 = vsel %vm1068_vm1, %v1120_v10, %v1122_v24 }
 0x139   : > { %8315 = vst [vmem:[#allocation36_spill] sm:$0xff] %v6328_v43  ;;  %2229 = vmatprep.subr.bf16.mxu0 %v8299_v57  ;;  %v6345_v54 = vsel %vm904_vm0, %v956_v36, %v958_v45  ;;  %v6351_v55 = vpack.c.bf16 %v6337_v15, %v6265_v58  ;;  %v5254_v17 = vpop.f32.mrb[28].mxu0  ;;  %v1119_v42 = vsel %vm1068_vm1, %v1116_v3, %v1118_v47 }
 0x13a   : > { %v1121_v60 = vsel %vm1068_vm1, %v1118_v47, %v1120_v10  ;;  %v6356_v30 = vsel %vm904_vm0, %v952_v1, %v954_v4  ;;  %v6359_v43 = vsel %vm904_vm0, %v954_v4, %v956_v36  ;;  %v6361_v21 = vmax.f32 %v5254_v17, 0.0  ;;  %v684_v26 = vpop.f32.mrb[29].mxu0  ;;  %5561 = vmatpush1.bf16.msra.mxu1 %v5648_v53  ;;  %v5649_v1 = vld [vmem:[%s8166_s2 + $0x50] sm:$0xff]  }
 0x13b   : > { %8316 = vst [vmem:[#allocation37_spill] sm:$0xff] %v6351_v55  ;;  %v1384_v23 = vpack.c.bf16 %v1119_v42, %v1117_v37  ;;  %v1387_v46 = vpack.c.bf16 %v6341_v48, %v1121_v60  ;;  %v6366_v13 = vmax.f32 %v684_v26, 0.0  ;;  %v5255_v3 = vpop.f32.mrb[30].mxu0  ;;  %2230 = vmatpush1.bf16.msra.mxu0 %v5648_v53  ;;  %5546 = vmatprep.subr.bf16.mxu1 %v8299_v57 }
 0x13c   : > { %v6376_v10 = vpack.c.bf16 %v6359_v43, %v6356_v30  ;;  %v6380_v4 = vpack.c.bf16 %v6312_v28, %v6286_v63  ;;  %v964_v26 = vrot.slane %v6361_v21, 1  ;;  %v1128_v47 = vrot.slane %v6361_v21, 2  ;;  %v687_v17 = vpop.f32.mrb[31].mxu0  ;;  %2231 = vmatprep.subr.bf16.mxu0 %v8299_v57 }
 0x13d   : > { %v6384_v53 = vmax.f32 %v5255_v3, 0.0  ;;  %5316 = vmatprep.mubr.bf16.mxu0 %v1384_v23  ;;  %v6388_v36 = vpack.c.bf16 %v1117_v37, %v6261_v33  ;;  %v960_v55 = vrot.slane %v6366_v13, 1  ;;  %v6392_v8 = vmax.f32 %v687_v17, 0.0 }
 0x13e   : > { %8317 = vst [vmem:[#allocation38_spill] sm:$0xff] %v6376_v10  ;;  %8318 = vst [vmem:[#allocation39_spill] sm:$0xff] %v6380_v4  ;;  %v1124_v10 = vrot.slane %v6366_v13, 2  ;;  %v8321_v4 = vpack.c.bf16 %v6050_v59, %v6076_v35  ;;  %5317 = vmatmul.mubr.bf16.gmra.mrb[76].mxu0 %v1387_v46  ;;  %v8322_v33 = vpack.c.bf16 %v6196_v34, %v6173_v18  ;;  %5562 = vmatpush1.bf16.msra.mxu1 %v5649_v1 }
 0x13f   : > { %8319 = vst [vmem:[#allocation40_spill] sm:$0xff] %v6384_v53  ;;  %8320 = vst [vmem:[#allocation41_spill] sm:$0xff] %v6388_v36  ;;  %v966_v23 = vrot.slane %v6384_v53, 1  ;;  %v1130_v39 = vrot.slane %v6384_v53, 2  ;;  %v6406_v37 = vpack.c.bf16 %v6384_v53, %v6361_v21  ;;  %v6408_v17 = vpack.c.bf16 %v1121_v60, %v1119_v42  ;;  %2232 = vmatpush1.bf16.msra.mxu0 %v5649_v1 }
 0x140   : > { %1690 = vmatmul.mubr.bf16.gmra.mrb[20].mxu1 %v8321_v4  ;;  %v962_v59 = vrot.slane %v6392_v8, 1  ;;  %v1126_v35 = vrot.slane %v6392_v8, 2  ;;  %v1125_v46 = vsel %vm1068_vm1, %v1122_v24, %v1124_v10  ;;  %v5650_v4 = vld [vmem:[%s8166_s2 + $0x58] sm:$0xff]   ;;  %v6417_v34 = vsel %vm904_vm0, %v958_v45, %v960_v55  ;;  %5547 = vmatprep.subr.bf16.mxu1 %v8299_v57 }
 0x141   : > { %1697 = vmatprep.mubr.bf16.mxu1 %v8322_v33  ;;  %8323 = vst [vmem:[#allocation42_spill] sm:$0xff] %v6406_v37  ;;  %8324 = vst [vmem:[#allocation43_spill] sm:$0xff] %v6408_v17  ;;  %v6421_v18 = vsel %vm1068_vm1, %v1128_v47, %v1130_v39  ;;  %2233 = vmatprep.subr.bf16.mxu0 %v8299_v57  ;;  %v6425_v42 = vsel %vm904_vm0, %v964_v26, %v966_v23  ;;  %v5258_v1 = vpop.f32.mrb[32].mxu0 }
 0x142   : > { %v6431_v60 = vpack.c.bf16 %v6417_v34, %v6345_v54  ;;  %v1127_v45 = vsel %vm1068_vm1, %v1124_v10, %v1126_v35  ;;  %v1129_v33 = vsel %vm1068_vm1, %v1126_v35, %v1128_v47  ;;  %v6436_v3 = vsel %vm904_vm0, %v960_v55, %v962_v59  ;;  %v700_v37 = vpop.f32.mrb[33].mxu0  ;;  %5563 = vmatpush1.bf16.msra.mxu1 %v5650_v4  ;;  %v5651_v55 = vld [vmem:[%s8166_s2 + $0x60] sm:$0xff]  }
 0x143   : > { %v6439_v17 = vsel %vm904_vm0, %v962_v59, %v964_v26  ;;  %v6441_v36 = vmax.f32 %v5258_v1, 0.0  ;;  %v1390_v38 = vpack.c.bf16 %v1127_v45, %v1125_v46  ;;  %v1393_v24 = vpack.c.bf16 %v6421_v18, %v1129_v33  ;;  %v5259_v10 = vpop.f32.mrb[34].mxu0  ;;  %2234 = vmatpush1.bf16.msra.mxu0 %v5650_v4  ;;  %5548 = vmatprep.subr.bf16.mxu1 %v8299_v57 }
 0x144   : > { %8325 = vst [vmem:[#allocation44_spill] sm:$0xff] %v6431_v60  ;;  %v6446_v27 = vmax.f32 %v700_v37, 0.0  ;;  %v6456_v47 = vpack.c.bf16 %v6439_v17, %v6436_v3  ;;  %v6460_v59 = vpack.c.bf16 %v6392_v8, %v6366_v13  ;;  %v6464_v4 = vmax.f32 %v5259_v10, 0.0  ;;  %v703_v1 = vpop.f32.mrb[35].mxu0  ;;  %2235 = vmatprep.subr.bf16.mxu0 %v8299_v57 }
 0x145   : > { %8326 = vst [vmem:[#allocation45_spill] sm:$0xff] %v6441_v36  ;;  %v972_v37 = vrot.slane %v6441_v36, 1  ;;  %v1136_v35 = vrot.slane %v6441_v36, 2  ;;  %5320 = vmatprep.mubr.bf16.mxu0 %v1390_v38  ;;  %v6468_v26 = vpack.c.bf16 %v1125_v46, %v6341_v48  ;;  %v6472_v32 = vmax.f32 %v703_v1, 0.0 }
 0x146   : > { %8327 = vst [vmem:[#allocation46_spill] sm:$0xff] %v6456_v47  ;;  %8328 = vst [vmem:[#allocation47_spill] sm:$0xff] %v6460_v59  ;;  %v968_v60 = vrot.slane %v6446_v27, 1  ;;  %v1132_v47 = vrot.slane %v6446_v27, 2  ;;  %v8332_v59 = vpack.c.bf16 %v6126_v14, %v6068_v31  ;;  %5321 = vmatmul.mubr.bf16.gmra.mrb[80].mxu0 %v1393_v24  ;;  %v974_v38 = vrot.slane %v6464_v4, 1  ;;  %5564 = vmatpush1.bf16.msra.mxu1 %v5651_v55 }
 0x147   : > { %8329 = vst [vmem:[#allocation48_spill] sm:$0xff] %v6464_v4  ;;  %8330 = vst [vmem:[#allocation49_spill] sm:$0xff] %v6468_v26  ;;  %v1138_v49 = vrot.slane %v6464_v4, 2  ;;  %v8333_v48 = vpack.c.bf16 %v6184_v11, %v6199_v51  ;;  %v6486_v46 = vpack.c.bf16 %v6464_v4, %v6441_v36  ;;  %v6488_v1 = vpack.c.bf16 %v1129_v33, %v1127_v45 }
 0x148   : > { %8331 = vst [vmem:[#allocation50_spill] sm:$0xff] %v6472_v32  ;;  %1698 = vmatmul.mubr.bf16.gmra.mrb[24].mxu1 %v8332_v59  ;;  %v970_v14 = vrot.slane %v6472_v32, 1  ;;  %v1134_v31 = vrot.slane %v6472_v32, 2  ;;  %v1133_v24 = vsel %vm1068_vm1, %v1130_v39, %v1132_v47  ;;  %2236 = vmatpush1.bf16.msra.mxu0 %v5651_v55  ;;  %v5652_v59 = vld [vmem:[%s8166_s2 + $0x68] sm:$0xff]   ;;  %v6497_v51 = vsel %vm904_vm0, %v966_v23, %v968_v60 }
 0x149   : > { %1705 = vmatprep.mubr.bf16.mxu1 %v8333_v48  ;;  %8334 = vst [vmem:[#allocation51_spill] sm:$0xff] %v6486_v46  ;;  %8335 = vst [vmem:[#allocation52_spill] sm:$0xff] %v6488_v1  ;;  %5549 = vmatprep.subr.bf16.mxu1 %v8299_v57  ;;  %v6501_v11 = vsel %vm1068_vm1, %v1136_v35, %v1138_v49  ;;  %v6505_v45 = vsel %vm904_vm0, %v972_v37, %v974_v38  ;;  %v5262_v55 = vpop.f32.mrb[36].mxu0 }
 0x14a   : > { %2237 = vmatprep.subr.bf16.mxu0 %v8299_v57  ;;  %v6511_v33 = vpack.c.bf16 %v6497_v51, %v6425_v42  ;;  %v1135_v23 = vsel %vm1068_vm1, %v1132_v47, %v1134_v31  ;;  %v1137_v48 = vsel %vm1068_vm1, %v1134_v31, %v1136_v35  ;;  %v6516_v10 = vsel %vm904_vm0, %v968_v60, %v970_v14  ;;  %v716_v46 = vpop.f32.mrb[37].mxu0  ;;  %v5653_v60 = vld [vmem:[%s8166_s2 + $0x70] sm:$0xff]  }
 0x14b   : > { %v6519_v1 = vsel %vm904_vm0, %v970_v14, %v972_v37  ;;  %v6521_v26 = vmax.f32 %v5262_v55, 0.0  ;;  %v1396_v53 = vpack.c.bf16 %v1135_v23, %v1133_v24  ;;  %v1399_v39 = vpack.c.bf16 %v6501_v11, %v1137_v48  ;;  %5565 = vmatpush1.bf16.msra.mxu1 %v5652_v59  ;;  %v5263_v47 = vpop.f32.mrb[38].mxu0 }
 0x14c   : > { %8336 = vst [vmem:[#allocation53_spill] sm:$0xff] %v6511_v33  ;;  %8337 = vst [vmem:[#allocation54_spill] sm:$0xff] %v6519_v1  ;;  %v6526_v36 = vmax.f32 %v716_v46, 0.0  ;;  %2238 = vmatpush1.bf16.msra.mxu0 %v5652_v59  ;;  %5550 = vmatprep.subr.bf16.mxu1 %v8299_v57  ;;  %v6536_v35 = vpack.c.bf16 %v6519_v1, %v6516_v10  ;;  %v6540_v14 = vpack.c.bf16 %v6472_v32, %v6446_v27  ;;  %v719_v55 = vpop.f32.mrb[39].mxu0 }
 0x14d   : > { %8338 = vst [vmem:[#allocation55_spill] sm:$0xff] %v6521_v26  ;;  %v980_v46 = vrot.slane %v6521_v26, 1  ;;  %v1144_v31 = vrot.slane %v6521_v26, 2  ;;  %v6544_v59 = vmax.f32 %v5263_v47, 0.0  ;;  %5324 = vmatprep.mubr.bf16.mxu0 %v1396_v53  ;;  %2239 = vmatprep.subr.bf16.mxu0 %v8299_v57  ;;  %v6548_v37 = vpack.c.bf16 %v1133_v24, %v6421_v18 }
 0x14e   : > { %8339 = vst [vmem:[#allocation56_spill] sm:$0xff] %v6536_v35  ;;  %8340 = vst [vmem:[#allocation57_spill] sm:$0xff] %v6540_v14  ;;  %v976_v33 = vrot.slane %v6526_v36, 1  ;;  %v1140_v35 = vrot.slane %v6526_v36, 2  ;;  %v6552_v1 = vmax.f32 %v719_v55, 0.0  ;;  %v8343_v14 = vpack.c.bf16 %v6121_v25, %v6150_v12  ;;  %5325 = vmatmul.mubr.bf16.gmra.mrb[84].mxu0 %v1399_v39 }
 0x14f   : > { %8341 = vst [vmem:[#allocation58_spill] sm:$0xff] %v6544_v59  ;;  %8342 = vst [vmem:[#allocation59_spill] sm:$0xff] %v6548_v37  ;;  %v982_v53 = vrot.slane %v6544_v59, 1  ;;  %v1146_v32 = vrot.slane %v6544_v59, 2  ;;  %v6563_v18 = vpack.c.bf16 %v6544_v59, %v6521_v26  ;;  %v8345_v24 = vpack.c.bf16 %v6276_v56, %v6254_v29  ;;  %5566 = vmatpush1.bf16.msra.mxu1 %v5653_v60  ;;  %v6583_v56 = vld [vmem:[%s8166_s2 + $0x80] sm:$0xff]  }
 0x150   : > { %1706 = vmatmul.mubr.bf16.gmra.mrb[28].mxu1 %v8343_v14  ;;  %v6568_v55 = vpack.c.bf16 %v1137_v48, %v1135_v23  ;;  %v978_v25 = vrot.slane %v6552_v1, 1  ;;  %v1142_v12 = vrot.slane %v6552_v1, 2  ;;  %v1141_v39 = vsel %vm1068_vm1, %v1138_v49, %v1140_v35  ;;  %2240 = vmatpush1.bf16.msra.mxu0 %v5653_v60  ;;  %v5654_v14 = vld [vmem:[%s8166_s2 + $0x78] sm:$0xff]   ;;  %8347 = vst [vmem:[#allocation62_spill] sm:$0xff] %v6583_v56 }
 0x151   : > { %8344 = vst [vmem:[#allocation60_spill] sm:$0xff] %v6563_v18  ;;  %1713 = vmatprep.mubr.bf16.mxu1 %v8345_v24  ;;  %v6577_v47 = vsel %vm904_vm0, %v974_v38, %v976_v33  ;;  %5551 = vmatprep.subr.bf16.mxu1 %v8299_v57  ;;  %v6586_v29 = vsel %vm1068_vm1, %v1144_v31, %v1146_v32  ;;  %v5266_v48 = vpop.f32.mrb[40].mxu0 }
 0x152   : > { %8346 = vst [vmem:[#allocation61_spill] sm:$0xff] %v6568_v55  ;;  %2241 = vmatprep.subr.bf16.mxu0 %v8299_v57  ;;  %v6590_v49 = vsel %vm904_vm0, %v980_v46, %v982_v53  ;;  %v6596_v38 = vpack.c.bf16 %v6577_v47, %v6505_v45  ;;  %v1143_v60 = vsel %vm1068_vm1, %v1140_v35, %v1142_v12  ;;  %v6606_v57 = vmax.f32 %v5266_v48, 0.0  ;;  %v732_v18 = vpop.f32.mrb[41].mxu0 }
 0x153   : > { %v1145_v24 = vsel %vm1068_vm1, %v1142_v12, %v1144_v31  ;;  %v6601_v55 = vsel %vm904_vm0, %v976_v33, %v978_v25  ;;  %v6604_v37 = vsel %vm904_vm0, %v978_v25, %v980_v46  ;;  %v1402_v4 = vpack.c.bf16 %v1143_v60, %v1141_v39  ;;  %5567 = vmatpush1.bf16.msra.mxu1 %v5654_v14  ;;  %v5267_v35 = vpop.f32.mrb[42].mxu0 }
 0x154   : > { %8348 = vst [vmem:[#allocation63_spill] sm:$0xff] %v6596_v38  ;;  %8349 = vst [vmem:[#allocation64_spill] sm:$0xff] %v6606_v57  ;;  %v1405_v23 = vpack.c.bf16 %v6586_v29, %v1145_v24  ;;  %v6611_v26 = vmax.f32 %v732_v18, 0.0  ;;  %2242 = vmatpush1.bf16.msra.mxu0 %v5654_v14  ;;  %5344 = vmatprep.subr.bf16.mxu1 %v6583_v56  ;;  %v6618_v46 = vpack.c.bf16 %v6604_v37, %v6601_v55  ;;  %v735_v14 = vpop.f32.mrb[43].mxu0 }
 0x155   : > { %v6622_v31 = vpack.c.bf16 %v6552_v1, %v6526_v36  ;;  %v988_v25 = vrot.slane %v6606_v57, 1  ;;  %v1152_v18 = vrot.slane %v6606_v57, 2  ;;  %v6626_v12 = vmax.f32 %v5267_v35, 0.0  ;;  %5328 = vmatprep.mubr.bf16.mxu0 %v1402_v4 }
 0x156   : > { %8350 = vst [vmem:[#allocation65_spill] sm:$0xff] %v6618_v46  ;;  %v6629_v48 = vpack.c.bf16 %v1141_v39, %v6501_v11  ;;  %v984_v33 = vrot.slane %v6611_v26, 1  ;;  %v1148_v38 = vrot.slane %v6611_v26, 2  ;;  %v6633_v46 = vmax.f32 %v735_v14, 0.0  ;;  %5329 = vmatmul.mubr.bf16.gmra.mrb[88].mxu0 %v1405_v23 }
 0x157   : > { %8351 = vst [vmem:[#allocation66_spill] sm:$0xff] %v6622_v31  ;;  %8352 = vst [vmem:[#allocation67_spill] sm:$0xff] %v6626_v12  ;;  %v8355_v31 = vpack.c.bf16 %v6206_v22, %v6142_v5  ;;  %v990_v56 = vrot.slane %v6626_v12, 1  ;;  %v1154_v4 = vrot.slane %v6626_v12, 2  ;;  %v8356_v11 = vpack.c.bf16 %v6265_v58, %v6279_v41 }
 0x158   : > { %8353 = vst [vmem:[#allocation68_spill] sm:$0xff] %v6629_v48  ;;  %8354 = vst [vmem:[#allocation69_spill] sm:$0xff] %v6633_v46  ;;  %v6647_v39 = vpack.c.bf16 %v6626_v12, %v6606_v57  ;;  %v6649_v14 = vpack.c.bf16 %v1145_v24, %v1143_v60  ;;  %v986_v22 = vrot.slane %v6633_v46, 1  ;;  %v1150_v5 = vrot.slane %v6633_v46, 2 }
 0x159   : > { %1714 = vmatmul.mubr.bf16.gmra.mrb[32].mxu1 %v8355_v31  ;;  %v1149_v23 = vsel %vm1068_vm1, %v1146_v32, %v1148_v38  ;;  %v6655_v31 = vsel %vm904_vm0, %v982_v53, %v984_v33  ;;  %v6658_v35 = vsel %vm1068_vm1, %v1152_v18, %v1154_v4  ;;  %v6661_v41 = vsel %vm904_vm0, %v988_v25, %v990_v56  ;;  %v5270_v24 = vpop.f32.mrb[44].mxu0 }
 0x15a   : > { %1721 = vmatprep.mubr.bf16.mxu1 %v8356_v11  ;;  %8357 = vst [vmem:[#allocation70_spill] sm:$0xff] %v6647_v39  ;;  %8358 = vst [vmem:[#allocation71_spill] sm:$0xff] %v6649_v14  ;;  %v6667_v60 = vpack.c.bf16 %v6655_v31, %v6590_v49  ;;  %v1151_v11 = vsel %vm1068_vm1, %v1148_v38, %v1150_v5  ;;  %v1153_v32 = vsel %vm1068_vm1, %v1150_v5, %v1152_v18  ;;  %v748_v39 = vpop.f32.mrb[45].mxu0 }
 0x15b   : > { %8359 = vst [vmem:[#allocation72_spill] sm:$0xff] %v6661_v41  ;;  %v6672_v53 = vsel %vm904_vm0, %v984_v33, %v986_v22  ;;  %v6675_v14 = vsel %vm904_vm0, %v986_v22, %v988_v25  ;;  %v6677_v48 = vmax.f32 %v5270_v24, 0.0  ;;  %v1408_v59 = vpack.c.bf16 %v1151_v11, %v1149_v23  ;;  %v5271_v38 = vpop.f32.mrb[46].mxu0 }
 0x15c   : > { %8360 = vst [vmem:[#allocation73_spill] sm:$0xff] %v6667_v60  ;;  %8361 = vst [vmem:[#allocation74_spill] sm:$0xff] %v6675_v14  ;;  %v1411_v58 = vpack.c.bf16 %v6658_v35, %v1153_v32  ;;  %v6682_v57 = vmax.f32 %v748_v39, 0.0  ;;  %v6688_v33 = vpack.c.bf16 %v6675_v14, %v6672_v53  ;;  %v6692_v25 = vpack.c.bf16 %v6633_v46, %v6611_v26  ;;  %v751_v39 = vpop.f32.mrb[47].mxu0 }
 0x15d   : > { %8362 = vst [vmem:[#allocation75_spill] sm:$0xff] %v6677_v48  ;;  %v996_v22 = vrot.slane %v6677_v48, 1  ;;  %v1160_v5 = vrot.slane %v6677_v48, 2  ;;  %v6696_v24 = vmax.f32 %v5271_v38, 0.0  ;;  %5332 = vmatprep.mubr.bf16.mxu0 %v1408_v59  ;;  %v6699_v60 = vpack.c.bf16 %v1149_v23, %v6586_v29 }
 0x15e   : > { %8363 = vst [vmem:[#allocation76_spill] sm:$0xff] %v6688_v33  ;;  %8364 = vst [vmem:[#allocation77_spill] sm:$0xff] %v6692_v25  ;;  %v992_v18 = vrot.slane %v6682_v57, 1  ;;  %v1156_v14 = vrot.slane %v6682_v57, 2  ;;  %v6703_v33 = vmax.f32 %v751_v39, 0.0  ;;  %v8367_v25 = vpack.c.bf16 %v6201_v52, %v6232_v61  ;;  %5333 = vmatmul.mubr.bf16.gmra.mrb[92].mxu0 %v1411_v58 }
 0x15f   : > { %8365 = vst [vmem:[#allocation78_spill] sm:$0xff] %v6699_v60  ;;  %v998_v46 = vrot.slane %v6696_v24, 1  ;;  %v1162_v59 = vrot.slane %v6696_v24, 2  ;;  %v8368_v29 = vpack.c.bf16 %v6356_v30, %v6337_v15  ;;  %v6717_v23 = vpack.c.bf16 %v6696_v24, %v6677_v48 }
 0x160   : > { %8366 = vst [vmem:[#allocation79_spill] sm:$0xff] %v6703_v33  ;;  %v6719_v39 = vpack.c.bf16 %v1153_v32, %v1151_v11  ;;  %v994_v52 = vrot.slane %v6703_v33, 1  ;;  %v1158_v61 = vrot.slane %v6703_v33, 2  ;;  %v1157_v58 = vsel %vm1068_vm1, %v1154_v4, %v1156_v14 }
 0x161   : > { %1722 = vmatmul.mubr.bf16.gmra.mrb[36].mxu1 %v8367_v25  ;;  %8369 = vst [vmem:[#allocation80_spill] sm:$0xff] %v6717_v23  ;;  %v6725_v25 = vsel %vm904_vm0, %v990_v56, %v992_v18  ;;  %v1163_v38 = vsel %vm1068_vm1, %v1160_v5, %v1162_v59  ;;  %v6729_v30 = vsel %vm904_vm0, %v996_v22, %v998_v46  ;;  %v5274_v32 = vpop.f32.mrb[48].mxu0 }
 0x162   : > { %1729 = vmatprep.mubr.bf16.mxu1 %v8368_v29  ;;  %8370 = vst [vmem:[#allocation81_spill] sm:$0xff] %v6719_v39  ;;  %v6735_v11 = vpack.c.bf16 %v6725_v25, %v6661_v41  ;;  %v1159_v29 = vsel %vm1068_vm1, %v1156_v14, %v1158_v61  ;;  %v1161_v4 = vsel %vm1068_vm1, %v1158_v61, %v1160_v5  ;;  %v6745_v60 = vmax.f32 %v5274_v32, 0.0  ;;  %v764_v23 = vpop.f32.mrb[49].mxu0 }
 0x163   : > { %v6740_v56 = vsel %vm904_vm0, %v992_v18, %v994_v52  ;;  %v6743_v39 = vsel %vm904_vm0, %v994_v52, %v996_v22  ;;  %v1414_v12 = vpack.c.bf16 %v1159_v29, %v1157_v58  ;;  %v1417_v15 = vpack.c.bf16 %v1163_v38, %v1161_v4  ;;  %v5275_v41 = vpop.f32.mrb[50].mxu0 }
 0x164   : > { %8371 = vst [vmem:[#allocation82_spill] sm:$0xff] %v6735_v11  ;;  %8372 = vst [vmem:[#allocation83_spill] sm:$0xff] %v6745_v60  ;;  %v6749_v11 = vmax.f32 %v764_v23, 0.0  ;;  %v6755_v18 = vpack.c.bf16 %v6743_v39, %v6740_v56  ;;  %v6759_v22 = vpack.c.bf16 %v6703_v33, %v6682_v57  ;;  %v1004_v5 = vrot.slane %v6745_v60, 1  ;;  %v767_v23 = vpop.f32.mrb[51].mxu0 }
 0x165   : > { %v1168_v52 = vrot.slane %v6745_v60, 2  ;;  %v6763_v61 = vmax.f32 %v5275_v41, 0.0  ;;  %5336 = vmatprep.mubr.bf16.mxu0 %v1414_v12  ;;  %v6766_v32 = vpack.c.bf16 %v1157_v58, %v6658_v35  ;;  %v8380_v35 = vpack.c.bf16 %v6345_v54, %v6359_v43 }
 0x166   : > { %8373 = vst [vmem:[#allocation84_spill] sm:$0xff] %v6749_v11  ;;  %8374 = vst [vmem:[#allocation85_spill] sm:$0xff] %v6755_v18  ;;  %v1000_v14 = vrot.slane %v6749_v11, 1  ;;  %v1164_v48 = vrot.slane %v6749_v11, 2  ;;  %v6770_v18 = vmax.f32 %v767_v23, 0.0  ;;  %5337 = vmatmul.mubr.bf16.gmra.mrb[96].mxu0 %v1417_v15  ;;  %v6782_v58 = vpack.c.bf16 %v1161_v4, %v1159_v29 }
 0x167   : > { %8375 = vst [vmem:[#allocation86_spill] sm:$0xff] %v6759_v22  ;;  %8376 = vst [vmem:[#allocation87_spill] sm:$0xff] %v6763_v61  ;;  %v8379_v22 = vpack.c.bf16 %v6286_v63, %v6224_v7  ;;  %v1006_v33 = vrot.slane %v6763_v61, 1  ;;  %v1170_v12 = vrot.slane %v6763_v61, 2 }
 0x168   : > { %8377 = vst [vmem:[#allocation88_spill] sm:$0xff] %v6766_v32  ;;  %8378 = vst [vmem:[#allocation89_spill] sm:$0xff] %v6770_v18  ;;  %v1002_v63 = vrot.slane %v6770_v18, 1  ;;  %v1166_v7 = vrot.slane %v6770_v18, 2  ;;  %v1165_v15 = vsel %vm1068_vm1, %v1162_v59, %v1164_v48 }
 0x169   : > { %1730 = vmatmul.mubr.bf16.gmra.mrb[40].mxu1 %v8379_v22  ;;  %8381 = vst [vmem:[#allocation90_spill] sm:$0xff] %v6782_v58  ;;  %v6790_v22 = vsel %vm904_vm0, %v998_v46, %v1000_v14  ;;  %v6793_v41 = vsel %vm1068_vm1, %v1168_v52, %v1170_v12  ;;  %v6796_v43 = vsel %vm904_vm0, %v1004_v5, %v1006_v33  ;;  %v6810_v46 = vpop.f32.mrb[52].mxu0 }
 0x16a   : > { %1737 = vmatprep.mubr.bf16.mxu1 %v8380_v35  ;;  %8382 = vst [vmem:[#allocation91_spill] sm:$0xff] %v6796_v43  ;;  %v6802_v29 = vpack.c.bf16 %v6790_v22, %v6729_v30  ;;  %v6805_v4 = vsel %vm1068_vm1, %v1164_v48, %v1166_v7  ;;  %v6808_v59 = vsel %vm1068_vm1, %v1166_v7, %v1168_v52  ;;  %8384 = vst [vmem:[#allocation93_spill] sm:$0xff] %v6810_v46  ;;  %v780_v58 = vpop.f32.mrb[53].mxu0 }
 0x16b   : > { %v6813_v35 = vsel %vm904_vm0, %v1000_v14, %v1002_v63  ;;  %v6816_v23 = vsel %vm904_vm0, %v1002_v63, %v1004_v5  ;;  %v1420_v54 = vpack.c.bf16 %v6805_v4, %v1165_v15  ;;  %v1423_v61 = vpack.c.bf16 %v6793_v41, %v6808_v59  ;;  %v5279_v7 = vpop.f32.mrb[54].mxu0 }
 0x16c   : > { %8383 = vst [vmem:[#allocation92_spill] sm:$0xff] %v6802_v29  ;;  %8385 = vst [vmem:[#allocation94_spill] sm:$0xff] %v6813_v35  ;;  %v1419_v48 = vpack.c.bf16 %v6813_v35, %v6790_v22  ;;  %v6823_v32 = vmax.f32 %v780_v58, 0.0  ;;  %v1422_v52 = vpack.c.bf16 %v6796_v43, %v6816_v23  ;;  %v6827_v14 = vpack.c.bf16 %v1165_v15, %v1163_v38  ;;  %v783_v63 = vpop.f32.mrb[55].mxu0  ;;  %v8453_v22 = vld [vmem:[#allocation29_spill] sm:$0xff]  ;;  %v8477_v35 = vld [vmem:[#allocation4_spill] sm:$0xff] }
 0x16d   : > { %8386 = vst [vmem:[#allocation95_spill] sm:$0xff] %v6816_v23  ;;  %5340 = vmatprep.mubr.bf16.mxu0 %v1420_v54  ;;  %v8388_v58 = vpack.c.bf16 %v6281_v9, %v6312_v28  ;;  %v6840_v15 = vmax.f32 %v783_v63, 0.0  ;;  %v5661_v54 = vld [vmem:[%s8166_s2 + $0x200] sm:$0xff]   ;;  %v8390_v46 = vpack.c.bf16 %v6436_v3, %v6417_v34  ;;  %v8391_v29 = vpack.c.bf16 %v5927_v20, %v5924_v19  ;;  %v5662_v20 = vld [vmem:[%s8166_s2 + $0x208] sm:$0xff]   ;;  %v8409_v63 = vld [vmem:[#allocation13_spill] sm:$0xff] }
 0x16e   : > { %8387 = vst [vmem:[#allocation96_spill] sm:$0xff] %v6823_v32  ;;  %5341 = vmatmul.mubr.bf16.gmra.mrb[100].mxu0 %v1423_v61  ;;  %v8261_v7 = vrot.slane %v6823_v32, 1  ;;  %v8262_v38 = vrot.slane %v6823_v32, 2  ;;  %5408 = vmatprep.subr.bf16.mxu0 %v5661_v54  ;;  %v8393_v34 = vpack.c.bf16 %v6366_v13, %v6304_v44  ;;  %v8400_v13 = vld [vmem:[#allocation9_spill] sm:$0xff]  ;;  %v8469_v19 = vld [vmem:[#allocation42_spill] sm:$0xff] }
 0x16f   : > { %8389 = vst [vmem:[#allocation97_spill] sm:$0xff] %v6840_v15  ;;  %2243 = vmatprep.mubr.bf16.mxu0 %v8391_v29  ;;  %v8395_v29 = vpack.c.bf16 %v6425_v42, %v6439_v17  ;;  %v8401_v44 = vpack.c.bf16 %v5979_v50, %v8400_v13  ;;  %v5668_v17 = vld [vmem:[%s8166_s2 + $0x220] sm:$0xff]   ;;  %v8405_v42 = vld [vmem:[#allocation5_spill] sm:$0xff]  ;;  %v8424_v13 = vpack.c.bf16 %v6672_v53, %v6655_v31 }
 0x170   : > { %v6856_v9 = vsel %vm1068_vm1, %v1170_v12, %v8262_v38  ;;  %v6863_v3 = vsel %vm904_vm0, %v1006_v33, %v8261_v7  ;;  %v8394_v12 = vpack.c.bf16 %v5904_v6, %v5899_v0  ;;  %v8396_v33 = vpack.c.bf16 %v5960_v40, %v5918_v16  ;;  %v5666_v0 = vld [vmem:[%s8166_s2 + $0x218] sm:$0xff]   ;;  %v8470_v61 = vld [vmem:[#allocation86_spill] sm:$0xff] }
 0x171   : > { %1738 = vmatmul.mubr.bf16.gmra.mrb[44].mxu1 %v8388_v58  ;;  %8392 = vst [vmem:[#allocation98_spill] sm:$0xff] %v6863_v3  ;;  %v8397_v6 = vpack.c.bf16 %v6361_v21, %v6392_v8  ;;  %v8398_v16 = vpack.c.bf16 %v5901_v2, %v5897_v62  ;;  %v8399_v40 = vpack.c.bf16 %v6516_v10, %v6497_v51  ;;  %v5669_v62 = vld [vmem:[%s8166_s2 + $0x228] sm:$0xff]   ;;  %v8402_v2 = vld [vmem:[#allocation40_spill] sm:$0xff]  ;;  %v8404_v21 = vld [vmem:[#allocation6_spill] sm:$0xff]  ;;  %v8473_v3 = vmov 0  }
 0x172   : > { %1745 = vmatprep.mubr.bf16.mxu1 %v8390_v46  ;;  %v5664_v46 = vld [vmem:[%s8166_s2 + $0x210] sm:$0xff]   ;;  %v8403_v8 = vpack.c.bf16 %v6446_v27, %v8402_v2  ;;  %v8406_v50 = vpack.c.bf16 %v8404_v21, %v8405_v42  ;;  %v8407_v10 = vld [vmem:[#allocation54_spill] sm:$0xff]  ;;  %v5673_v27 = vld [vmem:[%s8166_s2 + $0x238] sm:$0xff]   ;;  %v8437_v53 = vpack.c.bf16 %v6740_v56, %v6725_v25  ;;  %v8449_v56 = vpack.c.bf16 %v6749_v11, %v6696_v24 }
 0x173   : > { %v8408_v51 = vpack.c.bf16 %v6505_v45, %v8407_v10  ;;  %v5671_v58 = vld [vmem:[%s8166_s2 + $0x230] sm:$0xff]   ;;  %v8413_v45 = vld [vmem:[#allocation7_spill] sm:$0xff]  ;;  %v8434_v21 = vld [vmem:[#allocation69_spill] sm:$0xff] }
 0x174   : > { %v8436_v31 = vld [vmem:[#allocation17_spill] sm:$0xff]  ;;  %v8447_v25 = vld [vmem:[#allocation23_spill] sm:$0xff] }
 0x175   : > { %v5656_v24 = vld [vmem:[%s8166_s2 + $0x88] sm:$0xff]   ;;  %v8474_v11 = vld [vmem:[#allocation57_spill] sm:$0xff] }
 0x176   : > { %2244 = vmatmul.mubr.bf16.vlgmr.msra.gmra.mrb[104].mxu0 %v8394_v12  ;;  %v8414_v12 = vpack.c.bf16 %v6601_v55, %v6577_v47  ;;  %v8423_v55 = vld [vmem:[#allocation12_spill] sm:$0xff] }
 0x177   : > { %2251 = vmatprep.mubr.bf16.mxu0 %v8396_v33  ;;  %5409 = vmatpush3.bf16.msra.mxu0 %v5661_v54  ;;  %v8410_v54 = vld [vmem:[#allocation45_spill] sm:$0xff]  ;;  %v8416_v33 = vld [vmem:[#allocation48_spill] sm:$0xff] }
 0x178   : > { %5410 = vmatprep.subr.bf16.mxu0 %v5662_v20 }
 0x179   : > { %1746 = vmatmul.mubr.bf16.gmra.mrb[48].mxu1 %v8393_v34 }
 0x17a   : > { %1753 = vmatprep.mubr.bf16.mxu1 %v8395_v29  ;;  %v8415_v29 = vld [vmem:[#allocation14_spill] sm:$0xff] }
 0x17b   : > { %5411 = vmatpush3.bf16.msra.mxu0 %v5662_v20  ;;  %v8411_v20 = vld [vmem:[#allocation50_spill] sm:$0xff] }
 0x17c   : > { %5412 = vmatprep.subr.bf16.mxu0 %v5664_v46  ;;  %v8412_v34 = vpack.c.bf16 %v8410_v54, %v8411_v20  ;;  %v8444_v54 = vld [vmem:[#allocation75_spill] sm:$0xff] }
 0x17d   : > { %v8445_v20 = vld [vmem:[#allocation79_spill] sm:$0xff] }
 0x17e   : > { %2252 = vmatmul.mubr.bf16.gmra.mrb[108].mxu0 %v8398_v16  ;;  %v8420_v16 = vld [vmem:[#allocation19_spill] sm:$0xff] }
 0x17f   : > { %2259 = vmatprep.mubr.bf16.mxu0 %v8401_v44  ;;  %5413 = vmatpush3.bf16.msra.mxu0 %v5664_v46  ;;  %v8417_v46 = vpack.c.bf16 %v6526_v36, %v8416_v33  ;;  %v8425_v36 = vld [vmem:[#allocation20_spill] sm:$0xff]  ;;  %v8426_v44 = vld [vmem:[#allocation58_spill] sm:$0xff]  ;;  %v8455_v33 = vld [vmem:[#allocation73_spill] sm:$0xff] }
 0x180   : > { %5414 = vmatprep.subr.bf16.mxu0 %v5666_v0 }
 0x181   : > { %1754 = vmatmul.mubr.bf16.gmra.mrb[52].mxu1 %v8397_v6  ;;  %v8419_v6 = vpack.c.bf16 %v6590_v49, %v6604_v37  ;;  %v8428_v37 = vld [vmem:[#allocation21_spill] sm:$0xff]  ;;  %v8429_v49 = vld [vmem:[#allocation72_spill] sm:$0xff] }
 0x182   : > { %1761 = vmatprep.mubr.bf16.mxu1 %v8399_v40  ;;  %v8421_v40 = vld [vmem:[#allocation55_spill] sm:$0xff] }
 0x183   : > { %5415 = vmatpush3.bf16.msra.mxu0 %v5666_v0  ;;  %v8418_v0 = vld [vmem:[#allocation15_spill] sm:$0xff]  ;;  %v8422_v47 = vpack.c.bf16 %v8421_v40, %v6552_v1  ;;  %v8432_v1 = vld [vmem:[#allocation25_spill] sm:$0xff]  ;;  %v8459_v40 = vld [vmem:[#allocation44_spill] sm:$0xff] }
 0x184   : > { %5416 = vmatprep.subr.bf16.mxu0 %v5668_v17 }
 0x186   : > { %2260 = vmatmul.mubr.bf16.gmra.mrb[112].mxu0 %v8406_v50  ;;  %v8439_v50 = vld [vmem:[#allocation67_spill] sm:$0xff] }
 0x187   : > { %2267 = vmatprep.mubr.bf16.mxu0 %v8409_v63  ;;  %5417 = vmatpush3.bf16.msra.mxu0 %v5668_v17  ;;  %v8427_v17 = vpack.c.bf16 %v6611_v26, %v8426_v44  ;;  %v8438_v26 = vld [vmem:[#allocation26_spill] sm:$0xff]  ;;  %v8440_v10 = vpack.c.bf16 %v6682_v57, %v8439_v50  ;;  %v8448_v57 = vld [vmem:[#allocation32_spill] sm:$0xff]  ;;  %v5658_v44 = vld [vmem:[%s8166_s2 + $0x98] sm:$0xff]  }
 0x188   : > { %5418 = vmatprep.subr.bf16.mxu0 %v5669_v62  ;;  %v8467_v50 = vld [vmem:[#allocation53_spill] sm:$0xff] }
 0x189   : > { %1762 = vmatmul.mubr.bf16.gmra.mrb[56].mxu1 %v8403_v8  ;;  %v8433_v8 = vld [vmem:[#allocation64_spill] sm:$0xff] }
 0x18a   : > { %1769 = vmatprep.mubr.bf16.mxu1 %v8408_v51  ;;  %v8435_v42 = vpack.c.bf16 %v8433_v8, %v8434_v21  ;;  %v8441_v51 = vld [vmem:[#allocation27_spill] sm:$0xff]  ;;  %v5659_v8 = vld [vmem:[%s8166_s2 + $0xa0] sm:$0xff]  }
 0x18b   : > { %5419 = vmatpush3.bf16.msra.mxu0 %v5669_v62  ;;  %v8430_v62 = vld [vmem:[#allocation74_spill] sm:$0xff]  ;;  %v5660_v21 = vld [vmem:[%s8166_s2 + $0xa8] sm:$0xff]  }
 0x18c   : > { %5420 = vmatprep.subr.bf16.mxu0 %v5671_v58  ;;  %v8431_v2 = vpack.c.bf16 %v8429_v49, %v8430_v62  ;;  %v8462_v49 = vld [vmem:[#allocation77_spill] sm:$0xff]  ;;  %v8463_v62 = vld [vmem:[#allocation46_spill] sm:$0xff] }
 0x18e   : > { %2268 = vmatmul.mubr.bf16.gmra.mrb[116].mxu0 %v8413_v45 }
 0x18f   : > { %2275 = vmatprep.mubr.bf16.mxu0 %v8415_v29  ;;  %5421 = vmatpush3.bf16.msra.mxu0 %v5671_v58  ;;  %v8442_v58 = vpack.c.bf16 %v6729_v30, %v6743_v39  ;;  %v8450_v39 = vld [vmem:[#allocation33_spill] sm:$0xff] }
 0x190   : > { %5422 = vmatprep.subr.bf16.mxu0 %v5673_v27  ;;  %v8451_v30 = vld [vmem:[#allocation37_spill] sm:$0xff] }
 0x191   : > { %1770 = vmatmul.mubr.bf16.gmra.mrb[60].mxu1 %v8412_v34  ;;  %v8446_v34 = vpack.c.bf16 %v8444_v54, %v8445_v20  ;;  %v5663_v20 = vld [vmem:[%s8166_s2 + $0xb0] sm:$0xff]  }
 0x192   : > { %1777 = vmatprep.mubr.bf16.mxu1 %v8414_v12  ;;  %v8452_v12 = vpack.c.bf16 %v6745_v60, %v6770_v18  ;;  %v8475_v18 = vld [vmem:[#allocation80_spill] sm:$0xff] }
 0x193   : > { %5423 = vmatpush3.bf16.msra.mxu0 %v5673_v27  ;;  %v8443_v27 = vld [vmem:[#allocation31_spill] sm:$0xff] }
 0x196   : > { %2276 = vmatmul.mubr.bf16.gmra.mrb[120].mxu0 %v8418_v0 }
 0x197   : > { %2283 = vmatprep.mubr.bf16.mxu0 %v8420_v16 }
 0x199   : > { %1778 = vmatmul.mubr.bf16.gmra.mrb[64].mxu1 %v8417_v46  ;;  %v8456_v46 = vld [vmem:[#allocation39_spill] sm:$0xff] }
 0x19a   : > { %1785 = vmatprep.mubr.bf16.mxu1 %v8419_v6  ;;  %v8457_v6 = vld [vmem:[#allocation60_spill] sm:$0xff] }
 0x19e   : > { %2284 = vmatmul.mubr.bf16.gmra.mrb[124].mxu0 %v8423_v55 }
 0x19f   : > { %2291 = vmatprep.mubr.bf16.mxu0 %v8425_v36 }
 0x1a1   : > { %1786 = vmatmul.mubr.bf16.gmra.mrb[68].mxu1 %v8422_v47  ;;  %v8460_v47 = vld [vmem:[#allocation76_spill] sm:$0xff] }
 0x1a2   : > { %1793 = vmatprep.mubr.bf16.mxu1 %v8424_v13  ;;  %v5657_v13 = vld [vmem:[%s8166_s2 + $0x90] sm:$0xff]  }
 0x1a6   : > { %2292 = vmatmul.mubr.bf16.gmra.mrb[128].mxu0 %v8428_v37 }
 0x1a7   : > { %2299 = vmatprep.mubr.bf16.mxu0 %v8432_v1 }
 0x1a9   : > { %1794 = vmatmul.mubr.bf16.gmra.mrb[72].mxu1 %v8427_v17  ;;  %v8461_v17 = vld [vmem:[#allocation35_spill] sm:$0xff] }
 0x1aa   : > { %1801 = vmatprep.mubr.bf16.mxu1 %v8431_v2  ;;  %v8464_v2 = vld [vmem:[#allocation82_spill] sm:$0xff] }
 0x1ae   : > { %2300 = vmatmul.mubr.bf16.gmra.mrb[132].mxu0 %v8436_v31 }
 0x1af   : > { %2307 = vmatprep.mubr.bf16.mxu0 %v8438_v26 }
 0x1b1   : > { %1802 = vmatmul.mubr.bf16.gmra.mrb[76].mxu1 %v8435_v42  ;;  %v8465_v42 = vld [vmem:[#allocation47_spill] sm:$0xff] }
 0x1b2   : > { %1809 = vmatprep.mubr.bf16.mxu1 %v8437_v53  ;;  %v8466_v53 = vld [vmem:[#allocation70_spill] sm:$0xff] }
 0x1b6   : > { %2308 = vmatmul.mubr.bf16.gmra.mrb[136].mxu0 %v8441_v51  ;;  %v5683_v51 = vld [vmem:[%s8166_s2 + $0x1e0] sm:$0xff]  }
 0x1b7   : > { %2315 = vmatprep.mubr.bf16.mxu0 %v8443_v27 }
 0x1b9   : > { %1810 = vmatmul.mubr.bf16.gmra.mrb[80].mxu1 %v8440_v10  ;;  %v8468_v10 = vld [vmem:[#allocation85_spill] sm:$0xff] }
 0x1ba   : > { %1817 = vmatprep.mubr.bf16.mxu1 %v8442_v58 }
 0x1be   : > { %2316 = vmatmul.mubr.bf16.gmra.mrb[140].mxu0 %v8447_v25 }
 0x1bf   : > { %2323 = vmatprep.mubr.bf16.mxu0 %v8448_v57 }
 0x1c1   : > { %1818 = vmatmul.mubr.bf16.gmra.mrb[84].mxu1 %v8446_v34 }
 0x1c2   : > { %1825 = vmatprep.mubr.bf16.mxu1 %v1419_v48  ;;  %v8454_v48 = vld [vmem:[#allocation38_spill] sm:$0xff] }
 0x1c6   : > { %2324 = vmatmul.mubr.bf16.gmra.mrb[144].mxu0 %v8450_v39  ;;  %v5681_v39 = vld [vmem:[%s8166_s2 + $0x1d0] sm:$0xff]  }
 0x1c7   : > { %2331 = vmatprep.mubr.bf16.mxu0 %v8451_v30 }
 0x1c9   : > { %1826 = vmatmul.mubr.bf16.gmra.mrb[88].mxu1 %v8449_v56 }
 0x1ca   : > { %1833 = vmatprep.mubr.bf16.mxu1 %v1422_v52  ;;  %v8458_v52 = vld [vmem:[#allocation62_spill] sm:$0xff] }
 0x1ce   : > { %2332 = vmatmul.mubr.bf16.gmra.mrb[148].mxu0 %v8453_v22 }
 0x1cf   : > { %2339 = vmatprep.mubr.bf16.mxu0 %v8454_v48 }
 0x1d1   : > { %1834 = vmatmul.mubr.bf16.gmra.mrb[92].mxu1 %v8452_v12 }
 0x1d2   : > { %2395 = vmatprep.mubr.bf16.mxu1 %v8455_v33 }
 0x1d6   : > { %2340 = vmatmul.mubr.bf16.gmra.mrb[152].mxu0 %v8456_v46  ;;  %v8494_v46 = vrot.slane %v6823_v32, 2 }
 0x1d7   : > { %2347 = vmatprep.mubr.bf16.mxu0 %v8459_v40 }
 0x1d9   : > { %2396 = vmatmul.mubr.bf16.vlgmr.msra.gmra.mrb[96].mxu1 %v8457_v6 }
 0x1da   : > { %5345 = vmatpush3.bf16.msra.mxu1 %v8458_v52  ;;  %2403 = vmatprep.mubr.bf16.mxu1 %v8460_v47 }
 0x1db   : > { %5346 = vmatprep.subr.bf16.mxu1 %v5656_v24 }
 0x1de   : > { %5347 = vmatpush3.bf16.msra.mxu1 %v5656_v24  ;;  %2348 = vmatmul.mubr.bf16.gmra.mrb[156].mxu0 %v8461_v17  ;;  %v5677_v17 = vld [vmem:[%s8166_s2 + $0x1b0] sm:$0xff]  }
 0x1df   : > { %5348 = vmatprep.subr.bf16.mxu1 %v5657_v13  ;;  %2355 = vmatprep.mubr.bf16.mxu0 %v8463_v62 }
 0x1e1   : > { %2404 = vmatmul.mubr.bf16.gmra.mrb[100].mxu1 %v8462_v49  ;;  %v8486_v49 = vld [vmem:[#allocation10_spill] sm:$0xff] }
 0x1e2   : > { %2411 = vmatprep.mubr.bf16.mxu1 %v8464_v2  ;;  %5349 = vmatpush3.bf16.msra.mxu1 %v5657_v13  ;;  %v8480_v2 = vld [vmem:[#allocation51_spill] sm:$0xff] }
 0x1e3   : > { %5350 = vmatprep.subr.bf16.mxu1 %v5658_v44 }
 0x1e6   : > { %5351 = vmatpush3.bf16.msra.mxu1 %v5658_v44  ;;  %2356 = vmatmul.mubr.bf16.gmra.mrb[160].mxu0 %v8465_v42 }
 0x1e7   : > { %5352 = vmatprep.subr.bf16.mxu1 %v5659_v8  ;;  %2363 = vmatprep.mubr.bf16.mxu0 %v8467_v50 }
 0x1e8   : > { %v1651_v58 = vpop.f32.mrb[0].mxu1  ;;  %v5298_v54 = vpop.f32.mrb[56].mxu0 }
 0x1e9   : > { %2412 = vmatmul.mubr.bf16.gmra.mrb[104].mxu1 %v8466_v53  ;;  %v1653_v34 = vpop.f32.mrb[1].mxu1  ;;  %v1876_v56 = vpop.f32.mrb[57].mxu0 }
 0x1ea   : > { %2419 = vmatprep.mubr.bf16.mxu1 %v8468_v10  ;;  %5353 = vmatpush3.bf16.msra.mxu1 %v5659_v8  ;;  %v7023_v12 = vadd.f32 %v1876_v56, %v1651_v58  ;;  %v1654_v24 = vpop.f32.mrb[2].mxu1  ;;  %v5299_v52 = vpop.f32.mrb[58].mxu0  ;;  %v5665_v8 = vld [vmem:[%s8166_s2 + $0xb8] sm:$0xff]   ;;  %v8471_v34 = vld [vmem:[#allocation56_spill] sm:$0xff] }
 0x1eb   : > { %5354 = vmatprep.subr.bf16.mxu1 %v5660_v21  ;;  %v1656_v13 = vpop.f32.mrb[3].mxu1  ;;  %v1879_v44 = vpop.f32.mrb[59].mxu0  ;;  %v8472_v58 = vld [vmem:[#allocation92_spill] sm:$0xff] }
 0x1ec   : > { %v7025_v28 = vadd.f32 %v1879_v44, %v1654_v24 }
 0x1ee   : > { %5355 = vmatpush3.bf16.msra.mxu1 %v5660_v21  ;;  %2364 = vmatmul.mubr.bf16.gmra.mrb[164].mxu0 %v8469_v19 }
 0x1ef   : > { %5356 = vmatprep.subr.bf16.mxu1 %v5663_v20  ;;  %2371 = vmatprep.mubr.bf16.mxu0 %v8471_v34  ;;  %v5675_v34 = vld [vmem:[%s8166_s2 + $0x1a0] sm:$0xff]  }
 0x1f0   : > { %v1659_v56 = vpop.f32.mrb[4].mxu1  ;;  %v5302_v13 = vpop.f32.mrb[60].mxu0 }
 0x1f1   : > { %2420 = vmatmul.mubr.bf16.gmra.mrb[108].mxu1 %v8470_v61  ;;  %v7034_v21 = vadd.f32 %v5298_v54, %v1659_v56  ;;  %v1661_v24 = vpop.f32.mrb[5].mxu1  ;;  %v1892_v44 = vpop.f32.mrb[61].mxu0  ;;  %v8478_v54 = vld [vmem:[#allocation3_spill] sm:$0xff] }
 0x1f2   : > { %2427 = vmatprep.mubr.bf16.mxu1 %v8472_v58  ;;  %5357 = vmatpush3.bf16.msra.mxu1 %v5663_v20  ;;  %v1662_v5 = vpop.f32.mrb[6].mxu1  ;;  %v5303_v7 = vpop.f32.mrb[62].mxu0  ;;  %v8476_v20 = vld [vmem:[#allocation63_spill] sm:$0xff]  ;;  %v8479_v56 = vpack.c.bf16 %v8477_v35, %v8478_v54  ;;  %v8481_v35 = vld [vmem:[#allocation8_spill] sm:$0xff]  ;;  %v8482_v54 = vld [vmem:[#allocation2_spill] sm:$0xff] }
 0x1f3   : > { %5358 = vmatprep.subr.bf16.mxu1 %v5665_v8  ;;  %v7036_v38 = vadd.f32 %v5299_v52, %v1662_v5  ;;  %v1664_v60 = vpop.f32.mrb[7].mxu1  ;;  %v1895_v43 = vpop.f32.mrb[63].mxu0 }
 0x1f6   : > { %5359 = vmatpush3.bf16.msra.mxu1 %v5665_v8  ;;  %2372 = vmatmul.mubr.bf16.gmra.mrb[168].mxu0 %v8474_v11  ;;  %v5667_v8 = vld [vmem:[%s8166_s2 + $0x180] sm:$0xff]  }
 0x1f7   : > { %2863 = vmatprep.subr.bf16.mxu1 %v8473_v3  ;;  %2379 = vmatprep.mubr.bf16.mxu0 %v8476_v20  ;;  %v8491_v20 = vld [vmem:[#allocation93_spill] sm:$0xff] }
 0x1f8   : > { %v1667_v24 = vpop.f32.mrb[8].mxu1  ;;  %v5306_v23 = vpop.f32.mrb[64].mxu0 }
 0x1f9   : > { %2428 = vmatmul.mubr.bf16.gmra.mrb[112].mxu1 %v8475_v18  ;;  %v7045_v58 = vadd.f32 %v1892_v44, %v1667_v24  ;;  %v1669_v5 = vpop.f32.mrb[9].mxu1  ;;  %v1908_v60 = vpop.f32.mrb[65].mxu0  ;;  %v8484_v44 = vld [vmem:[#allocation65_spill] sm:$0xff]  ;;  %v5670_v24 = vld [vmem:[%s8166_s2 + $0x188] sm:$0xff]  }
 0x1fa   : > { %5360 = vmatprep.mubr.bf16.mxu1 %v8479_v56  ;;  %v1670_v52 = vpop.f32.mrb[10].mxu1  ;;  %v5307_v61 = vpop.f32.mrb[66].mxu0  ;;  %v8483_v56 = vpack.c.bf16 %v8481_v35, %v8482_v54  ;;  %v8485_v5 = vld [vmem:[#allocation11_spill] sm:$0xff] }
 0x1fb   : > { %v7050_v10 = vadd.f32 %v1895_v43, %v1670_v52  ;;  %v1672_v18 = vpop.f32.mrb[11].mxu1  ;;  %v1911_v53 = vpop.f32.mrb[67].mxu0  ;;  %v8487_v47 = vpack.c.bf16 %v8485_v5, %v8486_v49  ;;  %v8489_v5 = vld [vmem:[#allocation16_spill] sm:$0xff] }
 0x1fe   : > { %2380 = vmatmul.mubr.bf16.gmra.mrb[172].mxu0 %v8480_v2 }
 0x1ff   : > { %2387 = vmatprep.mubr.bf16.mxu0 %v8484_v44 }
 0x200   : > { %v7064_v43 = vpop.f32.mrb[68].mxu0 }
 0x201   : > { %5361 = vmatmul.mubr.bf16.vlgmr.msra.gmra.mrb[116].mxu1 %v8483_v56  ;;  %v7068_v54 = vpop.f32.mrb[69].mxu0 }
 0x202   : > { %2864 = vmatpush1.bf16.msra.mxu1 %v5667_v8  ;;  %5364 = vmatprep.mubr.bf16.mxu1 %v8487_v47  ;;  %v1675_v18 = vpop.f32.mrb[12].mxu1  ;;  %v7070_v56 = vpop.f32.mrb[70].mxu0  ;;  %v5672_v47 = vld [vmem:[%s8166_s2 + $0x190] sm:$0xff]  }
 0x203   : > { %2865 = vmatprep.subr.bf16.mxu1 %v8473_v3  ;;  %v7066_v52 = vadd.f32 %v5302_v13, %v1675_v18  ;;  %v1677_v35 = vpop.f32.mrb[13].mxu1  ;;  %v7078_v49 = vpop.f32.mrb[71].mxu0  ;;  %v8488_v13 = vld [vmem:[#allocation66_spill] sm:$0xff] }
 0x204   : > { %v1678_v8 = vpop.f32.mrb[14].mxu1  ;;  %v8490_v18 = vld [vmem:[#allocation18_spill] sm:$0xff] }
 0x205   : > { %v7072_v6 = vadd.f32 %v5303_v7, %v1678_v8  ;;  %v1680_v33 = vpop.f32.mrb[15].mxu1  ;;  %v5674_v7 = vld [vmem:[%s8166_s2 + $0x198] sm:$0xff]  }
 0x206   : > { %2866 = vmatpush1.bf16.msra.mxu1 %v5670_v24  ;;  %2388 = vmatmul.mubr.bf16.gmra.mrb[176].mxu0 %v8488_v13 }
 0x207   : > { %2867 = vmatprep.subr.bf16.mxu1 %v8473_v3  ;;  %5424 = vmatprep.mubr.bf16.mxu0 %v8489_v5 }
 0x208   : > { %v7088_v24 = vpop.f32.mrb[72].mxu0 }
 0x209   : > { %5365 = vmatmul.mubr.bf16.gmra.mrb[120].mxu1 %v8489_v5  ;;  %v7092_v13 = vpop.f32.mrb[73].mxu0  ;;  %v848_v5 = vmax.f32 %v8491_v20, 0.0  ;;  %v5676_v20 = vld [vmem:[%s8166_s2 + $0x1a8] sm:$0xff]  }
 0x20a   : > { %5368 = vmatprep.mubr.bf16.mxu1 %v8490_v18  ;;  %2868 = vmatpush1.bf16.msra.mxu1 %v5672_v47  ;;  %v1683_v33 = vpop.f32.mrb[16].mxu1  ;;  %v7094_v2 = vpop.f32.mrb[74].mxu0 }
 0x20b   : > { %2869 = vmatprep.subr.bf16.mxu1 %v8473_v3  ;;  %v7090_v35 = vadd.f32 %v1908_v60, %v1683_v33  ;;  %v1685_v8 = vpop.f32.mrb[17].mxu1  ;;  %v7102_v19 = vpop.f32.mrb[75].mxu0  ;;  %v8492_v60 = vld [vmem:[#allocation22_spill] sm:$0xff]  ;;  %v8493_v33 = vld [vmem:[#allocation24_spill] sm:$0xff] }
 0x20c   : > { %v1686_v44 = vpop.f32.mrb[18].mxu1 }
 0x20d   : > { %v7097_v47 = vadd.f32 %v1911_v53, %v1686_v44  ;;  %v1688_v11 = vpop.f32.mrb[19].mxu1  ;;  %v1176_v53 = vrot.slane %v848_v5, 2 }
 0x20e   : > { %2870 = vmatpush1.bf16.msra.mxu1 %v5674_v7  ;;  %5425 = vmatmul.mubr.bf16.vlgmr.msra.gmra.mrb[180].mxu0 %v8490_v18  ;;  %v1174_v11 = vrot.slane %v6840_v15, 2 }
 0x20f   : > { %2871 = vmatprep.subr.bf16.mxu1 %v8473_v3  ;;  %5428 = vmatprep.mubr.bf16.mxu0 %v8492_v60 }
 0x211   : > { %5369 = vmatmul.mubr.bf16.gmra.mrb[124].mxu1 %v8492_v60  ;;  %v7114_v7 = vpop.f32.mrb[76].mxu0 }
 0x212   : > { %5372 = vmatprep.mubr.bf16.mxu1 %v8493_v33  ;;  %2872 = vmatpush1.bf16.msra.mxu1 %v5675_v34  ;;  %v7118_v50 = vpop.f32.mrb[77].mxu0 }
 0x213   : > { %v1691_v44 = vpop.f32.mrb[20].mxu1  ;;  %2873 = vmatprep.subr.bf16.mxu1 %v8473_v3  ;;  %v7120_v60 = vpop.f32.mrb[78].mxu0 }
 0x214   : > { %v7116_v8 = vadd.f32 %v5306_v23, %v1691_v44  ;;  %v1693_v18 = vpop.f32.mrb[21].mxu1  ;;  %v7127_v40 = vpop.f32.mrb[79].mxu0  ;;  %v7132_v23 = vsel %vm1068_vm1, %v8494_v46, %v1174_v11  ;;  %v7135_v44 = vsel %vm1068_vm1, %v1174_v11, %v1176_v53  ;;  %v5678_v46 = vld [vmem:[%s8166_s2 + $0x1b8] sm:$0xff]   ;;  %v8497_v11 = vrot.slane %v6823_v32, 1 }
 0x215   : > { %v1694_v42 = vpop.f32.mrb[22].mxu1  ;;  %v1012_v18 = vrot.slane %v848_v5, 1 }
 0x216   : > { %v7122_v62 = vadd.f32 %v5307_v61, %v1694_v42  ;;  %v1696_v34 = vpop.f32.mrb[23].mxu1  ;;  %2874 = vmatpush1.bf16.msra.mxu1 %v5676_v20  ;;  %v1010_v61 = vrot.slane %v6840_v15, 1  ;;  %v8495_v20 = vld [vmem:[#allocation28_spill] sm:$0xff]  ;;  %5429 = vmatmul.mubr.bf16.gmra.mrb[184].mxu0 %v8493_v33 }
 0x217   : > { %2875 = vmatprep.subr.bf16.mxu1 %v8473_v3  ;;  %v8496_v34 = vld [vmem:[#allocation30_spill] sm:$0xff]  ;;  %5432 = vmatprep.mubr.bf16.mxu0 %v8495_v20 }
 0x218   : > { %v7154_v42 = vsel %vm904_vm0, %v8497_v11, %v1010_v61  ;;  %v7157_v33 = vsel %vm904_vm0, %v1010_v61, %v1012_v18  ;;  %v5679_v18 = vld [vmem:[%s8166_s2 + $0x1c0] sm:$0xff]  }
 0x219   : > { %5373 = vmatmul.mubr.bf16.gmra.mrb[128].mxu1 %v8495_v20  ;;  %v7149_v53 = vpop.f32.mrb[80].mxu0  ;;  %8498 = vst [vmem:[#allocation9_spill] sm:$0xff] %v7154_v42  ;;  %8499 = vst [vmem:[#allocation40_spill] sm:$0xff] %v7157_v33  ;;  %v8500_v61 = vld [vmem:[#allocation34_spill] sm:$0xff] }
 0x21a   : > { %5376 = vmatprep.mubr.bf16.mxu1 %v8496_v34  ;;  %2876 = vmatpush1.bf16.msra.mxu1 %v5677_v17  ;;  %v7162_v15 = vpop.f32.mrb[81].mxu0 }
 0x21b   : > { %v1699_v5 = vpop.f32.mrb[24].mxu1  ;;  %2877 = vmatprep.subr.bf16.mxu1 %v8473_v3  ;;  %v7166_v30 = vpop.f32.mrb[82].mxu0 }
 0x21c   : > { %v7160_v20 = vadd.f32 %v7068_v54, %v1699_v5  ;;  %v1701_v17 = vpop.f32.mrb[25].mxu1  ;;  %v7174_v54 = vpop.f32.mrb[83].mxu0  ;;  %v8501_v5 = vld [vmem:[#allocation36_spill] sm:$0xff] }
 0x21d   : > { %v1702_v22 = vpop.f32.mrb[26].mxu1 }
 0x21e   : > { %v7169_v32 = vadd.f32 %v7078_v49, %v1702_v22  ;;  %v1704_v11 = vpop.f32.mrb[27].mxu1  ;;  %2878 = vmatpush1.bf16.msra.mxu1 %v5678_v46  ;;  %5433 = vmatmul.mubr.bf16.gmra.mrb[188].mxu0 %v8496_v34  ;;  %v5680_v22 = vld [vmem:[%s8166_s2 + $0x1c8] sm:$0xff]  }
 0x21f   : > { %2879 = vmatprep.subr.bf16.mxu1 %v8473_v3  ;;  %5436 = vmatprep.mubr.bf16.mxu0 %v8500_v61 }
 0x221   : > { %5377 = vmatmul.mubr.bf16.gmra.mrb[132].mxu1 %v8500_v61  ;;  %v7185_v46 = vpop.f32.mrb[84].mxu0 }
 0x222   : > { %5380 = vmatprep.mubr.bf16.mxu1 %v8501_v5  ;;  %2880 = vmatpush1.bf16.msra.mxu1 %v5679_v18  ;;  %v7190_v48 = vpop.f32.mrb[85].mxu0 }
 0x223   : > { %v1707_v49 = vpop.f32.mrb[28].mxu1  ;;  %2881 = vmatprep.subr.bf16.mxu1 %v8473_v3  ;;  %v7192_v42 = vpop.f32.mrb[86].mxu0 }
 0x224   : > { %v7188_v17 = vadd.f32 %v7064_v43, %v1707_v49  ;;  %v1709_v11 = vpop.f32.mrb[29].mxu1  ;;  %v7197_v33 = vpop.f32.mrb[87].mxu0  ;;  %v8504_v43 = vld [vmem:[#allocation41_spill] sm:$0xff]  ;;  %v8505_v49 = vld [vmem:[#allocation43_spill] sm:$0xff] }
 0x225   : > { %v1710_v34 = vpop.f32.mrb[30].mxu1 }
 0x226   : > { %8502 = vst [vmem:[#allocation6_spill] sm:$0xff] %v7188_v17  ;;  %v7195_v18 = vadd.f32 %v7070_v56, %v1710_v34  ;;  %v1712_v61 = vpop.f32.mrb[31].mxu1  ;;  %2882 = vmatpush1.bf16.msra.mxu1 %v5680_v22  ;;  %5437 = vmatmul.mubr.bf16.gmra.mrb[192].mxu0 %v8501_v5  ;;  %v5682_v56 = vld [vmem:[%s8166_s2 + $0x1d8] sm:$0xff]   ;;  %v5685_v17 = vld [vmem:[%s8166_s2 + $0x1f0] sm:$0xff]  }
 0x227   : > { %2883 = vmatprep.subr.bf16.mxu1 %v8473_v3  ;;  %5440 = vmatprep.mubr.bf16.mxu0 %v8504_v43 }
 0x228   : > { %8503 = vst [vmem:[#allocation5_spill] sm:$0xff] %v7195_v18 }
 0x229   : > { %5381 = vmatmul.mubr.bf16.gmra.mrb[136].mxu1 %v8504_v43  ;;  %v7210_v11 = vpop.f32.mrb[88].mxu0 }
 0x22a   : > { %5384 = vmatprep.mubr.bf16.mxu1 %v8505_v49  ;;  %2884 = vmatpush1.bf16.msra.mxu1 %v5681_v39  ;;  %v7216_v57 = vpop.f32.mrb[89].mxu0 }
 0x22b   : > { %2885 = vmatprep.subr.bf16.mxu1 %v8473_v3  ;;  %v7218_v25 = vpop.f32.mrb[90].mxu0 }
 0x22c   : > { %v1715_v22 = vpop.f32.mrb[32].mxu1  ;;  %v7223_v27 = vpop.f32.mrb[91].mxu0 }
 0x22d   : > { %v7214_v34 = vadd.f32 %v7092_v13, %v1715_v22  ;;  %v1717_v61 = vpop.f32.mrb[33].mxu1  ;;  %v8508_v13 = vld [vmem:[#allocation49_spill] sm:$0xff]  ;;  %v8509_v22 = vld [vmem:[#allocation52_spill] sm:$0xff] }
 0x22e   : > { %v1718_v5 = vpop.f32.mrb[34].mxu1  ;;  %2886 = vmatpush1.bf16.msra.mxu1 %v5682_v56  ;;  %5441 = vmatmul.mubr.bf16.gmra.mrb[196].mxu0 %v8505_v49 }
 0x22f   : > { %8506 = vst [vmem:[#allocation54_spill] sm:$0xff] %v7214_v34  ;;  %v7221_v39 = vadd.f32 %v7102_v19, %v1718_v5  ;;  %v1720_v43 = vpop.f32.mrb[35].mxu1  ;;  %2887 = vmatprep.subr.bf16.mxu1 %v8473_v3  ;;  %5444 = vmatprep.mubr.bf16.mxu0 %v8508_v13  ;;  %v5684_v19 = vld [vmem:[%s8166_s2 + $0x1e8] sm:$0xff]  }
 0x231   : > { %8507 = vst [vmem:[#allocation13_spill] sm:$0xff] %v7221_v39  ;;  %5385 = vmatmul.mubr.bf16.gmra.mrb[140].mxu1 %v8508_v13  ;;  %v7236_v61 = vpop.f32.mrb[92].mxu0 }
 0x232   : > { %5388 = vmatprep.mubr.bf16.mxu1 %v8509_v22  ;;  %2888 = vmatpush1.bf16.msra.mxu1 %v5683_v51  ;;  %8510 = vst [vmem:[#allocation45_spill] sm:$0xff] %v7236_v61  ;;  %v7242_v39 = vpop.f32.mrb[93].mxu0  ;;  %v8519_v61 = vld [vmem:[#allocation68_spill] sm:$0xff] }
 0x233   : > { %2889 = vmatprep.subr.bf16.mxu1 %v8473_v3  ;;  %v7244_v34 = vpop.f32.mrb[94].mxu0 }
 0x234   : > { %v1723_v56 = vpop.f32.mrb[36].mxu1  ;;  %8512 = vst [vmem:[#allocation7_spill] sm:$0xff] %v7244_v34  ;;  %v7249_v18 = vpop.f32.mrb[95].mxu0 }
 0x235   : > { %v7240_v5 = vadd.f32 %v7088_v24, %v1723_v56  ;;  %v1725_v43 = vpop.f32.mrb[37].mxu1  ;;  %v8514_v24 = vld [vmem:[#allocation59_spill] sm:$0xff]  ;;  %v8515_v56 = vld [vmem:[#allocation61_spill] sm:$0xff] }
 0x236   : > { %v1726_v49 = vpop.f32.mrb[38].mxu1  ;;  %2890 = vmatpush1.bf16.msra.mxu1 %v5684_v19  ;;  %5445 = vmatmul.mubr.bf16.gmra.mrb[200].mxu0 %v8509_v22 }
 0x237   : > { %8511 = vst [vmem:[#allocation50_spill] sm:$0xff] %v7240_v5  ;;  %v7247_v51 = vadd.f32 %v7094_v2, %v1726_v49  ;;  %v1728_v13 = vpop.f32.mrb[39].mxu1  ;;  %2891 = vmatprep.subr.bf16.mxu1 %v8473_v3  ;;  %5448 = vmatprep.mubr.bf16.mxu0 %v8514_v24  ;;  %v5686_v2 = vld [vmem:[%s8166_s2 + $0x1f8] sm:$0xff]  }
 0x239   : > { %8513 = vst [vmem:[#allocation14_spill] sm:$0xff] %v7247_v51  ;;  %5389 = vmatmul.mubr.bf16.gmra.mrb[144].mxu1 %v8514_v24  ;;  %v7262_v43 = vpop.f32.mrb[96].mxu0 }
 0x23a   : > { %5392 = vmatprep.mubr.bf16.mxu1 %v8515_v56  ;;  %2892 = vmatpush1.bf16.msra.mxu1 %v5685_v17  ;;  %v7268_v51 = vpop.f32.mrb[97].mxu0 }
 0x23b   : > { %2893 = vmatprep.subr.bf16.mxu1 %v8473_v3  ;;  %v7270_v5 = vpop.f32.mrb[98].mxu0  ;;  %v8520_v3 = vld [vmem:[#allocation71_spill] sm:$0xff] }
 0x23c   : > { %v1731_v19 = vpop.f32.mrb[40].mxu1  ;;  %8517 = vst [vmem:[#allocation15_spill] sm:$0xff] %v7270_v5  ;;  %v7275_v34 = vpop.f32.mrb[99].mxu0  ;;  %v8526_v5 = vld [vmem:[#allocation78_spill] sm:$0xff] }
 0x23d   : > { %v7266_v49 = vadd.f32 %v7118_v50, %v1731_v19  ;;  %v1733_v13 = vpop.f32.mrb[41].mxu1 }
 0x23e   : > { %v1734_v22 = vpop.f32.mrb[42].mxu1  ;;  %2894 = vmatpush1.bf16.msra.mxu1 %v5686_v2  ;;  %5449 = vmatmul.mubr.bf16.gmra.mrb[204].mxu0 %v8515_v56 }
 0x23f   : > { %8516 = vst [vmem:[#allocation48_spill] sm:$0xff] %v7266_v49  ;;  %v7273_v17 = vadd.f32 %v7127_v40, %v1734_v22  ;;  %v1736_v24 = vpop.f32.mrb[43].mxu1  ;;  %5452 = vmatprep.mubr.bf16.mxu0 %v8519_v61 }
 0x241   : > { %8518 = vst [vmem:[#allocation19_spill] sm:$0xff] %v7273_v17  ;;  %5393 = vmatmul.mubr.bf16.gmra.mrb[148].mxu1 %v8519_v61  ;;  %v7281_v19 = vpop.f32.mrb[100].mxu0  ;;  %v8527_v61 = vld [vmem:[#allocation81_spill] sm:$0xff] }
 0x242   : > { %5396 = vmatprep.mubr.bf16.mxu1 %v8520_v3  ;;  %8521 = vst [vmem:[#allocation55_spill] sm:$0xff] %v7281_v19  ;;  %v7286_v22 = vpop.f32.mrb[101].mxu0 }
 0x243   : > { %v7288_v17 = vpop.f32.mrb[102].mxu0 }
 0x244   : > { %v1739_v50 = vpop.f32.mrb[44].mxu1  ;;  %8523 = vst [vmem:[#allocation20_spill] sm:$0xff] %v7288_v17  ;;  %v7293_v49 = vpop.f32.mrb[103].mxu0 }
 0x245   : > { %v7284_v13 = vadd.f32 %v7114_v7, %v1739_v50  ;;  %v1741_v40 = vpop.f32.mrb[45].mxu1  ;;  %8525 = vst [vmem:[#allocation21_spill] sm:$0xff] %v7293_v49  ;;  %v8528_v49 = vld [vmem:[#allocation88_spill] sm:$0xff] }
 0x246   : > { %v1742_v24 = vpop.f32.mrb[46].mxu1  ;;  %5453 = vmatmul.mubr.bf16.gmra.mrb[208].mxu0 %v8520_v3 }
 0x247   : > { %8522 = vst [vmem:[#allocation12_spill] sm:$0xff] %v7284_v13  ;;  %v7291_v2 = vadd.f32 %v7120_v60, %v1742_v24  ;;  %v1744_v56 = vpop.f32.mrb[47].mxu1  ;;  %5456 = vmatprep.mubr.bf16.mxu0 %v8526_v5 }
 0x249   : > { %8524 = vst [vmem:[#allocation58_spill] sm:$0xff] %v7291_v2  ;;  %5397 = vmatmul.mubr.bf16.gmra.mrb[152].mxu1 %v8526_v5  ;;  %v2245_v50 = vpop.f32.mrb[104].mxu0 }
 0x24a   : > { %5400 = vmatprep.mubr.bf16.mxu1 %v8527_v61  ;;  %v7303_v17 = vadd.f32 %v2245_v50, %v7023_v12  ;;  %v2247_v24 = vpop.f32.mrb[105].mxu0 }
 0x24b   : > { %v2248_v2 = vpop.f32.mrb[106].mxu0 }
 0x24c   : > { %v1747_v7 = vpop.f32.mrb[48].mxu1  ;;  %v7309_v3 = vadd.f32 %v2248_v2, %v7025_v28  ;;  %v2250_v5 = vpop.f32.mrb[107].mxu0 }
 0x24d   : > { %v7300_v40 = vadd.f32 %v7162_v15, %v1747_v7  ;;  %v1749_v60 = vpop.f32.mrb[49].mxu1  ;;  %v8529_v15 = vld [vmem:[#allocation90_spill] sm:$0xff] }
 0x24e   : > { %v1750_v56 = vpop.f32.mrb[50].mxu1  ;;  %5457 = vmatmul.mubr.bf16.gmra.mrb[212].mxu0 %v8527_v61 }
 0x24f   : > { %v7306_v13 = vadd.f32 %v7174_v54, %v1750_v56  ;;  %v1752_v19 = vpop.f32.mrb[51].mxu1  ;;  %5460 = vmatprep.mubr.bf16.mxu0 %v8528_v49 }
 0x251   : > { %5401 = vmatmul.mubr.bf16.gmra.mrb[156].mxu1 %v8528_v49  ;;  %v2253_v7 = vpop.f32.mrb[108].mxu0 }
 0x252   : > { %5404 = vmatprep.mubr.bf16.mxu1 %v8529_v15  ;;  %v7319_v54 = vadd.f32 %v2253_v7, %v7034_v21  ;;  %v2255_v2 = vpop.f32.mrb[109].mxu0 }
 0x253   : > { %v2256_v60 = vpop.f32.mrb[110].mxu0 }
 0x254   : > { %v1755_v12 = vpop.f32.mrb[52].mxu1  ;;  %v7325_v61 = vadd.f32 %v2256_v60, %v7036_v38  ;;  %v2258_v49 = vpop.f32.mrb[111].mxu0 }
 0x255   : > { %v7316_v50 = vadd.f32 %v7149_v53, %v1755_v12  ;;  %v1757_v28 = vpop.f32.mrb[53].mxu1 }
 0x256   : > { %v1758_v19 = vpop.f32.mrb[54].mxu1  ;;  %5461 = vmatmul.mubr.bf16.gmra.mrb[216].mxu0 %v8529_v15 }
 0x257   : > { %v7322_v24 = vadd.f32 %v7166_v30, %v1758_v19  ;;  %v1760_v56 = vpop.f32.mrb[55].mxu1  ;;  %5464 = vmatprep.mubr.bf16.mxu0 %v6827_v14 }
 0x259   : > { %5405 = vmatmul.mubr.bf16.gmra.mrb[160].mxu1 %v6827_v14  ;;  %v2261_v53 = vpop.f32.mrb[112].mxu0 }
 0x25a   : > { %2895 = vmatprep.mubr.bf16.mxu1 %v8409_v63  ;;  %v7335_v30 = vadd.f32 %v2261_v53, %v7045_v58  ;;  %v2263_v12 = vpop.f32.mrb[113].mxu0  ;;  %v8531_v58 = vpack.c.bf16 %v6856_v9, %v6793_v41 }
 0x25b   : > { %v2264_v28 = vpop.f32.mrb[114].mxu0 }
 0x25c   : > { %v1763_v21 = vpop.f32.mrb[56].mxu1  ;;  %v7341_v15 = vadd.f32 %v2264_v28, %v7050_v10  ;;  %v2266_v14 = vpop.f32.mrb[115].mxu0 }
 0x25d   : > { %v7332_v5 = vadd.f32 %v7190_v48, %v1763_v21  ;;  %v1765_v38 = vpop.f32.mrb[57].mxu1  ;;  %v8530_v48 = vpack.c.bf16 %v6808_v59, %v6805_v4 }
 0x25e   : > { %v1766_v7 = vpop.f32.mrb[58].mxu1 }
 0x25f   : > { %v7338_v2 = vadd.f32 %v7197_v33, %v1766_v7  ;;  %v1768_v63 = vpop.f32.mrb[59].mxu1  ;;  %5465 = vmatmul.mubr.bf16.gmra.mrb[220].mxu0 %v8530_v48 }
 0x260   : > { %5468 = vmatprep.mubr.bf16.mxu0 %v8531_v58 }
 0x261   : > { %2896 = vmatmul.mubr.bf16.vlgmr.msra.gmra.mrb[164].mxu1 %v8413_v45  ;;  %v2269_v33 = vpop.f32.mrb[116].mxu0 }
 0x262   : > { %2903 = vmatprep.mubr.bf16.mxu1 %v8415_v29  ;;  %v7355_v10 = vadd.f32 %v2269_v33, %v7066_v52  ;;  %v2271_v45 = vpop.f32.mrb[117].mxu0  ;;  %v8532_v29 = vpack.c.bf16 %v7135_v44, %v7132_v23 }
 0x263   : > { %v2272_v21 = vpop.f32.mrb[118].mxu0 }
 0x264   : > { %v1771_v19 = vpop.f32.mrb[60].mxu1  ;;  %v7361_v59 = vadd.f32 %v2272_v21, %v7072_v6  ;;  %v2274_v9 = vpop.f32.mrb[119].mxu0 }
 0x265   : > { %v7352_v60 = vadd.f32 %v7185_v46, %v1771_v19  ;;  %v1773_v56 = vpop.f32.mrb[61].mxu1 }
 0x266   : > { %v1774_v49 = vpop.f32.mrb[62].mxu1 }
 0x267   : > { %v7358_v4 = vadd.f32 %v7192_v42, %v1774_v49  ;;  %v1776_v41 = vpop.f32.mrb[63].mxu1  ;;  %5469 = vmatmul.mubr.bf16.gmra.mrb[224].mxu0 %v8532_v29 }
 0x269   : > { %2904 = vmatmul.mubr.bf16.gmra.mrb[168].mxu1 %v8418_v0  ;;  %v2277_v46 = vpop.f32.mrb[120].mxu0 }
 0x26a   : > { %2911 = vmatprep.mubr.bf16.mxu1 %v8420_v16  ;;  %v7372_v42 = vadd.f32 %v2277_v46, %v7090_v35  ;;  %v2279_v38 = vpop.f32.mrb[121].mxu0 }
 0x26b   : > { %v2280_v7 = vpop.f32.mrb[122].mxu0 }
 0x26c   : > { %v1779_v52 = vpop.f32.mrb[64].mxu1  ;;  %v7378_v23 = vadd.f32 %v2280_v7, %v7097_v47  ;;  %v2282_v16 = vpop.f32.mrb[123].mxu0 }
 0x26d   : > { %v7369_v53 = vadd.f32 %v7216_v57, %v1779_v52  ;;  %v1781_v6 = vpop.f32.mrb[65].mxu1  ;;  %v8534_v52 = vld [vmem:[#allocation6_spill] sm:$0xff] }
 0x26e   : > { %v1782_v12 = vpop.f32.mrb[66].mxu1 }
 0x26f   : > { %v7375_v0 = vadd.f32 %v7223_v27, %v1782_v12  ;;  %v1784_v44 = vpop.f32.mrb[67].mxu1 }
 0x270   : > { %v8536_v44 = vld [vmem:[#allocation5_spill] sm:$0xff] }
 0x271   : > { %2912 = vmatmul.mubr.bf16.gmra.mrb[172].mxu1 %v8423_v55  ;;  %v2285_v28 = vpop.f32.mrb[124].mxu0 }
 0x272   : > { %2919 = vmatprep.mubr.bf16.mxu1 %v8425_v36  ;;  %v7386_v63 = vadd.f32 %v2285_v28, %v7116_v8  ;;  %v2287_v27 = vpop.f32.mrb[125].mxu0  ;;  %v8538_v28 = vld [vmem:[#allocation31_spill] sm:$0xff] }
 0x273   : > { %v2288_v58 = vpop.f32.mrb[126].mxu0 }
 0x274   : > { %v1787_v57 = vpop.f32.mrb[68].mxu1  ;;  %v7392_v19 = vadd.f32 %v2288_v58, %v7122_v62  ;;  %v2290_v36 = vpop.f32.mrb[127].mxu0  ;;  %v8539_v58 = vld [vmem:[#allocation54_spill] sm:$0xff] }
 0x275   : > { %v7383_v35 = vadd.f32 %v7210_v11, %v1787_v57  ;;  %v1789_v14 = vpop.f32.mrb[69].mxu1  ;;  %v8537_v57 = vld [vmem:[#allocation27_spill] sm:$0xff] }
 0x276   : > { %v1790_v48 = vpop.f32.mrb[70].mxu1 }
 0x277   : > { %v7389_v47 = vadd.f32 %v7218_v25, %v1790_v48  ;;  %v1792_v55 = vpop.f32.mrb[71].mxu1 }
 0x279   : > { %2920 = vmatmul.mubr.bf16.gmra.mrb[176].mxu1 %v8428_v37  ;;  %v2293_v33 = vpop.f32.mrb[128].mxu0 }
 0x27a   : > { %2927 = vmatprep.mubr.bf16.mxu1 %v8432_v1  ;;  %v7400_v56 = vadd.f32 %v2293_v33, %v7160_v20  ;;  %v2295_v25 = vpop.f32.mrb[129].mxu0  ;;  %v8533_v20 = vld [vmem:[#allocation45_spill] sm:$0xff] }
 0x27b   : > { %v2296_v21 = vpop.f32.mrb[130].mxu0 }
 0x27c   : > { %v1795_v11 = vpop.f32.mrb[72].mxu1  ;;  %v7406_v41 = vadd.f32 %v2296_v21, %v7169_v32  ;;  %v2298_v1 = vpop.f32.mrb[131].mxu0  ;;  %v8535_v32 = vld [vmem:[#allocation7_spill] sm:$0xff] }
 0x27d   : > { %v7397_v8 = vadd.f32 %v7242_v39, %v1795_v11  ;;  %v1797_v45 = vpop.f32.mrb[73].mxu1 }
 0x27e   : > { %v1798_v49 = vpop.f32.mrb[74].mxu1 }
 0x27f   : > { %v7403_v62 = vadd.f32 %v7249_v18, %v1798_v49  ;;  %v1800_v37 = vpop.f32.mrb[75].mxu1  ;;  %v8540_v49 = vld [vmem:[#allocation13_spill] sm:$0xff] }
 0x281   : > { %2928 = vmatmul.mubr.bf16.gmra.mrb[180].mxu1 %v8436_v31  ;;  %v2301_v9 = vpop.f32.mrb[132].mxu0 }
 0x282   : > { %2935 = vmatprep.mubr.bf16.mxu1 %v8438_v26  ;;  %v7414_v46 = vadd.f32 %v2301_v9, %v8534_v52  ;;  %v2303_v18 = vpop.f32.mrb[133].mxu0  ;;  %v8542_v9 = vld [vmem:[#allocation32_spill] sm:$0xff] }
 0x283   : > { %v2304_v12 = vpop.f32.mrb[134].mxu0 }
 0x284   : > { %v1803_v39 = vpop.f32.mrb[76].mxu1  ;;  %v7420_v16 = vadd.f32 %v2304_v12, %v8536_v44  ;;  %v2306_v26 = vpop.f32.mrb[135].mxu0  ;;  %v8544_v44 = vld [vmem:[#allocation15_spill] sm:$0xff] }
 0x285   : > { %v7411_v29 = vadd.f32 %v8533_v20, %v1803_v39  ;;  %v1805_v6 = vpop.f32.mrb[77].mxu1  ;;  %v8541_v39 = vld [vmem:[#allocation23_spill] sm:$0xff]  ;;  %v8545_v26 = vld [vmem:[#allocation14_spill] sm:$0xff] }
 0x286   : > { %v1806_v38 = vpop.f32.mrb[78].mxu1  ;;  %v8543_v6 = vld [vmem:[#allocation50_spill] sm:$0xff] }
 0x287   : > { %v7417_v7 = vadd.f32 %v8535_v32, %v1806_v38  ;;  %v1808_v31 = vpop.f32.mrb[79].mxu1 }
 0x289   : > { %2936 = vmatmul.mubr.bf16.gmra.mrb[184].mxu1 %v8537_v57  ;;  %v2309_v27 = vpop.f32.mrb[136].mxu0 }
 0x28a   : > { %2943 = vmatprep.mubr.bf16.mxu1 %v8538_v28  ;;  %v7428_v55 = vadd.f32 %v2309_v27, %v8539_v58  ;;  %v2311_v11 = vpop.f32.mrb[137].mxu0  ;;  %v8546_v27 = vld [vmem:[#allocation33_spill] sm:$0xff] }
 0x28b   : > { %v2312_v45 = vpop.f32.mrb[138].mxu0  ;;  %v8547_v58 = vld [vmem:[#allocation37_spill] sm:$0xff] }
 0x28c   : > { %v1811_v14 = vpop.f32.mrb[80].mxu1  ;;  %v7434_v21 = vadd.f32 %v2312_v45, %v8540_v49  ;;  %v2314_v1 = vpop.f32.mrb[139].mxu0 }
 0x28d   : > { %v7425_v48 = vadd.f32 %v7268_v51, %v1811_v14  ;;  %v1813_v36 = vpop.f32.mrb[81].mxu1 }
 0x28e   : > { %v1814_v33 = vpop.f32.mrb[82].mxu1 }
 0x28f   : > { %v7431_v25 = vadd.f32 %v7275_v34, %v1814_v33  ;;  %v1816_v37 = vpop.f32.mrb[83].mxu1  ;;  %v8548_v33 = vld [vmem:[#allocation48_spill] sm:$0xff] }
 0x291   : > { %2944 = vmatmul.mubr.bf16.gmra.mrb[188].mxu1 %v8541_v39  ;;  %v2317_v20 = vpop.f32.mrb[140].mxu0 }
 0x292   : > { %2951 = vmatprep.mubr.bf16.mxu1 %v8542_v9  ;;  %v7442_v18 = vadd.f32 %v2317_v20, %v8543_v6  ;;  %v2319_v34 = vpop.f32.mrb[141].mxu0  ;;  %v8549_v9 = vld [vmem:[#allocation21_spill] sm:$0xff]  ;;  %v8550_v20 = vld [vmem:[#allocation19_spill] sm:$0xff] }
 0x293   : > { %v2320_v32 = vpop.f32.mrb[142].mxu0 }
 0x294   : > { %v1819_v51 = vpop.f32.mrb[84].mxu1  ;;  %v7448_v57 = vadd.f32 %v2320_v32, %v8545_v26  ;;  %v2322_v14 = vpop.f32.mrb[143].mxu0  ;;  %v8552_v32 = vld [vmem:[#allocation38_spill] sm:$0xff]  ;;  %v8553_v26 = vld [vmem:[#allocation55_spill] sm:$0xff] }
 0x295   : > { %v7439_v52 = vadd.f32 %v7262_v43, %v1819_v51  ;;  %v1821_v38 = vpop.f32.mrb[85].mxu1  ;;  %v8554_v14 = vld [vmem:[#allocation12_spill] sm:$0xff] }
 0x296   : > { %v1822_v12 = vpop.f32.mrb[86].mxu1 }
 0x297   : > { %v7445_v31 = vadd.f32 %v8544_v44, %v1822_v12  ;;  %v1824_v28 = vpop.f32.mrb[87].mxu1  ;;  %v8551_v12 = vld [vmem:[#allocation29_spill] sm:$0xff] }
 0x299   : > { %2952 = vmatmul.mubr.bf16.gmra.mrb[192].mxu1 %v8546_v27  ;;  %v2325_v36 = vpop.f32.mrb[144].mxu0 }
 0x29a   : > { %2959 = vmatprep.mubr.bf16.mxu1 %v8547_v58  ;;  %v7456_v45 = vadd.f32 %v2325_v36, %v8548_v33  ;;  %v2327_v37 = vpop.f32.mrb[145].mxu0 }
 0x29b   : > { %v2328_v39 = vpop.f32.mrb[146].mxu0 }
 0x29c   : > { %v1827_v43 = vpop.f32.mrb[88].mxu1  ;;  %v7462_v6 = vadd.f32 %v2328_v39, %v8550_v20  ;;  %v2330_v34 = vpop.f32.mrb[147].mxu0 }
 0x29d   : > { %v7453_v11 = vadd.f32 %v7286_v22, %v1827_v43  ;;  %v1829_v49 = vpop.f32.mrb[89].mxu1  ;;  %v8557_v34 = vld [vmem:[#allocation39_spill] sm:$0xff] }
 0x29e   : > { %v1830_v1 = vpop.f32.mrb[90].mxu1  ;;  %v8555_v49 = vld [vmem:[#allocation20_spill] sm:$0xff] }
 0x29f   : > { %v7459_v51 = vadd.f32 %v8549_v9, %v1830_v1  ;;  %v1832_v38 = vpop.f32.mrb[91].mxu1  ;;  %v8556_v1 = vld [vmem:[#allocation58_spill] sm:$0xff] }
 0x2a0   : > { %v5687_v38 = vld [vmem:[%s8167_s3] sm:$0xff]  }
 0x2a1   : > { %2960 = vmatmul.mubr.bf16.gmra.mrb[196].mxu1 %v8551_v12  ;;  %v2333_v44 = vpop.f32.mrb[148].mxu0  ;;  %v8558_v12 = vld [vmem:[#allocation44_spill] sm:$0xff]  ;;  %5472 = vmatprep.subr.bf16.mxu0 %v5687_v38 }
 0x2a2   : > { %2967 = vmatprep.mubr.bf16.mxu1 %v8552_v32  ;;  %v7470_v27 = vadd.f32 %v2333_v44, %v8554_v14  ;;  %v2335_v43 = vpop.f32.mrb[149].mxu0  ;;  %5473 = vmatpush3.bf16.msra.mxu0 %v5687_v38  ;;  %v8560_v38 = vld [vmem:[#allocation46_spill] sm:$0xff] }
 0x2a3   : > { %v2336_v33 = vpop.f32.mrb[150].mxu0 }
 0x2a4   : > { %v1835_v22 = vpop.f32.mrb[92].mxu1  ;;  %v7476_v39 = vadd.f32 %v2336_v33, %v8556_v1  ;;  %v2338_v20 = vpop.f32.mrb[151].mxu0  ;;  %v5688_v33 = vld [vmem:[%s8167_s3 + $0x8] sm:$0xff]  }
 0x2a5   : > { %v7467_v28 = vadd.f32 %v8553_v26, %v1835_v22  ;;  %v1837_v58 = vpop.f32.mrb[93].mxu1  ;;  %5474 = vmatprep.subr.bf16.mxu0 %v5688_v33  ;;  %v8559_v20 = vld [vmem:[#allocation35_spill] sm:$0xff] }
 0x2a6   : > { %v1838_v36 = vpop.f32.mrb[94].mxu1  ;;  %5475 = vmatpush3.bf16.msra.mxu0 %v5688_v33 }
 0x2a7   : > { %v7473_v37 = vadd.f32 %v8555_v49, %v1838_v36  ;;  %v1840_v9 = vpop.f32.mrb[95].mxu1 }
 0x2a9   : > { %2968 = vmatmul.mubr.bf16.gmra.mrb[200].mxu1 %v8557_v34  ;;  %v2341_v32 = vpop.f32.mrb[152].mxu0 }
 0x2aa   : > { %2975 = vmatprep.mubr.bf16.mxu1 %v8558_v12  ;;  %v7484_v44 = vadd.f32 %v2341_v32, %v7300_v40  ;;  %v2343_v14 = vpop.f32.mrb[153].mxu0 }
 0x2ab   : > { %v2344_v43 = vpop.f32.mrb[154].mxu0 }
 0x2ac   : > { %v2397_v22 = vpop.f32.mrb[96].mxu1  ;;  %v7493_v49 = vadd.f32 %v2344_v43, %v7306_v13  ;;  %v2346_v9 = vpop.f32.mrb[155].mxu0 }
 0x2ad   : > { %v7487_v26 = vadd.f32 %v2397_v22, %v7411_v29  ;;  %v2399_v58 = vpop.f32.mrb[97].mxu1  ;;  %v5689_v29 = vld [vmem:[%s8167_s3 + $0x10] sm:$0xff]  }
 0x2ae   : > { %v2400_v36 = vpop.f32.mrb[98].mxu1  ;;  %5476 = vmatprep.subr.bf16.mxu0 %v5689_v29 }
 0x2af   : > { %v7496_v1 = vadd.f32 %v2400_v36, %v7417_v7  ;;  %v2402_v40 = vpop.f32.mrb[99].mxu1  ;;  %5477 = vmatpush3.bf16.msra.mxu0 %v5689_v29 }
 0x2b0   : > { %v8561_v40 = vld [vmem:[#allocation47_spill] sm:$0xff] }
 0x2b1   : > { %2976 = vmatmul.mubr.bf16.gmra.mrb[204].mxu1 %v8559_v20  ;;  %v2349_v34 = vpop.f32.mrb[156].mxu0 }
 0x2b2   : > { %2983 = vmatprep.mubr.bf16.mxu1 %v8560_v38  ;;  %v7504_v13 = vadd.f32 %v2349_v34, %v7316_v50  ;;  %v2351_v32 = vpop.f32.mrb[157].mxu0  ;;  %v5690_v50 = vld [vmem:[%s8167_s3 + $0x18] sm:$0xff]  }
 0x2b3   : > { %v2352_v14 = vpop.f32.mrb[158].mxu0  ;;  %5478 = vmatprep.subr.bf16.mxu0 %v5690_v50 }
 0x2b4   : > { %v2405_v12 = vpop.f32.mrb[100].mxu1  ;;  %v7510_v43 = vadd.f32 %v2352_v14, %v7322_v24  ;;  %v2354_v33 = vpop.f32.mrb[159].mxu0  ;;  %5479 = vmatpush3.bf16.msra.mxu0 %v5690_v50  ;;  %v5691_v24 = vld [vmem:[%s8167_s3 + $0x20] sm:$0xff]   ;;  %v8564_v50 = vld [vmem:[#allocation56_spill] sm:$0xff] }
 0x2b5   : > { %v7507_v7 = vadd.f32 %v2405_v12, %v7425_v48  ;;  %v2407_v22 = vpop.f32.mrb[101].mxu1  ;;  %v8562_v48 = vld [vmem:[#allocation53_spill] sm:$0xff]  ;;  %5480 = vmatprep.subr.bf16.mxu0 %v5691_v24 }
 0x2b6   : > { %v2408_v58 = vpop.f32.mrb[102].mxu1 }
 0x2b7   : > { %v7513_v36 = vadd.f32 %v2408_v58, %v7431_v25  ;;  %v2410_v9 = vpop.f32.mrb[103].mxu1 }
 0x2b8   : > { %5481 = vmatpush3.bf16.msra.mxu0 %v5691_v24 }
 0x2b9   : > { %2984 = vmatmul.mubr.bf16.gmra.mrb[208].mxu1 %v8561_v40  ;;  %v2357_v29 = vpop.f32.mrb[160].mxu0 }
 0x2ba   : > { %2991 = vmatprep.mubr.bf16.mxu1 %v8562_v48  ;;  %v7524_v25 = vadd.f32 %v2357_v29, %v7332_v5  ;;  %v2359_v34 = vpop.f32.mrb[161].mxu0  ;;  %v5692_v5 = vld [vmem:[%s8167_s3 + $0x28] sm:$0xff]  }
 0x2bb   : > { %v2360_v32 = vpop.f32.mrb[162].mxu0  ;;  %5482 = vmatprep.subr.bf16.mxu0 %v5692_v5 }
 0x2bc   : > { %v2413_v20 = vpop.f32.mrb[104].mxu1  ;;  %v7530_v14 = vadd.f32 %v2360_v32, %v7338_v2  ;;  %v2362_v33 = vpop.f32.mrb[163].mxu0  ;;  %5483 = vmatpush3.bf16.msra.mxu0 %v5692_v5  ;;  %v5693_v2 = vld [vmem:[%s8167_s3 + $0x30] sm:$0xff]   ;;  %v8566_v5 = vld [vmem:[#allocation63_spill] sm:$0xff] }
 0x2bd   : > { %v7527_v38 = vadd.f32 %v2413_v20, %v7439_v52  ;;  %v2415_v12 = vpop.f32.mrb[105].mxu1  ;;  %v8563_v52 = vld [vmem:[#allocation42_spill] sm:$0xff]  ;;  %5484 = vmatprep.subr.bf16.mxu0 %v5693_v2 }
 0x2be   : > { %v2416_v22 = vpop.f32.mrb[106].mxu1 }
 0x2bf   : > { %v7533_v58 = vadd.f32 %v2416_v22, %v7445_v31  ;;  %v2418_v9 = vpop.f32.mrb[107].mxu1 }
 0x2c0   : > { %5485 = vmatpush3.bf16.msra.mxu0 %v5693_v2 }
 0x2c1   : > { %2992 = vmatmul.mubr.bf16.gmra.mrb[212].mxu1 %v8563_v52  ;;  %v2365_v40 = vpop.f32.mrb[164].mxu0 }
 0x2c2   : > { %2999 = vmatprep.mubr.bf16.mxu1 %v8564_v50  ;;  %v7544_v31 = vadd.f32 %v2365_v40, %v7352_v60  ;;  %v2367_v20 = vpop.f32.mrb[165].mxu0  ;;  %v5694_v60 = vld [vmem:[%s8167_s3 + $0x38] sm:$0xff]  }
 0x2c3   : > { %v2368_v34 = vpop.f32.mrb[166].mxu0  ;;  %5486 = vmatprep.subr.bf16.mxu0 %v5694_v60 }
 0x2c4   : > { %v2421_v48 = vpop.f32.mrb[108].mxu1  ;;  %v7550_v32 = vadd.f32 %v2368_v34, %v7358_v4  ;;  %v2370_v33 = vpop.f32.mrb[167].mxu0  ;;  %5487 = vmatpush3.bf16.msra.mxu0 %v5694_v60  ;;  %v8568_v60 = vld [vmem:[#allocation65_spill] sm:$0xff] }
 0x2c5   : > { %v7547_v29 = vadd.f32 %v2421_v48, %v7453_v11  ;;  %v2423_v24 = vpop.f32.mrb[109].mxu1  ;;  %v8565_v11 = vld [vmem:[#allocation57_spill] sm:$0xff] }
 0x2c6   : > { %v2424_v12 = vpop.f32.mrb[110].mxu1 }
 0x2c7   : > { %v7553_v22 = vadd.f32 %v2424_v12, %v7459_v51  ;;  %v2426_v9 = vpop.f32.mrb[111].mxu1 }
 0x2c8   : > { %v8567_v9 = vld [vmem:[#allocation51_spill] sm:$0xff] }
 0x2c9   : > { %3000 = vmatmul.mubr.bf16.gmra.mrb[216].mxu1 %v8565_v11  ;;  %v2373_v52 = vpop.f32.mrb[168].mxu0 }
 0x2ca   : > { %3007 = vmatprep.mubr.bf16.mxu1 %v8566_v5  ;;  %v7561_v4 = vadd.f32 %v2373_v52, %v7369_v53  ;;  %v2375_v40 = vpop.f32.mrb[169].mxu0 }
 0x2cb   : > { %v2376_v2 = vpop.f32.mrb[170].mxu0 }
 0x2cc   : > { %v2429_v50 = vpop.f32.mrb[112].mxu1  ;;  %v7567_v24 = vadd.f32 %v2376_v2, %v7375_v0  ;;  %v2378_v12 = vpop.f32.mrb[171].mxu0 }
 0x2cd   : > { %v7564_v51 = vadd.f32 %v2429_v50, %v7467_v28  ;;  %v2431_v48 = vpop.f32.mrb[113].mxu1 }
 0x2ce   : > { %v2432_v20 = vpop.f32.mrb[114].mxu1 }
 0x2cf   : > { %v7570_v34 = vadd.f32 %v2432_v20, %v7473_v37  ;;  %v2434_v33 = vpop.f32.mrb[115].mxu1 }
 0x2d0   : > { %v8570_v33 = vld [vmem:[#allocation73_spill] sm:$0xff] }
 0x2d1   : > { %3008 = vmatmul.mubr.bf16.gmra.mrb[220].mxu1 %v8567_v9  ;;  %v2381_v53 = vpop.f32.mrb[172].mxu0 }
 0x2d2   : > { %3015 = vmatprep.mubr.bf16.mxu1 %v8568_v60  ;;  %v7575_v28 = vadd.f32 %v2381_v53, %v7383_v35  ;;  %v2383_v52 = vpop.f32.mrb[173].mxu0 }
 0x2d3   : > { %v2384_v37 = vpop.f32.mrb[174].mxu0 }
 0x2d4   : > { %v5362_v11 = vpop.f32.mrb[116].mxu1  ;;  %v7584_v48 = vadd.f32 %v2384_v37, %v7389_v47  ;;  %v2386_v20 = vpop.f32.mrb[175].mxu0 }
 0x2d5   : > { %v7578_v5 = vadd.f32 %v5362_v11, %v7319_v54  ;;  %v2470_v0 = vpop.f32.mrb[117].mxu1  ;;  %v8569_v54 = vld [vmem:[#allocation66_spill] sm:$0xff] }
 0x2d6   : > { %v7581_v50 = vadd.f32 %v2470_v0, %v7303_v17  ;;  %v5363_v40 = vpop.f32.mrb[118].mxu1 }
 0x2d7   : > { %v7587_v2 = vadd.f32 %v5363_v40, %v7325_v61  ;;  %v2473_v12 = vpop.f32.mrb[119].mxu1 }
 0x2d8   : > { %v7590_v35 = vadd.f32 %v2473_v12, %v7309_v3  ;;  %v8572_v12 = vld [vmem:[#allocation76_spill] sm:$0xff] }
 0x2d9   : > { %3016 = vmatmul.mubr.bf16.gmra.mrb[224].mxu1 %v8569_v54  ;;  %v2389_v9 = vpop.f32.mrb[176].mxu0 }
 0x2da   : > { %3023 = vmatprep.mubr.bf16.mxu1 %v8570_v33  ;;  %v7595_v60 = vadd.f32 %v2389_v9, %v7397_v8  ;;  %v2391_v53 = vpop.f32.mrb[177].mxu0 }
 0x2db   : > { %v2392_v52 = vpop.f32.mrb[178].mxu0 }
 0x2dc   : > { %v5366_v17 = vpop.f32.mrb[120].mxu1  ;;  %v7604_v0 = vadd.f32 %v2392_v52, %v7403_v62  ;;  %v2394_v40 = vpop.f32.mrb[179].mxu0 }
 0x2dd   : > { %v7598_v47 = vadd.f32 %v5366_v17, %v7355_v10  ;;  %v2486_v61 = vpop.f32.mrb[121].mxu1  ;;  %v8571_v10 = vld [vmem:[#allocation60_spill] sm:$0xff]  ;;  %v8575_v40 = vld [vmem:[#allocation82_spill] sm:$0xff] }
 0x2de   : > { %v7601_v11 = vadd.f32 %v2486_v61, %v7335_v30  ;;  %v5367_v3 = vpop.f32.mrb[122].mxu1 }
 0x2df   : > { %v7607_v37 = vadd.f32 %v5367_v3, %v7361_v59  ;;  %v2489_v20 = vpop.f32.mrb[123].mxu1 }
 0x2e0   : > { %v7610_v8 = vadd.f32 %v2489_v20, %v7341_v15 }
 0x2e1   : > { %3024 = vmatmul.mubr.bf16.gmra.mrb[228].mxu1 %v8571_v10  ;;  %v7614_v30 = vpop.f32.mrb[180].mxu0 }
 0x2e2   : > { %3031 = vmatprep.mubr.bf16.mxu1 %v8572_v12  ;;  %v7619_v9 = vpop.f32.mrb[181].mxu0 }
 0x2e3   : > { %v7624_v53 = vpop.f32.mrb[182].mxu0 }
 0x2e4   : > { %v5370_v54 = vpop.f32.mrb[124].mxu1  ;;  %v7629_v52 = vpop.f32.mrb[183].mxu0 }
 0x2e5   : > { %v7617_v33 = vadd.f32 %v5370_v54, %v7386_v63  ;;  %v2502_v62 = vpop.f32.mrb[125].mxu1  ;;  %v8574_v63 = vld [vmem:[#allocation77_spill] sm:$0xff] }
 0x2e6   : > { %v7622_v59 = vadd.f32 %v2502_v62, %v7372_v42  ;;  %v5371_v17 = vpop.f32.mrb[126].mxu1 }
 0x2e7   : > { %v7627_v15 = vadd.f32 %v5371_v17, %v7392_v19  ;;  %v2505_v61 = vpop.f32.mrb[127].mxu1 }
 0x2e8   : > { %v7632_v3 = vadd.f32 %v2505_v61, %v7378_v23 }
 0x2e9   : > { %8573 = vst [vmem:[#allocation72_spill] sm:$0xff] %v7627_v15  ;;  %3032 = vmatmul.mubr.bf16.gmra.mrb[232].mxu1 %v8574_v63  ;;  %v7636_v10 = vpop.f32.mrb[184].mxu0 }
 0x2ea   : > { %3039 = vmatprep.mubr.bf16.mxu1 %v8575_v40  ;;  %v7641_v54 = vpop.f32.mrb[185].mxu0 }
 0x2eb   : > { %v7646_v17 = vpop.f32.mrb[186].mxu0 }
 0x2ec   : > { %v5374_v20 = vpop.f32.mrb[128].mxu1  ;;  %v7651_v63 = vpop.f32.mrb[187].mxu0 }
 0x2ed   : > { %v7639_v42 = vadd.f32 %v5374_v20, %v7414_v46  ;;  %v2518_v12 = vpop.f32.mrb[129].mxu1  ;;  %v8580_v46 = vld [vmem:[#allocation70_spill] sm:$0xff]  ;;  %v8581_v20 = vld [vmem:[#allocation85_spill] sm:$0xff] }
 0x2ee   : > { %v7644_v19 = vadd.f32 %v2518_v12, %v7400_v56  ;;  %v5375_v62 = vpop.f32.mrb[130].mxu1 }
 0x2ef   : > { %8576 = vst [vmem:[#allocation74_spill] sm:$0xff] %v7639_v42  ;;  %v7649_v23 = vadd.f32 %v5375_v62, %v7420_v16  ;;  %v2521_v61 = vpop.f32.mrb[131].mxu1 }
 0x2f0   : > { %8577 = vst [vmem:[#allocation25_spill] sm:$0xff] %v7644_v19  ;;  %v7654_v40 = vadd.f32 %v2521_v61, %v7406_v41 }
 0x2f1   : > { %8578 = vst [vmem:[#allocation64_spill] sm:$0xff] %v7649_v23  ;;  %3040 = vmatmul.mubr.bf16.gmra.mrb[236].mxu1 %v8580_v46  ;;  %v7658_v15 = vpop.f32.mrb[188].mxu0 }
 0x2f2   : > { %8579 = vst [vmem:[#allocation69_spill] sm:$0xff] %v7654_v40  ;;  %3047 = vmatprep.mubr.bf16.mxu1 %v8581_v20  ;;  %v7663_v19 = vpop.f32.mrb[189].mxu0 }
 0x2f3   : > { %v7668_v23 = vpop.f32.mrb[190].mxu0 }
 0x2f4   : > { %v5378_v42 = vpop.f32.mrb[132].mxu1  ;;  %v7673_v46 = vpop.f32.mrb[191].mxu0 }
 0x2f5   : > { %v7661_v56 = vadd.f32 %v5378_v42, %v7442_v18  ;;  %v2534_v12 = vpop.f32.mrb[133].mxu1  ;;  %v8586_v18 = vld [vmem:[#allocation86_spill] sm:$0xff]  ;;  %v8587_v42 = vld [vmem:[#allocation92_spill] sm:$0xff] }
 0x2f6   : > { %v7666_v16 = vadd.f32 %v2534_v12, %v7428_v55  ;;  %v5379_v62 = vpop.f32.mrb[134].mxu1 }
 0x2f7   : > { %8582 = vst [vmem:[#allocation17_spill] sm:$0xff] %v7661_v56  ;;  %v7671_v41 = vadd.f32 %v5379_v62, %v7448_v57  ;;  %v2537_v61 = vpop.f32.mrb[135].mxu1 }
 0x2f8   : > { %8583 = vst [vmem:[#allocation26_spill] sm:$0xff] %v7666_v16  ;;  %v7676_v20 = vadd.f32 %v2537_v61, %v7434_v21 }
 0x2f9   : > { %8584 = vst [vmem:[#allocation67_spill] sm:$0xff] %v7671_v41  ;;  %3048 = vmatmul.mubr.bf16.gmra.mrb[240].mxu1 %v8586_v18  ;;  %v7680_v40 = vpop.f32.mrb[192].mxu0 }
 0x2fa   : > { %8585 = vst [vmem:[#allocation75_spill] sm:$0xff] %v7676_v20  ;;  %3055 = vmatprep.mubr.bf16.mxu1 %v8587_v42  ;;  %v7685_v16 = vpop.f32.mrb[193].mxu0 }
 0x2fb   : > { %v7690_v41 = vpop.f32.mrb[194].mxu0 }
 0x2fc   : > { %v5382_v56 = vpop.f32.mrb[136].mxu1  ;;  %v7695_v18 = vpop.f32.mrb[195].mxu0 }
 0x2fd   : > { %v7683_v55 = vadd.f32 %v5382_v56, %v7470_v27  ;;  %v2550_v12 = vpop.f32.mrb[137].mxu1  ;;  %v8592_v27 = vld [vmem:[#allocation80_spill] sm:$0xff]  ;;  %v8593_v56 = vld [vmem:[#allocation95_spill] sm:$0xff] }
 0x2fe   : > { %v7688_v57 = vadd.f32 %v2550_v12, %v7456_v45  ;;  %v5383_v62 = vpop.f32.mrb[138].mxu1 }
 0x2ff   : > { %8588 = vst [vmem:[#allocation79_spill] sm:$0xff] %v7683_v55  ;;  %v7693_v21 = vadd.f32 %v5383_v62, %v7476_v39  ;;  %v2553_v61 = vpop.f32.mrb[139].mxu1  ;;  %v8594_v55 = vld [vmem:[#allocation94_spill] sm:$0xff] }
 0x300   : > { %8589 = vst [vmem:[#allocation62_spill] sm:$0xff] %v7688_v57  ;;  %v7698_v42 = vadd.f32 %v2553_v61, %v7462_v6  ;;  %v8595_v20 = vpack.c.bf16 %v8593_v56, %v8594_v55 }
 0x301   : > { %8590 = vst [vmem:[#allocation4_spill] sm:$0xff] %v7693_v21  ;;  %3056 = vmatmul.mubr.bf16.gmra.mrb[244].mxu1 %v8592_v27  ;;  %v7704_v12 = vpop.f32.mrb[196].mxu0 }
 0x302   : > { %8591 = vst [vmem:[#allocation3_spill] sm:$0xff] %v7698_v42  ;;  %3063 = vmatprep.mubr.bf16.mxu1 %v8595_v20  ;;  %8596 = vst [vmem:[#allocation8_spill] sm:$0xff] %v7704_v12  ;;  %v7709_v62 = vpop.f32.mrb[197].mxu0  ;;  %v8604_v42 = vld [vmem:[#allocation98_spill] sm:$0xff]  ;;  %v8605_v12 = vld [vmem:[#allocation91_spill] sm:$0xff] }
 0x303   : > { %v7714_v61 = vpop.f32.mrb[198].mxu0 }
 0x304   : > { %v5386_v45 = vpop.f32.mrb[140].mxu1  ;;  %v7719_v20 = vpop.f32.mrb[199].mxu0 }
 0x305   : > { %v7707_v57 = vadd.f32 %v5386_v45, %v7504_v13  ;;  %v2566_v39 = vpop.f32.mrb[141].mxu1  ;;  %v8601_v13 = vld [vmem:[#allocation89_spill] sm:$0xff]  ;;  %v8602_v45 = vld [vmem:[#allocation84_spill] sm:$0xff] }
 0x306   : > { %v7712_v21 = vadd.f32 %v2566_v39, %v7484_v44  ;;  %v5387_v6 = vpop.f32.mrb[142].mxu1  ;;  %v8606_v44 = vpack.c.bf16 %v8604_v42, %v8605_v12 }
 0x307   : > { %8597 = vst [vmem:[#allocation2_spill] sm:$0xff] %v7707_v57  ;;  %v7717_v27 = vadd.f32 %v5387_v6, %v7510_v43  ;;  %v2569_v55 = vpop.f32.mrb[143].mxu1  ;;  %v8603_v57 = vpack.c.bf16 %v8601_v13, %v8602_v45  ;;  %v8612_v45 = vld [vmem:[#allocation83_spill] sm:$0xff] }
 0x308   : > { %8598 = vst [vmem:[#allocation11_spill] sm:$0xff] %v7712_v21  ;;  %v7722_v56 = vadd.f32 %v2569_v55, %v7493_v49 }
 0x309   : > { %8599 = vst [vmem:[#allocation10_spill] sm:$0xff] %v7717_v27  ;;  %3064 = vmatmul.mubr.bf16.gmra.mrb[248].mxu1 %v8603_v57  ;;  %v7730_v21 = vpop.f32.mrb[200].mxu0 }
 0x30a   : > { %8600 = vst [vmem:[#allocation16_spill] sm:$0xff] %v7722_v56  ;;  %3071 = vmatprep.mubr.bf16.mxu1 %v8606_v44  ;;  %v7735_v27 = vpop.f32.mrb[201].mxu0 }
 0x30b   : > { %v7740_v56 = vpop.f32.mrb[202].mxu0 }
 0x30c   : > { %v5390_v39 = vpop.f32.mrb[144].mxu1  ;;  %v7745_v12 = vpop.f32.mrb[203].mxu0 }
 0x30d   : > { %v7733_v43 = vadd.f32 %v5390_v39, %v7544_v31  ;;  %v2582_v6 = vpop.f32.mrb[145].mxu1  ;;  %v8611_v31 = vld [vmem:[#allocation87_spill] sm:$0xff]  ;;  %v8614_v39 = vld [vmem:[#allocation40_spill] sm:$0xff] }
 0x30e   : > { %v7738_v49 = vadd.f32 %v2582_v6, %v7524_v25  ;;  %v5391_v55 = vpop.f32.mrb[146].mxu1  ;;  %v8613_v44 = vpack.c.bf16 %v8611_v31, %v8612_v45 }
 0x30f   : > { %8607 = vst [vmem:[#allocation18_spill] sm:$0xff] %v7733_v43  ;;  %v7743_v57 = vadd.f32 %v5391_v55, %v7550_v32  ;;  %v2585_v42 = vpop.f32.mrb[147].mxu1  ;;  %v8615_v43 = vld [vmem:[#allocation9_spill] sm:$0xff] }
 0x310   : > { %8608 = vst [vmem:[#allocation93_spill] sm:$0xff] %v7738_v49  ;;  %v7748_v13 = vadd.f32 %v2585_v42, %v7530_v14  ;;  %v8616_v25 = vpack.c.bf16 %v8614_v39, %v8615_v43  ;;  %v8621_v39 = vld [vmem:[#allocation96_spill] sm:$0xff] }
 0x311   : > { %8609 = vst [vmem:[#allocation22_spill] sm:$0xff] %v7743_v57  ;;  %3072 = vmatmul.mubr.bf16.gmra.mrb[252].mxu1 %v8613_v44  ;;  %v7756_v49 = vpop.f32.mrb[204].mxu0 }
 0x312   : > { %8610 = vst [vmem:[#allocation24_spill] sm:$0xff] %v7748_v13  ;;  %3079 = vmatprep.mubr.bf16.mxu1 %v8616_v25  ;;  %v7761_v57 = vpop.f32.mrb[205].mxu0 }
 0x313   : > { %v7766_v13 = vpop.f32.mrb[206].mxu0 }
 0x314   : > { %v5394_v6 = vpop.f32.mrb[148].mxu1  ;;  %v7771_v45 = vpop.f32.mrb[207].mxu0 }
 0x315   : > { %v7759_v32 = vadd.f32 %v5394_v6, %v7575_v28  ;;  %v2598_v55 = vpop.f32.mrb[149].mxu1  ;;  %v8620_v28 = vld [vmem:[#allocation97_spill] sm:$0xff] }
 0x316   : > { %v7764_v14 = vadd.f32 %v2598_v55, %v7561_v4  ;;  %v5395_v42 = vpop.f32.mrb[150].mxu1  ;;  %v8622_v25 = vpack.c.bf16 %v8620_v28, %v8621_v39 }
 0x317   : > { %8617 = vst [vmem:[#allocation28_spill] sm:$0xff] %v7759_v32  ;;  %v7769_v31 = vadd.f32 %v5395_v42, %v7584_v48  ;;  %v2601_v43 = vpop.f32.mrb[151].mxu1 }
 0x318   : > { %8618 = vst [vmem:[#allocation30_spill] sm:$0xff] %v7764_v14  ;;  %v7774_v44 = vadd.f32 %v2601_v43, %v7567_v24 }
 0x319   : > { %8619 = vst [vmem:[#allocation34_spill] sm:$0xff] %v7769_v31  ;;  %3080 = vmatmul.mubr.bf16.gmra.mrb[0].mxu1 %v8622_v25  ;;  %v7779_v32 = vpop.f32.mrb[208].mxu0 }
 0x31a   : > { %v7784_v14 = vpop.f32.mrb[209].mxu0 }
 0x31b   : > { %v7789_v31 = vpop.f32.mrb[210].mxu0 }
 0x31c   : > { %v5398_v6 = vpop.f32.mrb[152].mxu1  ;;  %v7794_v28 = vpop.f32.mrb[211].mxu0 }
 0x31d   : > { %v7782_v4 = vadd.f32 %v5398_v6, %v7487_v26  ;;  %v2614_v55 = vpop.f32.mrb[153].mxu1 }
 0x31e   : > { %v7787_v48 = vadd.f32 %v2614_v55, %v7595_v60  ;;  %v5399_v42 = vpop.f32.mrb[154].mxu1 }
 0x31f   : > { %8623 = vst [vmem:[#allocation36_spill] sm:$0xff] %v7782_v4  ;;  %v7792_v24 = vadd.f32 %v5399_v42, %v7496_v1  ;;  %v2617_v43 = vpop.f32.mrb[155].mxu1 }
 0x320   : > { %v7797_v39 = vadd.f32 %v2617_v43, %v7604_v0 }
 0x321   : > { %8624 = vst [vmem:[#allocation41_spill] sm:$0xff] %v7792_v24  ;;  %v7799_v25 = vpop.f32.mrb[212].mxu0 }
 0x322   : > { %8625 = vst [vmem:[#allocation43_spill] sm:$0xff] %v7797_v39  ;;  %v7804_v55 = vpop.f32.mrb[213].mxu0 }
 0x323   : > { %v7809_v42 = vpop.f32.mrb[214].mxu0 }
 0x324   : > { %v5402_v26 = vpop.f32.mrb[156].mxu1  ;;  %v7814_v43 = vpop.f32.mrb[215].mxu0 }
 0x325   : > { %v7802_v6 = vadd.f32 %v5402_v26, %v7527_v38  ;;  %v2630_v60 = vpop.f32.mrb[157].mxu1 }
 0x326   : > { %v7807_v4 = vadd.f32 %v2630_v60, %v7507_v7  ;;  %v5403_v1 = vpop.f32.mrb[158].mxu1 }
 0x327   : > { %8626 = vst [vmem:[#allocation49_spill] sm:$0xff] %v7802_v6  ;;  %v7812_v24 = vadd.f32 %v5403_v1, %v7533_v58  ;;  %v2633_v0 = vpop.f32.mrb[159].mxu1 }
 0x328   : > { %8627 = vst [vmem:[#allocation52_spill] sm:$0xff] %v7807_v4  ;;  %v7817_v39 = vadd.f32 %v2633_v0, %v7513_v36 }
 0x329   : > { %8628 = vst [vmem:[#allocation59_spill] sm:$0xff] %v7812_v24  ;;  %v7819_v26 = vpop.f32.mrb[216].mxu0 }
 0x32a   : > { %8629 = vst [vmem:[#allocation61_spill] sm:$0xff] %v7817_v39  ;;  %8630 = vst [vmem:[#allocation68_spill] sm:$0xff] %v7819_v26  ;;  %v7824_v60 = vpop.f32.mrb[217].mxu0 }
 0x32b   : > { %v7829_v1 = vpop.f32.mrb[218].mxu0 }
 0x32c   : > { %v5406_v38 = vpop.f32.mrb[160].mxu1  ;;  %8633 = vst [vmem:[#allocation81_spill] sm:$0xff] %v7829_v1  ;;  %v7834_v0 = vpop.f32.mrb[219].mxu0 }
 0x32d   : > { %v7822_v6 = vadd.f32 %v5406_v38, %v7564_v51  ;;  %v2646_v7 = vpop.f32.mrb[161].mxu1  ;;  %8635 = vst [vmem:[#allocation90_spill] sm:$0xff] %v7834_v0 }
 0x32e   : > { %v7827_v4 = vadd.f32 %v2646_v7, %v7547_v29  ;;  %v5407_v58 = vpop.f32.mrb[162].mxu1  ;;  %v7847_v7 = vld [vmem:[%s8168_s4] ss:$0 sm:$0xff] }
 0x32f   : > { %8631 = vst [vmem:[#allocation71_spill] sm:$0xff] %v7822_v6  ;;  %v7832_v24 = vadd.f32 %v5407_v58, %v7570_v34  ;;  %v2649_v36 = vpop.f32.mrb[163].mxu1 }
 0x330   : > { %8632 = vst [vmem:[#allocation78_spill] sm:$0xff] %v7827_v4  ;;  %v7837_v39 = vadd.f32 %v2649_v36, %v7553_v22 }
 0x331   : > { %8634 = vst [vmem:[#allocation88_spill] sm:$0xff] %v7832_v24 }
 0x332   : > { %8636 = vst [vmem:[#allocation45_spill] sm:$0xff] %v7837_v39  ;;  %v7839_v38 = vpop.f32.mrb[220].mxu0 }
 0x333   : > { %8637 = vst [vmem:[#allocation6_spill] sm:$0xff] %v7839_v38  ;;  %v7842_v29 = vpop.f32.mrb[221].mxu0 }
 0x334   : > { %v2897_v51 = vpop.f32.mrb[164].mxu1  ;;  %8638 = vst [vmem:[#allocation7_spill] sm:$0xff] %v7842_v29  ;;  %v7849_v58 = vpop.f32.mrb[222].mxu0 }
 0x335   : > { %v3123_v6 = vadd.f32 %v7619_v9, %v2897_v51  ;;  %v2899_v26 = vpop.f32.mrb[165].mxu1  ;;  %8639 = vst [vmem:[#allocation5_spill] sm:$0xff] %v7849_v58  ;;  %v7853_v39 = vpop.f32.mrb[223].mxu0 }
 0x336   : > { %v2900_v34 = vpop.f32.mrb[166].mxu1 }
 0x337   : > { %v3313_v24 = vadd.f32 %v3123_v6, %v7581_v50  ;;  %v3126_v22 = vadd.f32 %v7629_v52, %v2900_v34  ;;  %v2902_v36 = vpop.f32.mrb[167].mxu1 }
 0x339   : > { %v3368_v9 = vadd.f32 %v7847_v7, %v3313_v24  ;;  %v3314_v26 = vadd.f32 %v3126_v22, %v7590_v35 }
 0x33a   : > { %v7858_v38 = vpop.f32.mrb[224].mxu0 }
 0x33b   : > { %v3369_v51 = vadd.f32 %v7847_v7, %v3314_v26  ;;  %8640 = vst [vmem:[#allocation27_spill] sm:$0xff] %v7858_v38  ;;  %v3416_v29 = vmax.f32 %v3368_v9, 0.0  ;;  %v7861_v50 = vpop.f32.mrb[225].mxu0 }
 0x33c   : > { %v2905_v4 = vpop.f32.mrb[168].mxu1  ;;  %v7863_v6 = vpop.f32.mrb[226].mxu0 }
 0x33d   : > { %v3417_v1 = vmax.f32 %v3369_v51, 0.0  ;;  %v3131_v58 = vadd.f32 %v7614_v30, %v2905_v4  ;;  %v2907_v0 = vpop.f32.mrb[169].mxu1  ;;  %8641 = vst [vmem:[#allocation31_spill] sm:$0xff] %v7863_v6  ;;  %v7867_v36 = vpop.f32.mrb[227].mxu0 }
 0x33e   : > { %v2908_v52 = vpop.f32.mrb[170].mxu1 }
 0x33f   : > { %v3315_v34 = vadd.f32 %v3131_v58, %v7578_v5  ;;  %v3134_v24 = vadd.f32 %v7624_v53, %v2908_v52  ;;  %v2910_v35 = vpop.f32.mrb[171].mxu1  ;;  %v3464_v22 = vpack.c.bf16 %v3417_v1, %v3416_v29 }
 0x341   : > { %v3370_v26 = vadd.f32 %v7847_v7, %v3315_v34  ;;  %v3316_v9 = vadd.f32 %v3134_v24, %v7587_v2  ;;  %5488 = vmatprep.mubr.bf16.mxu0 %v3464_v22 }
 0x343   : > { %v3371_v30 = vadd.f32 %v7847_v7, %v3316_v9  ;;  %v3418_v0 = vmax.f32 %v3370_v26, 0.0 }
 0x344   : > { %v2913_v4 = vpop.f32.mrb[172].mxu1 }
 0x345   : > { %v3419_v51 = vmax.f32 %v3371_v30, 0.0  ;;  %v3139_v6 = vadd.f32 %v7641_v54, %v2913_v4  ;;  %v2915_v38 = vpop.f32.mrb[173].mxu1 }
 0x346   : > { %v2916_v5 = vpop.f32.mrb[174].mxu1 }
 0x347   : > { %v3465_v58 = vpack.c.bf16 %v3419_v51, %v3418_v0  ;;  %v3317_v53 = vadd.f32 %v3139_v6, %v7601_v11  ;;  %v3142_v1 = vadd.f32 %v7651_v63, %v2916_v5  ;;  %v2918_v29 = vpop.f32.mrb[175].mxu1 }
 0x349   : > { %v3372_v52 = vadd.f32 %v7847_v7, %v3317_v53  ;;  %v3318_v2 = vadd.f32 %v3142_v1, %v7610_v8  ;;  %5489 = vmatmul.mubr.bf16.vlgmr.msra.gmra.mrb[228].mxu0 %v3465_v58 }
 0x34b   : > { %v3373_v34 = vadd.f32 %v7847_v7, %v3318_v2  ;;  %v3420_v35 = vmax.f32 %v3372_v52, 0.0 }
 0x34c   : > { %v2921_v24 = vpop.f32.mrb[176].mxu1 }
 0x34d   : > { %v3421_v22 = vmax.f32 %v3373_v34, 0.0  ;;  %v3147_v54 = vadd.f32 %v7636_v10, %v2921_v24  ;;  %v2923_v38 = vpop.f32.mrb[177].mxu1 }
 0x34e   : > { %v2924_v26 = vpop.f32.mrb[178].mxu1 }
 0x34f   : > { %v3319_v9 = vadd.f32 %v3147_v54, %v7598_v47  ;;  %v3150_v11 = vadd.f32 %v7646_v17, %v2924_v26  ;;  %v2926_v63 = vpop.f32.mrb[179].mxu1  ;;  %v3466_v6 = vpack.c.bf16 %v3421_v22, %v3420_v35 }
 0x351   : > { %v3374_v30 = vadd.f32 %v7847_v7, %v3319_v9  ;;  %v3320_v8 = vadd.f32 %v3150_v11, %v7607_v37  ;;  %5492 = vmatprep.mubr.bf16.mxu0 %v3466_v6  ;;  %v8642_v11 = vld [vmem:[#allocation72_spill] sm:$0xff] }
 0x353   : > { %v3375_v4 = vadd.f32 %v7847_v7, %v3320_v8  ;;  %v3422_v51 = vmax.f32 %v3374_v30, 0.0 }
 0x354   : > { %v2929_v0 = vpop.f32.mrb[180].mxu1 }
 0x355   : > { %v3423_v5 = vmax.f32 %v3375_v4, 0.0  ;;  %v3155_v10 = vadd.f32 %v7663_v19, %v2929_v0  ;;  %v2931_v58 = vpop.f32.mrb[181].mxu1 }
 0x356   : > { %v2932_v53 = vpop.f32.mrb[182].mxu1 }
 0x357   : > { %v3321_v47 = vadd.f32 %v3155_v10, %v7622_v59  ;;  %v3158_v17 = vadd.f32 %v7673_v46, %v2932_v53  ;;  %v2934_v1 = vpop.f32.mrb[183].mxu1  ;;  %v3467_v29 = vpack.c.bf16 %v3423_v5, %v3422_v51  ;;  %v8643_v51 = vld [vmem:[#allocation25_spill] sm:$0xff] }
 0x358   : > { %v8644_v53 = vld [vmem:[#allocation69_spill] sm:$0xff] }
 0x359   : > { %v3376_v52 = vadd.f32 %v7847_v7, %v3321_v47  ;;  %v3322_v37 = vadd.f32 %v3158_v17, %v7632_v3  ;;  %5493 = vmatmul.mubr.bf16.gmra.mrb[232].mxu0 %v3467_v29 }
 0x35b   : > { %v3377_v2 = vadd.f32 %v7847_v7, %v3322_v37  ;;  %v3424_v24 = vmax.f32 %v3376_v52, 0.0 }
 0x35c   : > { %v2937_v34 = vpop.f32.mrb[184].mxu1 }
 0x35d   : > { %v3425_v35 = vmax.f32 %v3377_v2, 0.0  ;;  %v3163_v19 = vadd.f32 %v7658_v15, %v2937_v34  ;;  %v2939_v22 = vpop.f32.mrb[185].mxu1  ;;  %v8645_v34 = vld [vmem:[#allocation74_spill] sm:$0xff] }
 0x35e   : > { %v2940_v54 = vpop.f32.mrb[186].mxu1 }
 0x35f   : > { %v3323_v59 = vadd.f32 %v3163_v19, %v7617_v33  ;;  %v3166_v46 = vadd.f32 %v7668_v23, %v2940_v54  ;;  %v2942_v38 = vpop.f32.mrb[187].mxu1  ;;  %v3468_v26 = vpack.c.bf16 %v3425_v35, %v3424_v24  ;;  %v8646_v54 = vld [vmem:[#allocation64_spill] sm:$0xff] }
 0x361   : > { %v3378_v9 = vadd.f32 %v7847_v7, %v3323_v59  ;;  %v3324_v3 = vadd.f32 %v3166_v46, %v8642_v11  ;;  %5496 = vmatprep.mubr.bf16.mxu0 %v3468_v26 }
 0x363   : > { %v3379_v63 = vadd.f32 %v7847_v7, %v3324_v3  ;;  %v3426_v30 = vmax.f32 %v3378_v9, 0.0 }
 0x364   : > { %v2945_v6 = vpop.f32.mrb[188].mxu1 }
 0x365   : > { %v3427_v8 = vmax.f32 %v3379_v63, 0.0  ;;  %v3171_v15 = vadd.f32 %v7685_v16, %v2945_v6  ;;  %v2947_v4 = vpop.f32.mrb[189].mxu1  ;;  %v8647_v63 = vld [vmem:[#allocation26_spill] sm:$0xff] }
 0x366   : > { %v2948_v0 = vpop.f32.mrb[190].mxu1  ;;  %v8648_v4 = vld [vmem:[#allocation75_spill] sm:$0xff] }
 0x367   : > { %v3325_v33 = vadd.f32 %v3171_v15, %v8643_v51  ;;  %v3174_v23 = vadd.f32 %v7695_v18, %v2948_v0  ;;  %v2950_v5 = vpop.f32.mrb[191].mxu1  ;;  %v3469_v10 = vpack.c.bf16 %v3427_v8, %v3426_v30 }
 0x369   : > { %v3380_v58 = vadd.f32 %v7847_v7, %v3325_v33  ;;  %v3326_v47 = vadd.f32 %v3174_v23, %v8644_v53  ;;  %5497 = vmatmul.mubr.bf16.gmra.mrb[236].mxu0 %v3469_v10  ;;  %v8649_v10 = vld [vmem:[#allocation8_spill] sm:$0xff] }
 0x36b   : > { %v3381_v17 = vadd.f32 %v7847_v7, %v3326_v47  ;;  %v3428_v29 = vmax.f32 %v3380_v58, 0.0  ;;  %v8650_v47 = vld [vmem:[#allocation17_spill] sm:$0xff] }
 0x36c   : > { %v2953_v1 = vpop.f32.mrb[192].mxu1 }
 0x36d   : > { %v3429_v52 = vmax.f32 %v3381_v17, 0.0  ;;  %v3179_v16 = vadd.f32 %v7680_v40, %v2953_v1  ;;  %v2955_v37 = vpop.f32.mrb[193].mxu1 }
 0x36e   : > { %v2956_v2 = vpop.f32.mrb[194].mxu1 }
 0x36f   : > { %v3327_v24 = vadd.f32 %v3179_v16, %v8645_v34  ;;  %v3182_v18 = vadd.f32 %v7690_v41, %v2956_v2  ;;  %v2958_v35 = vpop.f32.mrb[195].mxu1  ;;  %v3470_v19 = vpack.c.bf16 %v3429_v52, %v3428_v29  ;;  %v8651_v16 = vld [vmem:[#allocation67_spill] sm:$0xff] }
 0x371   : > { %v3382_v22 = vadd.f32 %v7847_v7, %v3327_v24  ;;  %v3328_v59 = vadd.f32 %v3182_v18, %v8646_v54  ;;  %5500 = vmatprep.mubr.bf16.mxu0 %v3470_v19  ;;  %v8652_v54 = vld [vmem:[#allocation62_spill] sm:$0xff] }
 0x373   : > { %v3383_v46 = vadd.f32 %v7847_v7, %v3328_v59  ;;  %v3430_v26 = vmax.f32 %v3382_v22, 0.0 }
 0x374   : > { %v2961_v38 = vpop.f32.mrb[196].mxu1 }
 0x375   : > { %v3431_v9 = vmax.f32 %v3383_v46, 0.0  ;;  %v3187_v40 = vadd.f32 %v7709_v62, %v2961_v38  ;;  %v2963_v11 = vpop.f32.mrb[197].mxu1 }
 0x376   : > { %v2964_v3 = vpop.f32.mrb[198].mxu1 }
 0x377   : > { %v3329_v6 = vadd.f32 %v3187_v40, %v8647_v63  ;;  %v3190_v41 = vadd.f32 %v7719_v20, %v2964_v3  ;;  %v2966_v30 = vpop.f32.mrb[199].mxu1  ;;  %v3471_v8 = vpack.c.bf16 %v3431_v9, %v3430_v26  ;;  %v8653_v9 = vld [vmem:[#allocation3_spill] sm:$0xff] }
 0x379   : > { %v3384_v15 = vadd.f32 %v7847_v7, %v3329_v6  ;;  %v3330_v0 = vadd.f32 %v3190_v41, %v8648_v4  ;;  %5501 = vmatmul.mubr.bf16.gmra.mrb[240].mxu0 %v3471_v8  ;;  %v8654_v8 = vld [vmem:[#allocation79_spill] sm:$0xff] }
 0x37b   : > { %v3385_v51 = vadd.f32 %v7847_v7, %v3330_v0  ;;  %v3432_v23 = vmax.f32 %v3384_v15, 0.0 }
 0x37c   : > { %v2969_v33 = vpop.f32.mrb[200].mxu1 }
 0x37d   : > { %v3433_v5 = vmax.f32 %v3385_v51, 0.0  ;;  %v3195_v62 = vadd.f32 %v8649_v10, %v2969_v33  ;;  %v2971_v58 = vpop.f32.mrb[201].mxu1  ;;  %v8655_v33 = vld [vmem:[#allocation4_spill] sm:$0xff] }
 0x37e   : > { %v2972_v53 = vpop.f32.mrb[202].mxu1 }
 0x37f   : > { %v3331_v17 = vadd.f32 %v3195_v62, %v8650_v47  ;;  %v3198_v20 = vadd.f32 %v7714_v61, %v2972_v53  ;;  %v2974_v1 = vpop.f32.mrb[203].mxu1  ;;  %v3472_v29 = vpack.c.bf16 %v3433_v5, %v3432_v23 }
 0x381   : > { %v3386_v52 = vadd.f32 %v7847_v7, %v3331_v17  ;;  %v3332_v37 = vadd.f32 %v3198_v20, %v8651_v16  ;;  %5504 = vmatprep.mubr.bf16.mxu0 %v3472_v29  ;;  %v8656_v17 = vld [vmem:[#allocation11_spill] sm:$0xff]  ;;  %v8657_v16 = vld [vmem:[#allocation16_spill] sm:$0xff] }
 0x383   : > { %v3387_v2 = vadd.f32 %v7847_v7, %v3332_v37  ;;  %v3434_v24 = vmax.f32 %v3386_v52, 0.0 }
 0x384   : > { %v2977_v34 = vpop.f32.mrb[204].mxu1 }
 0x385   : > { %v3435_v18 = vmax.f32 %v3387_v2, 0.0  ;;  %v3203_v35 = vadd.f32 %v7735_v27, %v2977_v34  ;;  %v2979_v19 = vpop.f32.mrb[205].mxu1 }
 0x386   : > { %v2980_v22 = vpop.f32.mrb[206].mxu1 }
 0x387   : > { %v3333_v59 = vadd.f32 %v3203_v35, %v8652_v54  ;;  %v3206_v61 = vadd.f32 %v7745_v12, %v2980_v22  ;;  %v2982_v46 = vpop.f32.mrb[207].mxu1  ;;  %v3473_v38 = vpack.c.bf16 %v3435_v18, %v3434_v24  ;;  %v8658_v22 = vld [vmem:[#allocation2_spill] sm:$0xff] }
 0x389   : > { %v3388_v26 = vadd.f32 %v7847_v7, %v3333_v59  ;;  %v3334_v40 = vadd.f32 %v3206_v61, %v8653_v9  ;;  %5505 = vmatmul.mubr.bf16.gmra.mrb[244].mxu0 %v3473_v38  ;;  %v8659_v38 = vld [vmem:[#allocation10_spill] sm:$0xff] }
 0x38b   : > { %v3389_v11 = vadd.f32 %v7847_v7, %v3334_v40  ;;  %v3436_v63 = vmax.f32 %v3388_v26, 0.0 }
 0x38c   : > { %v2985_v3 = vpop.f32.mrb[208].mxu1 }
 0x38d   : > { %v3437_v6 = vmax.f32 %v3389_v11, 0.0  ;;  %v3211_v27 = vadd.f32 %v7730_v21, %v2985_v3  ;;  %v2987_v41 = vpop.f32.mrb[209].mxu1 }
 0x38e   : > { %v2988_v30 = vpop.f32.mrb[210].mxu1 }
 0x38f   : > { %v3335_v15 = vadd.f32 %v3211_v27, %v8654_v8  ;;  %v3214_v12 = vadd.f32 %v7740_v56, %v2988_v30  ;;  %v2990_v4 = vpop.f32.mrb[211].mxu1  ;;  %v3474_v0 = vpack.c.bf16 %v3437_v6, %v3436_v63  ;;  %v8660_v27 = vld [vmem:[#allocation93_spill] sm:$0xff] }
 0x391   : > { %v3390_v51 = vadd.f32 %v7847_v7, %v3335_v15  ;;  %v3336_v23 = vadd.f32 %v3214_v12, %v8655_v33  ;;  %5508 = vmatprep.mubr.bf16.mxu0 %v3474_v0  ;;  %v8661_v12 = vld [vmem:[#allocation24_spill] sm:$0xff] }
 0x393   : > { %v3391_v5 = vadd.f32 %v7847_v7, %v3336_v23  ;;  %v3438_v62 = vmax.f32 %v3390_v51, 0.0 }
 0x394   : > { %v2993_v10 = vpop.f32.mrb[212].mxu1 }
 0x395   : > { %v3439_v58 = vmax.f32 %v3391_v5, 0.0  ;;  %v3219_v21 = vadd.f32 %v7761_v57, %v2993_v10  ;;  %v2995_v53 = vpop.f32.mrb[213].mxu1 }
 0x396   : > { %v2996_v47 = vpop.f32.mrb[214].mxu1 }
 0x397   : > { %v3337_v20 = vadd.f32 %v3219_v21, %v8656_v17  ;;  %v3222_v56 = vadd.f32 %v7771_v45, %v2996_v47  ;;  %v2998_v1 = vpop.f32.mrb[215].mxu1  ;;  %v3475_v29 = vpack.c.bf16 %v3439_v58, %v3438_v62  ;;  %v8662_v62 = vld [vmem:[#allocation18_spill] sm:$0xff] }
 0x398   : > { %v8663_v17 = vld [vmem:[#allocation22_spill] sm:$0xff] }
 0x399   : > { %v3392_v52 = vadd.f32 %v7847_v7, %v3337_v20  ;;  %v3338_v37 = vadd.f32 %v3222_v56, %v8657_v16  ;;  %5509 = vmatmul.mubr.bf16.gmra.mrb[248].mxu0 %v3475_v29 }
 0x39b   : > { %v3393_v2 = vadd.f32 %v7847_v7, %v3338_v37  ;;  %v3440_v24 = vmax.f32 %v3392_v52, 0.0 }
 0x39c   : > { %v3001_v34 = vpop.f32.mrb[216].mxu1 }
 0x39d   : > { %v3441_v18 = vmax.f32 %v3393_v2, 0.0  ;;  %v3227_v57 = vadd.f32 %v7756_v49, %v3001_v34  ;;  %v3003_v35 = vpop.f32.mrb[217].mxu1  ;;  %v8664_v34 = vld [vmem:[#allocation30_spill] sm:$0xff] }
 0x39e   : > { %v3004_v19 = vpop.f32.mrb[218].mxu1 }
 0x39f   : > { %v3339_v54 = vadd.f32 %v3227_v57, %v8658_v22  ;;  %v3230_v45 = vadd.f32 %v7766_v13, %v3004_v19  ;;  %v3006_v59 = vpop.f32.mrb[219].mxu1  ;;  %v3476_v61 = vpack.c.bf16 %v3441_v18, %v3440_v24 }
 0x3a1   : > { %v3394_v46 = vadd.f32 %v7847_v7, %v3339_v54  ;;  %v3340_v26 = vadd.f32 %v3230_v45, %v8659_v38  ;;  %5512 = vmatprep.mubr.bf16.mxu0 %v3476_v61 }
 0x3a3   : > { %v3395_v9 = vadd.f32 %v7847_v7, %v3340_v26  ;;  %v3442_v11 = vmax.f32 %v3394_v46, 0.0  ;;  %v8665_v46 = vld [vmem:[#allocation28_spill] sm:$0xff] }
 0x3a4   : > { %v3009_v40 = vpop.f32.mrb[220].mxu1 }
 0x3a5   : > { %v3443_v3 = vmax.f32 %v3395_v9, 0.0  ;;  %v3235_v49 = vadd.f32 %v7784_v14, %v3009_v40  ;;  %v3011_v63 = vpop.f32.mrb[221].mxu1 }
 0x3a6   : > { %v3012_v6 = vpop.f32.mrb[222].mxu1 }
 0x3a7   : > { %v3341_v41 = vadd.f32 %v3235_v49, %v8660_v27  ;;  %v3238_v13 = vadd.f32 %v7794_v28, %v3012_v6  ;;  %v3014_v30 = vpop.f32.mrb[223].mxu1  ;;  %v3477_v8 = vpack.c.bf16 %v3443_v3, %v3442_v11  ;;  %v8666_v11 = vld [vmem:[#allocation34_spill] sm:$0xff] }
 0x3a9   : > { %v3396_v15 = vadd.f32 %v7847_v7, %v3341_v41  ;;  %v3342_v4 = vadd.f32 %v3238_v13, %v8661_v12  ;;  %5513 = vmatmul.mubr.bf16.gmra.mrb[252].mxu0 %v3477_v8 }
 0x3ab   : > { %v3397_v0 = vadd.f32 %v7847_v7, %v3342_v4  ;;  %v3444_v33 = vmax.f32 %v3396_v15, 0.0  ;;  %v8668_v4 = vld [vmem:[#allocation43_spill] sm:$0xff] }
 0x3ac   : > { %v3017_v51 = vpop.f32.mrb[224].mxu1 }
 0x3ad   : > { %v3445_v23 = vmax.f32 %v3397_v0, 0.0  ;;  %v3243_v14 = vadd.f32 %v7779_v32, %v3017_v51  ;;  %v3019_v5 = vpop.f32.mrb[225].mxu1 }
 0x3ae   : > { %v3020_v10 = vpop.f32.mrb[226].mxu1  ;;  %v8669_v5 = vld [vmem:[#allocation68_spill] sm:$0xff] }
 0x3af   : > { %v3343_v58 = vadd.f32 %v3243_v14, %v8662_v62  ;;  %v3246_v28 = vadd.f32 %v7789_v31, %v3020_v10  ;;  %v3022_v21 = vpop.f32.mrb[227].mxu1  ;;  %v3478_v53 = vpack.c.bf16 %v3445_v23, %v3444_v33 }
 0x3b1   : > { %v3398_v47 = vadd.f32 %v7847_v7, %v3343_v58  ;;  %v3344_v20 = vadd.f32 %v3246_v28, %v8663_v17  ;;  %5516 = vmatprep.mubr.bf16.mxu0 %v3478_v53  ;;  %v8670_v58 = vld [vmem:[#allocation36_spill] sm:$0xff] }
 0x3b3   : > { %v3399_v56 = vadd.f32 %v7847_v7, %v3344_v20  ;;  %v3446_v29 = vmax.f32 %v3398_v47, 0.0  ;;  %v8672_v20 = vld [vmem:[#allocation41_spill] sm:$0xff] }
 0x3b4   : > { %v3025_v1 = vpop.f32.mrb[228].mxu1 }
 0x3b5   : > { %v3447_v52 = vmax.f32 %v3399_v56, 0.0  ;;  %v3251_v32 = vadd.f32 %v7804_v55, %v3025_v1  ;;  %v3027_v16 = vpop.f32.mrb[229].mxu1 }
 0x3b6   : > { %v3028_v37 = vpop.f32.mrb[230].mxu1  ;;  %v8673_v16 = vld [vmem:[#allocation7_spill] sm:$0xff] }
 0x3b7   : > { %v3479_v2 = vpack.c.bf16 %v3447_v52, %v3446_v29  ;;  %v3345_v24 = vadd.f32 %v3251_v32, %v8664_v34  ;;  %v3254_v31 = vadd.f32 %v7814_v43, %v3028_v37  ;;  %v3030_v18 = vpop.f32.mrb[231].mxu1 }
 0x3b9   : > { %v3400_v57 = vadd.f32 %v7847_v7, %v3345_v24  ;;  %v3346_v35 = vadd.f32 %v3254_v31, %v7774_v44  ;;  %5517 = vmatmul.mubr.bf16.gmra.mrb[0].mxu0 %v3479_v2  ;;  %v8674_v31 = vld [vmem:[#allocation52_spill] sm:$0xff] }
 0x3bb   : > { %v3401_v19 = vadd.f32 %v7847_v7, %v3346_v35  ;;  %v3448_v54 = vmax.f32 %v3400_v57, 0.0 }
 0x3bc   : > { %v3033_v22 = vpop.f32.mrb[232].mxu1 }
 0x3bd   : > { %v3449_v45 = vmax.f32 %v3401_v19, 0.0  ;;  %v3259_v55 = vadd.f32 %v7799_v25, %v3033_v22  ;;  %v3035_v59 = vpop.f32.mrb[233].mxu1  ;;  %v8675_v22 = vld [vmem:[#allocation61_spill] sm:$0xff] }
 0x3be   : > { %v3036_v61 = vpop.f32.mrb[234].mxu1 }
 0x3bf   : > { %v3347_v38 = vadd.f32 %v3259_v55, %v8665_v46  ;;  %v3262_v26 = vadd.f32 %v7809_v42, %v3036_v61  ;;  %v3038_v43 = vpop.f32.mrb[235].mxu1  ;;  %v3480_v9 = vpack.c.bf16 %v3449_v45, %v3448_v54  ;;  %v8667_v42 = vld [vmem:[#allocation90_spill] sm:$0xff] }
 0x3c0   : > { %v8676_v46 = vld [vmem:[#allocation6_spill] sm:$0xff] }
 0x3c1   : > { %v3402_v40 = vadd.f32 %v7847_v7, %v3347_v38  ;;  %v3348_v44 = vadd.f32 %v3262_v26, %v8666_v11  ;;  %5520 = vmatprep.mubr.bf16.mxu0 %v3480_v9  ;;  %v8677_v9 = vld [vmem:[#allocation49_spill] sm:$0xff] }
 0x3c2   : > { %v8678_v11 = vld [vmem:[#allocation5_spill] sm:$0xff] }
 0x3c3   : > { %v3403_v3 = vadd.f32 %v7847_v7, %v3348_v44  ;;  %v3450_v63 = vmax.f32 %v3402_v40, 0.0 }
 0x3c4   : > { %v3041_v49 = vpop.f32.mrb[236].mxu1 }
 0x3c5   : > { %v3451_v6 = vmax.f32 %v3403_v3, 0.0  ;;  %v3267_v25 = vadd.f32 %v7824_v60, %v3041_v49  ;;  %v3043_v27 = vpop.f32.mrb[237].mxu1 }
 0x3c6   : > { %v3044_v41 = vpop.f32.mrb[238].mxu1 }
 0x3c7   : > { %v3481_v13 = vpack.c.bf16 %v3451_v6, %v3450_v63  ;;  %v3349_v30 = vadd.f32 %v3267_v25, %v7787_v48  ;;  %v3270_v8 = vadd.f32 %v8667_v42, %v3044_v41  ;;  %v3046_v15 = vpop.f32.mrb[239].mxu1  ;;  %v8671_v48 = vld [vmem:[#allocation81_spill] sm:$0xff]  ;;  %v8679_v63 = vld [vmem:[#allocation59_spill] sm:$0xff] }
 0x3c9   : > { %v3404_v12 = vadd.f32 %v7847_v7, %v3349_v30  ;;  %v3350_v0 = vadd.f32 %v3270_v8, %v8668_v4  ;;  %5521 = vmatmul.mubr.bf16.gmra.mrb[4].mxu0 %v3481_v13 }
 0x3cb   : > { %v3405_v51 = vadd.f32 %v7847_v7, %v3350_v0  ;;  %v3452_v23 = vmax.f32 %v3404_v12, 0.0  ;;  %v8680_v12 = vld [vmem:[#allocation78_spill] sm:$0xff] }
 0x3cc   : > { %v3049_v33 = vpop.f32.mrb[240].mxu1 }
 0x3cd   : > { %v3453_v14 = vmax.f32 %v3405_v51, 0.0  ;;  %v3275_v60 = vadd.f32 %v8669_v5, %v3049_v33  ;;  %v3051_v10 = vpop.f32.mrb[241].mxu1 }
 0x3ce   : > { %v3052_v62 = vpop.f32.mrb[242].mxu1 }
 0x3cf   : > { %v3351_v28 = vadd.f32 %v3275_v60, %v8670_v58  ;;  %v3278_v21 = vadd.f32 %v8671_v48, %v3052_v62  ;;  %v3054_v53 = vpop.f32.mrb[243].mxu1  ;;  %v3482_v47 = vpack.c.bf16 %v3453_v14, %v3452_v23  ;;  %v8681_v23 = vld [vmem:[#allocation45_spill] sm:$0xff]  ;;  %v8682_v58 = vld [vmem:[#allocation27_spill] sm:$0xff] }
 0x3d0   : > { %v8684_v53 = vld [vmem:[#allocation31_spill] sm:$0xff] }
 0x3d1   : > { %v3406_v17 = vadd.f32 %v7847_v7, %v3351_v28  ;;  %v3352_v56 = vadd.f32 %v3278_v21, %v8672_v20  ;;  %5524 = vmatprep.mubr.bf16.mxu0 %v3482_v47  ;;  %v8683_v21 = vld [vmem:[#allocation71_spill] sm:$0xff] }
 0x3d3   : > { %v3407_v1 = vadd.f32 %v7847_v7, %v3352_v56  ;;  %v3454_v52 = vmax.f32 %v3406_v17, 0.0 }
 0x3d4   : > { %v3057_v29 = vpop.f32.mrb[244].mxu1 }
 0x3d5   : > { %v3455_v32 = vmax.f32 %v3407_v1, 0.0  ;;  %v3283_v37 = vadd.f32 %v8673_v16, %v3057_v29  ;;  %v3059_v2 = vpop.f32.mrb[245].mxu1  ;;  %v8685_v1 = vld [vmem:[#allocation88_spill] sm:$0xff] }
 0x3d6   : > { %v3060_v34 = vpop.f32.mrb[246].mxu1  ;;  %v4998_v2 = vld [vmem:[%s5763_s8 + $0x10] sm:$0xff]  }
 0x3d7   : > { %v3483_v24 = vpack.c.bf16 %v3455_v32, %v3454_v52  ;;  %v3353_v18 = vadd.f32 %v3283_v37, %v8674_v31  ;;  %v3286_v57 = vadd.f32 %v7853_v39, %v3060_v34  ;;  %v3062_v35 = vpop.f32.mrb[247].mxu1  ;;  %v4999_v34 = vld [vmem:[%s5763_s8 + $0x18] sm:$0xff]   ;;  %v4789_v31 = vunpack.c.h.bf16 %v4998_v2 }
 0x3d9   : > { %v3408_v19 = vadd.f32 %v7847_v7, %v3353_v18  ;;  %v3354_v54 = vadd.f32 %v3286_v57, %v8675_v22  ;;  %5525 = vmatmul.mubr.bf16.gmra.mrb[8].mxu0 %v3483_v24  ;;  %v3784_v24 = vld [vmem:[%s5763_s8 + $0xc] sm:$0xf]  ;;  %v4792_v18 = vunpack.c.l.bf16 %v4999_v34  ;;  %v4788_v57 = vunpack.c.l.bf16 %v4998_v2 }
 0x3da   : > { %v3833_v35 = vunpack.c.l.bf16 %v3784_v24  ;;  %v3934_v22 = vrot.slane %v4789_v31, 1 }
 0x3db   : > { %v3409_v45 = vadd.f32 %v7847_v7, %v3354_v54  ;;  %v3456_v59 = vmax.f32 %v3408_v19, 0.0  ;;  %v4793_v19 = vunpack.c.h.bf16 %v4999_v34  ;;  %v3936_v54 = vrot.slane %v4792_v18, 1 }
 0x3dc   : > { %v3065_v55 = vpop.f32.mrb[248].mxu1 }
 0x3dd   : > { %v3457_v61 = vmax.f32 %v3409_v45, 0.0  ;;  %v3291_v38 = vadd.f32 %v8676_v46, %v3065_v55  ;;  %v3067_v26 = vpop.f32.mrb[249].mxu1  ;;  %v3931_v45 = vrot.slane %v3833_v35, 1  ;;  %v3932_v55 = vrot.slane %v4788_v57, 1 }
 0x3de   : > { %v3068_v43 = vpop.f32.mrb[250].mxu1  ;;  %v3937_v46 = vsel %vm904_vm0, %v3934_v22, %v3936_v54 }
 0x3df   : > { %v3355_v40 = vadd.f32 %v3291_v38, %v8677_v9  ;;  %v3294_v44 = vadd.f32 %v8678_v11, %v3068_v43  ;;  %v3070_v39 = vpop.f32.mrb[251].mxu1  ;;  %v3484_v3 = vpack.c.bf16 %v3457_v61, %v3456_v59  ;;  %v3938_v59 = vrot.slane %v4793_v19, 1 }
 0x3e0   : > { %v3933_v43 = vsel %vm904_vm0, %v3931_v45, %v3932_v55 }
 0x3e1   : > { %v3410_v49 = vadd.f32 %v7847_v7, %v3355_v40  ;;  %v3356_v6 = vadd.f32 %v3294_v44, %v8679_v63  ;;  %5528 = vmatprep.mubr.bf16.mxu0 %v3484_v3  ;;  %v3939_v11 = vsel %vm904_vm0, %v3936_v54, %v3938_v59 }
 0x3e3   : > { %v3411_v25 = vadd.f32 %v7847_v7, %v3356_v6  ;;  %v3458_v41 = vmax.f32 %v3410_v49, 0.0  ;;  %v3935_v49 = vsel %vm904_vm0, %v3932_v55, %v3934_v22 }
 0x3e4   : > { %v3073_v27 = vpop.f32.mrb[252].mxu1 }
 0x3e5   : > { %v3459_v13 = vmax.f32 %v3411_v25, 0.0  ;;  %v3299_v30 = vadd.f32 %v7861_v50, %v3073_v27  ;;  %v3075_v42 = vpop.f32.mrb[253].mxu1  ;;  %v5000_v27 = vld [vmem:[%s5763_s8 + $0x20] sm:$0xff]  }
 0x3e6   : > { %v3076_v8 = vpop.f32.mrb[254].mxu1 }
 0x3e7   : > { %v3485_v15 = vpack.c.bf16 %v3459_v13, %v3458_v41  ;;  %v3357_v4 = vadd.f32 %v3299_v30, %v8680_v12  ;;  %v3302_v0 = vadd.f32 %v7867_v36, %v3076_v8  ;;  %v3078_v51 = vpop.f32.mrb[255].mxu1  ;;  %v5001_v41 = vld [vmem:[%s5763_s8 + $0x28] sm:$0xff]   ;;  %v4797_v12 = vunpack.c.h.bf16 %v5000_v27 }
 0x3e8   : > { %v4796_v51 = vunpack.c.l.bf16 %v5000_v27 }
 0x3e9   : > { %v3412_v33 = vadd.f32 %v7847_v7, %v3357_v4  ;;  %v3358_v14 = vadd.f32 %v3302_v0, %v8681_v23  ;;  %5529 = vmatmul.mubr.bf16.gmra.mrb[12].mxu0 %v3485_v15  ;;  %v4800_v4 = vunpack.c.l.bf16 %v5001_v41  ;;  %v4801_v23 = vunpack.c.h.bf16 %v5001_v41  ;;  %v5004_v41 = vld [vmem:[%s5763_s8 + $0x40] sm:$0xff]  }
 0x3eb   : > { %v3413_v5 = vadd.f32 %v7847_v7, %v3358_v14  ;;  %v3460_v10 = vmax.f32 %v3412_v33, 0.0  ;;  %v3942_v14 = vrot.slane %v4797_v12, 1 }
 0x3ec   : > { %v3081_v60 = vpop.f32.mrb[0].mxu1 }
 0x3ed   : > { %v3461_v62 = vmax.f32 %v3413_v5, 0.0  ;;  %v3307_v50 = vadd.f32 %v8682_v58, %v3081_v60  ;;  %v3083_v28 = vpop.f32.mrb[1].mxu1  ;;  %v3944_v5 = vrot.slane %v4800_v4, 1  ;;  %v3940_v60 = vrot.slane %v4796_v51, 1 }
 0x3ee   : > { %v3084_v48 = vpop.f32.mrb[2].mxu1  ;;  %v4813_v4 = vunpack.c.h.bf16 %v5004_v41 }
 0x3ef   : > { %v3359_v36 = vadd.f32 %v3307_v50, %v8683_v21  ;;  %v3310_v47 = vadd.f32 %v8684_v53, %v3084_v48  ;;  %v3086_v17 = vpop.f32.mrb[3].mxu1  ;;  %v3486_v20 = vpack.c.bf16 %v3461_v62, %v3460_v10  ;;  %v3946_v10 = vrot.slane %v4801_v23, 1 }
 0x3f0   : > { %v3945_v58 = vsel %vm904_vm0, %v3942_v14, %v3944_v5  ;;  %v3941_v48 = vsel %vm904_vm0, %v3938_v59, %v3940_v60 }
 0x3f1   : > { %v3414_v56 = vadd.f32 %v7847_v7, %v3359_v36  ;;  %v3360_v29 = vadd.f32 %v3310_v47, %v8685_v1  ;;  %5532 = vmatprep.mubr.bf16.mxu0 %v3486_v20  ;;  %v3947_v53 = vsel %vm904_vm0, %v3944_v5, %v3946_v10  ;;  %v3958_v5 = vrot.slane %v4813_v4, 1 }
 0x3f3   : > { %v3415_v52 = vadd.f32 %v7847_v7, %v3360_v29  ;;  %v3462_v32 = vmax.f32 %v3414_v56, 0.0  ;;  %v8010_v7 = vld [vmem:[%s8169_s5] ss:$0 sm:$0xff]  ;;  %v3943_v56 = vsel %vm904_vm0, %v3940_v60, %v3942_v14 }
 0x3f5   : > { %v3463_v16 = vmax.f32 %v3415_v52, 0.0 }
 0x3f7   : > { %v3487_v37 = vpack.c.bf16 %v3463_v16, %v3462_v32  ;;  %v5002_v32 = vld [vmem:[%s5763_s8 + $0x30] sm:$0xff]   ;;  %v5003_v16 = vld [vmem:[%s5763_s8 + $0x38] sm:$0xff]  }
 0x3f8   : > { %v4805_v18 = vunpack.c.h.bf16 %v5002_v32  ;;  %v4808_v57 = vunpack.c.l.bf16 %v5003_v16  ;;  %v4804_v19 = vunpack.c.l.bf16 %v5002_v32  ;;  %v4809_v54 = vunpack.c.h.bf16 %v5003_v16  ;;  %v5006_v16 = vld [vmem:[%s5763_s8 + $0x50] sm:$0xff]  }
 0x3f9   : > { %5533 = vmatmul.mubr.bf16.gmra.mrb[16].mxu0 %v3487_v37 }
 0x3fa   : > { %v3950_v45 = vrot.slane %v4805_v18, 1  ;;  %v3952_v55 = vrot.slane %v4808_v57, 1  ;;  %v3948_v59 = vrot.slane %v4804_v19, 1  ;;  %v4821_v57 = vunpack.c.h.bf16 %v5006_v16 }
 0x41c   : > { %v5490_v61 = vpop.f32.mrb[228].mxu0 }
 0x41d   : > { %v3602_v38 = vadd.f32 %v5490_v61, %v8010_v7  ;;  %v3593_v26 = vpop.f32.mrb[229].mxu0  ;;  %v3954_v61 = vrot.slane %v4809_v54, 1 }
 0x41e   : > { %v3594_v9 = vadd.f32 %v8010_v7, %v3593_v26  ;;  %v5491_v40 = vpop.f32.mrb[230].mxu0 }
 0x41f   : > { %v4078_v44 = vadd.f32 %v3937_v46, %v3602_v38  ;;  %v3605_v39 = vadd.f32 %v5491_v40, %v8010_v7  ;;  %v3596_v3 = vpop.f32.mrb[231].mxu0  ;;  %v3953_v38 = vsel %vm904_vm0, %v3950_v45, %v3952_v55 }
 0x420   : > { %v4076_v63 = vadd.f32 %v3933_v43, %v3594_v9  ;;  %v3597_v6 = vadd.f32 %v8010_v7, %v3596_v3  ;;  %v3949_v9 = vsel %vm904_vm0, %v3946_v10, %v3948_v59 }
 0x421   : > { %v4079_v25 = vadd.f32 %v3939_v11, %v3605_v39  ;;  %v4126_v30 = vmax.f32 %v4078_v44, 0.0  ;;  %v3955_v44 = vsel %vm904_vm0, %v3952_v55, %v3954_v61  ;;  %v3966_v55 = vrot.slane %v4821_v57, 1 }
 0x422   : > { %v4077_v13 = vadd.f32 %v3935_v49, %v3597_v6  ;;  %v4124_v8 = vmax.f32 %v4076_v63, 0.0  ;;  %v3951_v63 = vsel %vm904_vm0, %v3948_v59, %v3950_v45 }
 0x423   : > { %v4127_v42 = vmax.f32 %v4079_v25, 0.0 }
 0x424   : > { %v4125_v15 = vmax.f32 %v4077_v13, 0.0  ;;  %v5005_v13 = vld [vmem:[%s5763_s8 + $0x48] sm:$0xff]  }
 0x425   : > { %v4886_v0 = vpack.c.bf16 %v4127_v42, %v4126_v30  ;;  %v4817_v14 = vunpack.c.h.bf16 %v5005_v13 }
 0x426   : > { %v4881_v33 = vpack.c.bf16 %v4125_v15, %v4124_v8 }
 0x427   : > { %5021 = vst [vmem:[%s8026_s18 + $0x8] sm:$0xff] %v4886_v0   ;;  %v4816_v0 = vunpack.c.l.bf16 %v5005_v13  ;;  %v5008_v13 = vld [vmem:[%s5763_s8 + $0x60] sm:$0xff]  }
 0x428   : > { %4882 = vst [vmem:[%s8026_s18] sm:$0xff] %v4881_v33   ;;  %v4812_v33 = vunpack.c.l.bf16 %v5004_v41 }
 0x429   : > { %v3960_v60 = vrot.slane %v4816_v0, 1  ;;  %v4829_v0 = vunpack.c.h.bf16 %v5008_v13 }
 0x42a   : > { %v3956_v10 = vrot.slane %v4812_v33, 1 }
 0x42c   : > { %v5494_v62 = vpop.f32.mrb[232].mxu0 }
 0x42d   : > { %v3618_v50 = vadd.f32 %v5494_v62, %v8010_v7  ;;  %v3609_v28 = vpop.f32.mrb[233].mxu0  ;;  %v3962_v62 = vrot.slane %v4817_v14, 1 }
 0x42e   : > { %v3610_v21 = vadd.f32 %v8010_v7, %v3609_v28  ;;  %v5495_v36 = vpop.f32.mrb[234].mxu0 }
 0x42f   : > { %v4082_v47 = vadd.f32 %v3945_v58, %v3618_v50  ;;  %v3621_v17 = vadd.f32 %v5495_v36, %v8010_v7  ;;  %v3612_v20 = vpop.f32.mrb[235].mxu0  ;;  %v3961_v50 = vsel %vm904_vm0, %v3958_v5, %v3960_v60 }
 0x430   : > { %v4080_v1 = vadd.f32 %v3941_v48, %v3610_v21  ;;  %v3613_v29 = vadd.f32 %v8010_v7, %v3612_v20  ;;  %v3957_v21 = vsel %vm904_vm0, %v3954_v61, %v3956_v10 }
 0x431   : > { %v4083_v52 = vadd.f32 %v3947_v53, %v3621_v17  ;;  %v4130_v2 = vmax.f32 %v4082_v47, 0.0  ;;  %v3963_v47 = vsel %vm904_vm0, %v3960_v60, %v3962_v62  ;;  %v3974_v60 = vrot.slane %v4829_v0, 1 }
 0x432   : > { %v4081_v37 = vadd.f32 %v3943_v56, %v3613_v29  ;;  %v4128_v24 = vmax.f32 %v4080_v1, 0.0  ;;  %v3959_v1 = vsel %vm904_vm0, %v3956_v10, %v3958_v5 }
 0x433   : > { %v4131_v34 = vmax.f32 %v4083_v52, 0.0 }
 0x434   : > { %v4129_v31 = vmax.f32 %v4081_v37, 0.0  ;;  %v5007_v37 = vld [vmem:[%s5763_s8 + $0x58] sm:$0xff]  }
 0x435   : > { %v4896_v35 = vpack.c.bf16 %v4131_v34, %v4130_v2  ;;  %v4825_v45 = vunpack.c.h.bf16 %v5007_v37 }
 0x436   : > { %v4891_v22 = vpack.c.bf16 %v4129_v31, %v4128_v24 }
 0x437   : > { %5023 = vst [vmem:[%s8026_s18 + $0x18] sm:$0xff] %v4896_v35   ;;  %v4824_v35 = vunpack.c.l.bf16 %v5007_v37  ;;  %v5010_v37 = vld [vmem:[%s5763_s8 + $0x70] sm:$0xff]  }
 0x438   : > { %5022 = vst [vmem:[%s8026_s18 + $0x10] sm:$0xff] %v4891_v22   ;;  %v4820_v22 = vunpack.c.l.bf16 %v5006_v16 }
 0x439   : > { %v3968_v59 = vrot.slane %v4824_v35, 1  ;;  %v4837_v35 = vunpack.c.h.bf16 %v5010_v37 }
 0x43a   : > { %v3964_v61 = vrot.slane %v4820_v22, 1 }
 0x43c   : > { %v5498_v46 = vpop.f32.mrb[236].mxu0 }
 0x43d   : > { %v3634_v26 = vadd.f32 %v5498_v46, %v8010_v7  ;;  %v3625_v43 = vpop.f32.mrb[237].mxu0  ;;  %v3970_v46 = vrot.slane %v4825_v45, 1 }
 0x43e   : > { %v3626_v40 = vadd.f32 %v8010_v7, %v3625_v43  ;;  %v5499_v11 = vpop.f32.mrb[238].mxu0 }
 0x43f   : > { %v4086_v39 = vadd.f32 %v3953_v38, %v3634_v26  ;;  %v3637_v3 = vadd.f32 %v5499_v11, %v8010_v7  ;;  %v3628_v49 = vpop.f32.mrb[239].mxu0  ;;  %v3969_v26 = vsel %vm904_vm0, %v3966_v55, %v3968_v59 }
 0x440   : > { %v4084_v6 = vadd.f32 %v3949_v9, %v3626_v40  ;;  %v3629_v25 = vadd.f32 %v8010_v7, %v3628_v49  ;;  %v3965_v40 = vsel %vm904_vm0, %v3962_v62, %v3964_v61 }
 0x441   : > { %v4087_v27 = vadd.f32 %v3955_v44, %v3637_v3  ;;  %v4134_v42 = vmax.f32 %v4086_v39, 0.0  ;;  %v3971_v39 = vsel %vm904_vm0, %v3968_v59, %v3970_v46  ;;  %v3982_v59 = vrot.slane %v4837_v35, 1 }
 0x442   : > { %v4085_v30 = vadd.f32 %v3951_v63, %v3629_v25  ;;  %v4132_v15 = vmax.f32 %v4084_v6, 0.0  ;;  %v3967_v6 = vsel %vm904_vm0, %v3964_v61, %v3966_v55 }
 0x443   : > { %v4135_v8 = vmax.f32 %v4087_v27, 0.0 }
 0x444   : > { %v4133_v12 = vmax.f32 %v4085_v30, 0.0  ;;  %v5009_v30 = vld [vmem:[%s5763_s8 + $0x68] sm:$0xff]  }
 0x445   : > { %v4906_v51 = vpack.c.bf16 %v4135_v8, %v4134_v42  ;;  %v4833_v5 = vunpack.c.h.bf16 %v5009_v30 }
 0x446   : > { %v4901_v23 = vpack.c.bf16 %v4133_v12, %v4132_v15 }
 0x447   : > { %5025 = vst [vmem:[%s8026_s18 + $0x28] sm:$0xff] %v4906_v51   ;;  %v4832_v51 = vunpack.c.l.bf16 %v5009_v30  ;;  %v5012_v30 = vld [vmem:[%s5763_s8 + $0x80] sm:$0xff]  }
 0x448   : > { %5024 = vst [vmem:[%s8026_s18 + $0x20] sm:$0xff] %v4901_v23   ;;  %v4828_v23 = vunpack.c.l.bf16 %v5008_v13 }
 0x449   : > { %v3976_v10 = vrot.slane %v4832_v51, 1  ;;  %v4845_v51 = vunpack.c.h.bf16 %v5012_v30 }
 0x44a   : > { %v3972_v62 = vrot.slane %v4828_v23, 1 }
 0x44c   : > { %v5502_v58 = vpop.f32.mrb[240].mxu0 }
 0x44d   : > { %v3650_v28 = vadd.f32 %v5502_v58, %v8010_v7  ;;  %v3641_v48 = vpop.f32.mrb[241].mxu0  ;;  %v3978_v58 = vrot.slane %v4833_v5, 1 }
 0x44e   : > { %v3642_v36 = vadd.f32 %v8010_v7, %v3641_v48  ;;  %v5503_v53 = vpop.f32.mrb[242].mxu0 }
 0x44f   : > { %v4090_v17 = vadd.f32 %v3961_v50, %v3650_v28  ;;  %v3653_v20 = vadd.f32 %v5503_v53, %v8010_v7  ;;  %v3644_v56 = vpop.f32.mrb[243].mxu0  ;;  %v3977_v28 = vsel %vm904_vm0, %v3974_v60, %v3976_v10 }
 0x450   : > { %v4088_v29 = vadd.f32 %v3957_v21, %v3642_v36  ;;  %v3645_v52 = vadd.f32 %v8010_v7, %v3644_v56  ;;  %v3973_v36 = vsel %vm904_vm0, %v3970_v46, %v3972_v62 }
 0x451   : > { %v4091_v32 = vadd.f32 %v3963_v47, %v3653_v20  ;;  %v4138_v34 = vmax.f32 %v4090_v17, 0.0  ;;  %v3979_v17 = vsel %vm904_vm0, %v3976_v10, %v3978_v58  ;;  %v3990_v10 = vrot.slane %v4845_v51, 1 }
 0x452   : > { %v4089_v2 = vadd.f32 %v3959_v1, %v3645_v52  ;;  %v4136_v31 = vmax.f32 %v4088_v29, 0.0  ;;  %v3975_v29 = vsel %vm904_vm0, %v3972_v62, %v3974_v60 }
 0x453   : > { %v4139_v24 = vmax.f32 %v4091_v32, 0.0 }
 0x454   : > { %v4137_v18 = vmax.f32 %v4089_v2, 0.0  ;;  %v5011_v2 = vld [vmem:[%s5763_s8 + $0x78] sm:$0xff]  }
 0x455   : > { %v4916_v19 = vpack.c.bf16 %v4139_v24, %v4138_v34  ;;  %v4841_v55 = vunpack.c.h.bf16 %v5011_v2 }
 0x456   : > { %v4911_v54 = vpack.c.bf16 %v4137_v18, %v4136_v31 }
 0x457   : > { %5027 = vst [vmem:[%s8026_s18 + $0x38] sm:$0xff] %v4916_v19   ;;  %v4840_v19 = vunpack.c.l.bf16 %v5011_v2  ;;  %v5014_v2 = vld [vmem:[%s5763_s8 + $0x90] sm:$0xff]  }
 0x458   : > { %5026 = vst [vmem:[%s8026_s18 + $0x30] sm:$0xff] %v4911_v54   ;;  %v4836_v54 = vunpack.c.l.bf16 %v5010_v37 }
 0x459   : > { %v3984_v61 = vrot.slane %v4840_v19, 1  ;;  %v4853_v19 = vunpack.c.h.bf16 %v5014_v2 }
 0x45a   : > { %v3980_v46 = vrot.slane %v4836_v54, 1 }
 0x45c   : > { %v5506_v38 = vpop.f32.mrb[244].mxu0 }
 0x45d   : > { %v3666_v43 = vadd.f32 %v5506_v38, %v8010_v7  ;;  %v3657_v9 = vpop.f32.mrb[245].mxu0  ;;  %v3986_v38 = vrot.slane %v4841_v55, 1 }
 0x45e   : > { %v3658_v11 = vadd.f32 %v8010_v7, %v3657_v9  ;;  %v5507_v44 = vpop.f32.mrb[246].mxu0 }
 0x45f   : > { %v4094_v3 = vadd.f32 %v3969_v26, %v3666_v43  ;;  %v3669_v49 = vadd.f32 %v5507_v44, %v8010_v7  ;;  %v3660_v63 = vpop.f32.mrb[247].mxu0  ;;  %v3985_v43 = vsel %vm904_vm0, %v3982_v59, %v3984_v61 }
 0x460   : > { %v4092_v25 = vadd.f32 %v3965_v40, %v3658_v11  ;;  %v3661_v27 = vadd.f32 %v8010_v7, %v3660_v63  ;;  %v3981_v11 = vsel %vm904_vm0, %v3978_v58, %v3980_v46 }
 0x461   : > { %v4095_v41 = vadd.f32 %v3971_v39, %v3669_v49  ;;  %v4142_v8 = vmax.f32 %v4094_v3, 0.0  ;;  %v3987_v3 = vsel %vm904_vm0, %v3984_v61, %v3986_v38  ;;  %v3998_v61 = vrot.slane %v4853_v19, 1 }
 0x462   : > { %v4093_v42 = vadd.f32 %v3967_v6, %v3661_v27  ;;  %v4140_v12 = vmax.f32 %v4092_v25, 0.0  ;;  %v3983_v25 = vsel %vm904_vm0, %v3980_v46, %v3982_v59 }
 0x463   : > { %v4143_v15 = vmax.f32 %v4095_v41, 0.0 }
 0x464   : > { %v4141_v4 = vmax.f32 %v4093_v42, 0.0  ;;  %v5013_v42 = vld [vmem:[%s5763_s8 + $0x88] sm:$0xff]  }
 0x465   : > { %v4926_v33 = vpack.c.bf16 %v4143_v15, %v4142_v8  ;;  %v4849_v60 = vunpack.c.h.bf16 %v5013_v42 }
 0x466   : > { %v4921_v14 = vpack.c.bf16 %v4141_v4, %v4140_v12 }
 0x467   : > { %5029 = vst [vmem:[%s8026_s18 + $0x48] sm:$0xff] %v4926_v33   ;;  %v4848_v33 = vunpack.c.l.bf16 %v5013_v42  ;;  %v5016_v42 = vld [vmem:[%s5763_s8 + $0xa0] sm:$0xff]  }
 0x468   : > { %5028 = vst [vmem:[%s8026_s18 + $0x40] sm:$0xff] %v4921_v14   ;;  %v4844_v14 = vunpack.c.l.bf16 %v5012_v30 }
 0x469   : > { %v3992_v62 = vrot.slane %v4848_v33, 1  ;;  %v4861_v33 = vunpack.c.h.bf16 %v5016_v42 }
 0x46a   : > { %v3988_v58 = vrot.slane %v4844_v14, 1 }
 0x46c   : > { %v5510_v50 = vpop.f32.mrb[248].mxu0 }
 0x46d   : > { %v3682_v48 = vadd.f32 %v5510_v50, %v8010_v7  ;;  %v3673_v21 = vpop.f32.mrb[249].mxu0  ;;  %v3994_v50 = vrot.slane %v4849_v60, 1 }
 0x46e   : > { %v3674_v53 = vadd.f32 %v8010_v7, %v3673_v21  ;;  %v5511_v47 = vpop.f32.mrb[250].mxu0 }
 0x46f   : > { %v4098_v20 = vadd.f32 %v3977_v28, %v3682_v48  ;;  %v3685_v56 = vadd.f32 %v5511_v47, %v8010_v7  ;;  %v3676_v1 = vpop.f32.mrb[251].mxu0  ;;  %v3993_v48 = vsel %vm904_vm0, %v3990_v10, %v3992_v62 }
 0x470   : > { %v4096_v52 = vadd.f32 %v3973_v36, %v3674_v53  ;;  %v3677_v32 = vadd.f32 %v8010_v7, %v3676_v1  ;;  %v3989_v53 = vsel %vm904_vm0, %v3986_v38, %v3988_v58 }
 0x471   : > { %v4099_v16 = vadd.f32 %v3979_v17, %v3685_v56  ;;  %v4146_v24 = vmax.f32 %v4098_v20, 0.0  ;;  %v3995_v20 = vsel %vm904_vm0, %v3992_v62, %v3994_v50  ;;  %v4006_v62 = vrot.slane %v4861_v33, 1 }
 0x472   : > { %v4097_v34 = vadd.f32 %v3975_v29, %v3677_v32  ;;  %v4144_v18 = vmax.f32 %v4096_v52, 0.0  ;;  %v3991_v52 = vsel %vm904_vm0, %v3988_v58, %v3990_v10 }
 0x473   : > { %v4147_v31 = vmax.f32 %v4099_v16, 0.0 }
 0x474   : > { %v4145_v57 = vmax.f32 %v4097_v34, 0.0  ;;  %v5015_v34 = vld [vmem:[%s5763_s8 + $0x98] sm:$0xff]  }
 0x475   : > { %v4936_v22 = vpack.c.bf16 %v4147_v31, %v4146_v24  ;;  %v4857_v59 = vunpack.c.h.bf16 %v5015_v34 }
 0x476   : > { %v4931_v45 = vpack.c.bf16 %v4145_v57, %v4144_v18 }
 0x477   : > { %5031 = vst [vmem:[%s8026_s18 + $0x58] sm:$0xff] %v4936_v22   ;;  %v4856_v22 = vunpack.c.l.bf16 %v5015_v34  ;;  %v5018_v34 = vld [vmem:[%s5763_s8 + $0xb0] sm:$0xff]  }
 0x478   : > { %5030 = vst [vmem:[%s8026_s18 + $0x50] sm:$0xff] %v4931_v45   ;;  %v4852_v45 = vunpack.c.l.bf16 %v5014_v2 }
 0x479   : > { %v4000_v46 = vrot.slane %v4856_v22, 1  ;;  %v4869_v22 = vunpack.c.h.bf16 %v5018_v34 }
 0x47a   : > { %v3996_v38 = vrot.slane %v4852_v45, 1 }
 0x47c   : > { %v5514_v26 = vpop.f32.mrb[252].mxu0 }
 0x47d   : > { %v3698_v9 = vadd.f32 %v5514_v26, %v8010_v7  ;;  %v3689_v40 = vpop.f32.mrb[253].mxu0  ;;  %v4002_v26 = vrot.slane %v4857_v59, 1 }
 0x47e   : > { %v3690_v44 = vadd.f32 %v8010_v7, %v3689_v40  ;;  %v5515_v39 = vpop.f32.mrb[254].mxu0 }
 0x47f   : > { %v4102_v49 = vadd.f32 %v3985_v43, %v3698_v9  ;;  %v3701_v63 = vadd.f32 %v5515_v39, %v8010_v7  ;;  %v3692_v6 = vpop.f32.mrb[255].mxu0  ;;  %v4001_v9 = vsel %vm904_vm0, %v3998_v61, %v4000_v46 }
 0x480   : > { %v4100_v27 = vadd.f32 %v3981_v11, %v3690_v44  ;;  %v3693_v41 = vadd.f32 %v8010_v7, %v3692_v6  ;;  %v3997_v44 = vsel %vm904_vm0, %v3994_v50, %v3996_v38 }
 0x481   : > { %v4103_v13 = vadd.f32 %v3987_v3, %v3701_v63  ;;  %v4150_v15 = vmax.f32 %v4102_v49, 0.0  ;;  %v4003_v49 = vsel %vm904_vm0, %v4000_v46, %v4002_v26  ;;  %v4014_v46 = vrot.slane %v4869_v22, 1 }
 0x482   : > { %v4101_v8 = vadd.f32 %v3983_v25, %v3693_v41  ;;  %v4148_v4 = vmax.f32 %v4100_v27, 0.0  ;;  %v3999_v27 = vsel %vm904_vm0, %v3996_v38, %v3998_v61 }
 0x483   : > { %v4151_v12 = vmax.f32 %v4103_v13, 0.0 }
 0x484   : > { %v4149_v0 = vmax.f32 %v4101_v8, 0.0  ;;  %v5017_v8 = vld [vmem:[%s5763_s8 + $0xa8] sm:$0xff]  }
 0x485   : > { %v4946_v23 = vpack.c.bf16 %v4151_v12, %v4150_v15  ;;  %v4865_v10 = vunpack.c.h.bf16 %v5017_v8 }
 0x486   : > { %v4941_v5 = vpack.c.bf16 %v4149_v0, %v4148_v4 }
 0x487   : > { %5033 = vst [vmem:[%s8026_s18 + $0x68] sm:$0xff] %v4946_v23   ;;  %v4864_v23 = vunpack.c.l.bf16 %v5017_v8  ;;  %v5020_v8 = vld [vmem:[%s5763_s8 + $0xc0] sm:$0xff]  }
 0x488   : > { %5032 = vst [vmem:[%s8026_s18 + $0x60] sm:$0xff] %v4941_v5   ;;  %v4860_v5 = vunpack.c.l.bf16 %v5016_v42 }
 0x489   : > { %v4008_v58 = vrot.slane %v4864_v23, 1 }
 0x48a   : > { %v4004_v50 = vrot.slane %v4860_v5, 1 }
 0x48c   : > { %v5518_v28 = vpop.f32.mrb[0].mxu0 }
 0x48d   : > { %v3714_v21 = vadd.f32 %v5518_v28, %v8010_v7  ;;  %v3705_v36 = vpop.f32.mrb[1].mxu0  ;;  %v4010_v28 = vrot.slane %v4865_v10, 1  ;;  %v4876_v10 = vunpack.c.l.bf16 %v5020_v8 }
 0x48e   : > { %v3706_v47 = vadd.f32 %v8010_v7, %v3705_v36  ;;  %v5519_v17 = vpop.f32.mrb[2].mxu0 }
 0x48f   : > { %v4106_v56 = vadd.f32 %v3993_v48, %v3714_v21  ;;  %v3717_v1 = vadd.f32 %v5519_v17, %v8010_v7  ;;  %v3708_v29 = vpop.f32.mrb[3].mxu0  ;;  %v4009_v21 = vsel %vm904_vm0, %v4006_v62, %v4008_v58 }
 0x490   : > { %v4104_v32 = vadd.f32 %v3989_v53, %v3706_v47  ;;  %v3709_v16 = vadd.f32 %v8010_v7, %v3708_v29  ;;  %v4005_v47 = vsel %vm904_vm0, %v4002_v26, %v4004_v50 }
 0x491   : > { %v4107_v37 = vadd.f32 %v3995_v20, %v3717_v1  ;;  %v4154_v31 = vmax.f32 %v4106_v56, 0.0  ;;  %v4011_v56 = vsel %vm904_vm0, %v4008_v58, %v4010_v28 }
 0x492   : > { %v4105_v24 = vadd.f32 %v3991_v52, %v3709_v16  ;;  %v4152_v57 = vmax.f32 %v4104_v32, 0.0  ;;  %v4007_v32 = vsel %vm904_vm0, %v4004_v50, %v4006_v62 }
 0x493   : > { %v4155_v18 = vmax.f32 %v4107_v37, 0.0 }
 0x494   : > { %v4153_v35 = vmax.f32 %v4105_v24, 0.0  ;;  %v5019_v24 = vld [vmem:[%s5763_s8 + $0xb8] sm:$0xff]  }
 0x495   : > { %v4956_v54 = vpack.c.bf16 %v4155_v18, %v4154_v31  ;;  %v4873_v61 = vunpack.c.h.bf16 %v5019_v24 }
 0x496   : > { %v4951_v55 = vpack.c.bf16 %v4153_v35, %v4152_v57 }
 0x497   : > { %5035 = vst [vmem:[%s8026_s18 + $0x78] sm:$0xff] %v4956_v54   ;;  %v4872_v54 = vunpack.c.l.bf16 %v5019_v24 }
 0x498   : > { %5034 = vst [vmem:[%s8026_s18 + $0x70] sm:$0xff] %v4951_v55   ;;  %v4868_v55 = vunpack.c.l.bf16 %v5018_v34 }
 0x499   : > { %v4016_v38 = vrot.slane %v4872_v54, 1 }
 0x49a   : > { %v4012_v26 = vrot.slane %v4868_v55, 1 }
 0x49c   : > { %v5522_v43 = vpop.f32.mrb[4].mxu0 }
 0x49d   : > { %v3730_v40 = vadd.f32 %v5522_v43, %v8010_v7  ;;  %v3721_v11 = vpop.f32.mrb[5].mxu0  ;;  %v4018_v43 = vrot.slane %v4873_v61, 1 }
 0x49e   : > { %v3722_v39 = vadd.f32 %v8010_v7, %v3721_v11  ;;  %v5523_v3 = vpop.f32.mrb[6].mxu0 }
 0x49f   : > { %v4110_v63 = vadd.f32 %v4001_v9, %v3730_v40  ;;  %v3733_v6 = vadd.f32 %v5523_v3, %v8010_v7  ;;  %v3724_v25 = vpop.f32.mrb[7].mxu0  ;;  %v4017_v40 = vsel %vm904_vm0, %v4014_v46, %v4016_v38 }
 0x4a0   : > { %v4108_v41 = vadd.f32 %v3997_v44, %v3722_v39  ;;  %v3725_v13 = vadd.f32 %v8010_v7, %v3724_v25  ;;  %v4013_v39 = vsel %vm904_vm0, %v4010_v28, %v4012_v26 }
 0x4a1   : > { %v4111_v30 = vadd.f32 %v4003_v49, %v3733_v6  ;;  %v4158_v12 = vmax.f32 %v4110_v63, 0.0  ;;  %v4019_v63 = vsel %vm904_vm0, %v4016_v38, %v4018_v43 }
 0x4a2   : > { %v4109_v15 = vadd.f32 %v3999_v27, %v3725_v13  ;;  %v4156_v0 = vmax.f32 %v4108_v41, 0.0  ;;  %v4015_v41 = vsel %vm904_vm0, %v4012_v26, %v4014_v46 }
 0x4a3   : > { %v4159_v4 = vmax.f32 %v4111_v30, 0.0 }
 0x4a4   : > { %v4157_v51 = vmax.f32 %v4109_v15, 0.0  ;;  %v3831_v15 = vld [vmem:[%s5763_s8 + $0xc8] sm:$0xf] }
 0x4a5   : > { %v4966_v14 = vpack.c.bf16 %v4159_v4, %v4158_v12  ;;  %v3880_v5 = vunpack.c.l.bf16 %v3831_v15 }
 0x4a6   : > { %v4961_v60 = vpack.c.bf16 %v4157_v51, %v4156_v0  ;;  %v3832_v51 = vld [vmem:[%s5763_s8 + $0xcc] sm:$0x1] }
 0x4a7   : > { %5037 = vst [vmem:[%s8026_s18 + $0x88] sm:$0xff] %v4966_v14   ;;  %v4877_v14 = vunpack.c.h.bf16 %v5020_v8  ;;  %v3881_v58 = vunpack.c.l.bf16 %v3832_v51  ;;  %v4024_v28 = vrot.slane %v3880_v5, 1 }
 0x4a8   : > { %5036 = vst [vmem:[%s8026_s18 + $0x80] sm:$0xff] %v4961_v60  }
 0x4a9   : > { %v4022_v50 = vrot.slane %v4877_v14, 1 }
 0x4ac   : > { %v5526_v48 = vpop.f32.mrb[8].mxu0 }
 0x4ad   : > { %v3746_v36 = vadd.f32 %v5526_v48, %v8010_v7  ;;  %v3737_v53 = vpop.f32.mrb[9].mxu0  ;;  %v4020_v48 = vrot.slane %v4876_v10, 1 }
 0x4ae   : > { %v3738_v17 = vadd.f32 %v8010_v7, %v3737_v53  ;;  %v5527_v20 = vpop.f32.mrb[10].mxu0  ;;  %v4025_v53 = vsel %vm904_vm0, %v4022_v50, %v4024_v28 }
 0x4af   : > { %v4114_v1 = vadd.f32 %v4009_v21, %v3746_v36  ;;  %v3749_v29 = vadd.f32 %v5527_v20, %v8010_v7  ;;  %v3740_v52 = vpop.f32.mrb[11].mxu0  ;;  %v4026_v21 = vrot.slane %v3881_v58, 1  ;;  %v4021_v20 = vsel %vm904_vm0, %v4018_v43, %v4020_v48 }
 0x4b0   : > { %v4112_v16 = vadd.f32 %v4005_v47, %v3738_v17  ;;  %v3741_v37 = vadd.f32 %v8010_v7, %v3740_v52 }
 0x4b1   : > { %v4115_v2 = vadd.f32 %v4011_v56, %v3749_v29  ;;  %v4162_v18 = vmax.f32 %v4114_v1, 0.0  ;;  %v4027_v29 = vsel %vm904_vm0, %v4024_v28, %v4026_v21 }
 0x4b2   : > { %v4113_v31 = vadd.f32 %v4007_v32, %v3741_v37  ;;  %v4160_v35 = vmax.f32 %v4112_v16, 0.0  ;;  %v4023_v37 = vsel %vm904_vm0, %v4020_v48, %v4022_v50 }
 0x4b3   : > { %v4163_v57 = vmax.f32 %v4115_v2, 0.0 }
 0x4b4   : > { %v4161_v19 = vmax.f32 %v4113_v31, 0.0 }
 0x4b5   : > { %v4976_v45 = vpack.c.bf16 %v4163_v57, %v4162_v18 }
 0x4b6   : > { %v4971_v59 = vpack.c.bf16 %v4161_v19, %v4160_v35 }
 0x4b7   : > { %5039 = vst [vmem:[%s8026_s18 + $0x98] sm:$0xff] %v4976_v45  }
 0x4b8   : > { %5038 = vst [vmem:[%s8026_s18 + $0x90] sm:$0xff] %v4971_v59  }
 0x4bc   : > { %v5530_v9 = vpop.f32.mrb[12].mxu0 }
 0x4bd   : > { %v3762_v11 = vadd.f32 %v5530_v9, %v8010_v7  ;;  %v3753_v44 = vpop.f32.mrb[13].mxu0 }
 0x4be   : > { %v3754_v3 = vadd.f32 %v8010_v7, %v3753_v44  ;;  %v5531_v49 = vpop.f32.mrb[14].mxu0 }
 0x4bf   : > { %v4118_v6 = vadd.f32 %v4017_v40, %v3762_v11  ;;  %v3765_v25 = vadd.f32 %v5531_v49, %v8010_v7  ;;  %v3756_v27 = vpop.f32.mrb[15].mxu0 }
 0x4c0   : > { %v4116_v13 = vadd.f32 %v4013_v39, %v3754_v3  ;;  %v3757_v30 = vadd.f32 %v8010_v7, %v3756_v27 }
 0x4c1   : > { %v4119_v42 = vadd.f32 %v4019_v63, %v3765_v25  ;;  %v4166_v4 = vmax.f32 %v4118_v6, 0.0 }
 0x4c2   : > { %v4117_v12 = vadd.f32 %v4015_v41, %v3757_v30  ;;  %v4164_v33 = vmax.f32 %v4116_v13, 0.0 }
 0x4c3   : > { %v4167_v0 = vmax.f32 %v4119_v42, 0.0 }
 0x4c4   : > { %v4165_v23 = vmax.f32 %v4117_v12, 0.0 }
 0x4c5   : > { %v4986_v60 = vpack.c.bf16 %v4167_v0, %v4166_v4 }
 0x4c6   : > { %v4981_v62 = vpack.c.bf16 %v4165_v23, %v4164_v33 }
 0x4c7   : > { %5041 = vst [vmem:[%s8026_s18 + $0xa8] sm:$0xff] %v4986_v60  }
 0x4c8   : > { %5040 = vst [vmem:[%s8026_s18 + $0xa0] sm:$0xff] %v4981_v62  }
 0x4cc   : > { %v5534_v36 = vpop.f32.mrb[16].mxu0 }
 0x4cd   : > { %v3778_v47 = vadd.f32 %v5534_v36, %v8010_v7  ;;  %v3769_v17 = vpop.f32.mrb[17].mxu0 }
 0x4ce   : > { %v3770_v56 = vadd.f32 %v8010_v7, %v3769_v17  ;;  %v5535_v1 = vpop.f32.mrb[18].mxu0 }
 0x4cf   : > { %v4122_v52 = vadd.f32 %v4025_v53, %v3778_v47  ;;  %v3781_v32 = vadd.f32 %v5535_v1, %v8010_v7  ;;  %v3772_v16 = vpop.f32.mrb[19].mxu0 }
 0x4d0   : > { %v4120_v2 = vadd.f32 %v4021_v20, %v3770_v56  ;;  %v3773_v34 = vadd.f32 %v8010_v7, %v3772_v16 }
 0x4d1   : > { %v4123_v24 = vadd.f32 %v4027_v29, %v3781_v32  ;;  %v4170_v18 = vmax.f32 %v4122_v52, 0.0 }
 0x4d2   : > { %v4121_v31 = vadd.f32 %v4023_v37, %v3773_v34  ;;  %v4168_v35 = vmax.f32 %v4120_v2, 0.0 }
 0x4d3   : > { %v4171_v57 = vmax.f32 %v4123_v24, 0.0 }
 0x4d4   : > { %v4169_v19 = vmax.f32 %v4121_v31, 0.0 }
 0x4d5   : > { %v4996_v22 = vpack.c.bf16 %v4171_v57, %v4170_v18 }
 0x4d6   : > { %v4991_v54 = vpack.c.bf16 %v4169_v19, %v4168_v35 }
 0x4d7   : > { %5043 = vst [vmem:[%s8026_s18 + $0xb8] sm:$0xff] %v4996_v22  }
 0x4d8   : > { %5042 = vst [vmem:[%s8026_s18 + $0xb0] sm:$0xff] %v4991_v54  }
 0x4d9 PF: > { %s16_s21 = sadd.s32 1, %s5701_s21  }
 0x4da   : > { %p13_p4 = scmp.ge.s32.totalorder %s16_s21, 4  }
 0x4dc   :  { %15 = sbr.rel (!%p13_p4) target bundleno = 1 (0x1), region = 76 }

</bundles_post_ra>
